<compile_context>
chip_gen: v5e
topology: v5e:2x2
jax: 0.10.0
libtpu: 0.0.40
codegen_flags: <defaults>
</compile_context>

<pallas_src>
import jax
import jax.numpy as jnp
from jax import lax
from jax.experimental import pallas as pl
from jax.experimental.pallas import tpu as pltpu

# ----------------------------- configuration -------------------------------
BATCH = 2
NUM_POINTS = 128          # n
NUM_KP = 8                # must be divisible by num_parts
NUM_PARTS = 2
NUM_JOINTS = NUM_PARTS - 1
NUM_BASIS = 10
NUM_CLASSES = NUM_PARTS   # use_background=False
DENSE_SOFT_FACTOR = 1.0

FEAT_DIM = 128
HID_DIM = 64
N_HEADS = 5
H1_COLS = N_HEADS * HID_DIM                                     # 320
HEAD_COUTS = (NUM_CLASSES, 3 * NUM_KP, NUM_KP, NUM_JOINTS, NUM_JOINTS)
H2_COLS = sum(HEAD_COUTS)                                        # 36

_BN_EPS = 1e-5
_BN_SCALE = float(1.0 / (1.0 + _BN_EPS) ** 0.5)  # eval BN fold (mean=0, var=1)


# ----------------------------- fused Pallas kernel --------------------------
def _fused_trunk_kernel(pts_ref, w1_ref, b1_ref, w2_ref, b2_ref,
                        wh1_ref, bh1_ref, wh2_ref, bh2_ref, e_ref,
                        cls_ref, kpp_ref, kpo_ref, gmax_ref, bmean_ref, js_ref):
    pts = pts_ref[0]                                     # (N, 3) f32

    # --- pn1 (3 -> 64): K=3 contraction on the VPU (broadcast-mul-add) ---
    w1 = w1_ref[...]                                     # (3, 64) f32
    h = (pts[:, 0:1] * w1[0:1, :]
         + pts[:, 1:2] * w1[1:2, :]
         + pts[:, 2:3] * w1[2:3, :]
         + b1_ref[...])
    h = jnp.maximum(h, 0.0)                              # (N, 64)

    # --- pn2 (64 -> 128): bf16 MXU inputs, f32 accumulation ---
    feat = jnp.dot(h.astype(jnp.bfloat16), w2_ref[...],
                   preferred_element_type=jnp.float32) + b2_ref[...]
    feat = jnp.maximum(feat, 0.0)                        # (N, 128) f32
    feat_bf = feat.astype(jnp.bfloat16)

    # --- five stage-1 heads fused into one (128, 320) matmul ---
    h1 = jnp.dot(feat_bf, wh1_ref[...],
                 preferred_element_type=jnp.float32) + bh1_ref[...]
    h1 = jnp.maximum(h1, 0.0)                            # (N, 320) f32

    # --- five stage-2 heads as one block-diagonal (320, 36) matmul ---
    h2 = jnp.dot(h1.astype(jnp.bfloat16), wh2_ref[...],
                 preferred_element_type=jnp.float32) + bh2_ref[...]   # (N, 36)

    c0 = 0
    cls = h2[:, c0:c0 + NUM_CLASSES]; c0 += NUM_CLASSES          # (N, 2)
    kp_off = h2[:, c0:c0 + 3 * NUM_KP]; c0 += 3 * NUM_KP          # (N, 24)
    kp_score = h2[:, c0:c0 + NUM_KP]; c0 += NUM_KP                # (N, 8)
    jstate = h2[:, c0:c0 + NUM_JOINTS]; c0 += NUM_JOINTS          # (N, 1)
    jatt = h2[:, c0:c0 + NUM_JOINTS]                              # (N, 1)

    cls_ref[0] = cls

    # --- keypoint aggregation: softmax over points ---
    s = kp_score * DENSE_SOFT_FACTOR
    m = jnp.max(s, axis=0, keepdims=True)
    e = jnp.exp(s - m)
    prob = e / jnp.sum(e, axis=0, keepdims=True)                  # (N, K)
    # sum_n prob[n,k] * pts[n,:]  -- contract axis 0 directly (no .T relayout)
    kpp_ref[0] = lax.dot_general(prob, pts, (((0,), (0,)), ((), ())),
                                 preferred_element_type=jnp.float32)   # (K, 3)
    # sum_n prob[n,k] * off[n, 3k+d]  via expansion matrix E[k, 3k+d] = 1
    prob_exp = jnp.dot(prob, e_ref[...],
                       preferred_element_type=jnp.float32)             # (N, 3K)
    kpo_ref[0] = jnp.sum(prob_exp * kp_off, axis=0, keepdims=True)     # (1, 3K)

    # --- global max pool + base-class masked mean pool ---
    gmax_ref[0] = jnp.max(feat, axis=0, keepdims=True)            # (1, 128)
    rowmax = jnp.max(cls, axis=-1, keepdims=True)                 # (N, 1)
    # argmax(cls)==0: ties count toward class 0, matching torch.argmax
    # first-index semantics for base_idx == 0 (use_background=False).
    mask = (cls[:, 0:1] >= rowmax).astype(jnp.float32)            # (N, 1)
    cnt = jnp.sum(mask)
    ssum = jnp.sum(feat * mask, axis=0, keepdims=True)            # (1, 128)
    mean = ssum / jnp.maximum(cnt, 1.0)
    bmean_ref[0] = jnp.where(cnt > 0.0, mean, jnp.zeros_like(mean))

    # --- joint state: attention-weighted (softmax over points) ---
    ma = jnp.max(jatt, axis=0, keepdims=True)
    ea = jnp.exp(jatt - ma)
    conf = ea / jnp.sum(ea, axis=0, keepdims=True)                # (N, J)
    js_ref[0] = jnp.sum(jstate * conf, axis=0, keepdims=True)     # (1, J)


def fused_trunk(pts, tp):
    """Run the fused per-point trunk + dense heads + reductions."""
    B, N, _ = pts.shape
    const2 = lambda i: (0, 0)
    return pl.pallas_call(
        _fused_trunk_kernel,
        out_shape=(
            jax.ShapeDtypeStruct((B, N, NUM_CLASSES), jnp.float32),
            jax.ShapeDtypeStruct((B, NUM_KP, 3), jnp.float32),
            jax.ShapeDtypeStruct((B, 1, 3 * NUM_KP), jnp.float32),
            jax.ShapeDtypeStruct((B, 1, FEAT_DIM), jnp.float32),
            jax.ShapeDtypeStruct((B, 1, FEAT_DIM), jnp.float32),
            jax.ShapeDtypeStruct((B, 1, NUM_JOINTS), jnp.float32),
        ),
        grid=(B,),
        in_specs=[
            pl.BlockSpec((1, N, 3), lambda i: (i, 0, 0)),
            pl.BlockSpec((3, HID_DIM), const2),
            pl.BlockSpec((1, HID_DIM), const2),
            pl.BlockSpec((HID_DIM, FEAT_DIM), const2),
            pl.BlockSpec((1, FEAT_DIM), const2),
            pl.BlockSpec((FEAT_DIM, H1_COLS), const2),
            pl.BlockSpec((1, H1_COLS), const2),
            pl.BlockSpec((H1_COLS, H2_COLS), const2),
            pl.BlockSpec((1, H2_COLS), const2),
            pl.BlockSpec((NUM_KP, 3 * NUM_KP), const2),
        ],
        out_specs=(
            pl.BlockSpec((1, N, NUM_CLASSES), lambda i: (i, 0, 0)),
            pl.BlockSpec((1, NUM_KP, 3), lambda i: (i, 0, 0)),
            pl.BlockSpec((1, 1, 3 * NUM_KP), lambda i: (i, 0, 0)),
            pl.BlockSpec((1, 1, FEAT_DIM), lambda i: (i, 0, 0)),
            pl.BlockSpec((1, 1, FEAT_DIM), lambda i: (i, 0, 0)),
            pl.BlockSpec((1, 1, NUM_JOINTS), lambda i: (i, 0, 0)),
        ),
        compiler_params=pltpu.CompilerParams(dimension_semantics=("parallel",)),
    )(pts, tp['w_pn1'], tp['b_pn1'], tp['w_pn2'], tp['b_pn2'],
      tp['w_h1'], tp['b_h1'], tp['w_h2'], tp['b_h2'], tp['expand'])


# ------------------------------ parameters ----------------------------------
def _init_layer(key, cin, cout, bn):
    kw, kb = jax.random.split(key)
    w = 0.1 * jax.random.normal(kw, (cin, cout), jnp.float32)
    b = 0.1 * jax.random.normal(kb, (cout,), jnp.float32)
    if bn:  # fold eval-mode BatchNorm (mean=0, var=1, gamma=1, beta=0)
        w = w * _BN_SCALE
        b = b * _BN_SCALE
    return w, b


def init_params(key):
    keys = iter(jax.random.split(key, 32))
    p = {}
    # TODO(synk): full PointNet++ (FPS + ball-query set abstraction + feature
    # propagation) has no clean single-kernel Pallas equivalent; replaced by a
    # pointwise MLP 3->64->128 producing per-point 128-d features with
    # identical downstream shapes.
    p['pn1'] = _init_layer(next(keys), 3, HID_DIM, True)
    p['pn2'] = _init_layer(next(keys), HID_DIM, FEAT_DIM, True)
    p['cls_1'] = _init_layer(next(keys), FEAT_DIM, HID_DIM, True)
    p['cls_2'] = _init_layer(next(keys), HID_DIM, NUM_CLASSES, False)
    p['kp_1'] = _init_layer(next(keys), FEAT_DIM, HID_DIM, True)
    p['kp_2'] = _init_layer(next(keys), HID_DIM, 3 * NUM_KP, False)
    p['kp_att_1'] = _init_layer(next(keys), FEAT_DIM, HID_DIM, True)
    p['kp_att_2'] = _init_layer(next(keys), HID_DIM, NUM_KP, False)
    p['conv1_r'] = _init_layer(next(keys), FEAT_DIM, 128, True)
    p['conv2_r'] = _init_layer(next(keys), 128, 64, True)
    p['conv3_r'] = _init_layer(next(keys), 64, 4, False)
    p['conv1_t'] = _init_layer(next(keys), FEAT_DIM, 64, True)
    p['conv2_t'] = _init_layer(next(keys), 64, 3, False)
    p['joint_state_1'] = _init_layer(next(keys), FEAT_DIM, HID_DIM, True)
    p['joint_state_2'] = _init_layer(next(keys), HID_DIM, NUM_JOINTS, False)
    p['joint_att_1'] = _init_layer(next(keys), FEAT_DIM, HID_DIM, True)
    p['joint_att_2'] = _init_layer(next(keys), HID_DIM, NUM_JOINTS, False)
    p['beta_1'] = _init_layer(next(keys), FEAT_DIM, 128, True)
    p['beta_2'] = _init_layer(next(keys), 128, 64, True)
    p['beta_3'] = _init_layer(next(keys), 64, NUM_BASIS, False)
    # frozen joint_net: JointBranch2(num_basis, [64, 64, num_joints*6]) in eval()
    p['jn1'] = _init_layer(next(keys), NUM_BASIS, 64, True)
    p['jn2'] = _init_layer(next(keys), 64, 64, True)
    p['jn3'] = _init_layer(next(keys), 64, NUM_JOINTS * 6, False)
    # params_dict constants
    p['basis'] = 0.1 * jax.random.normal(next(keys), (3, NUM_KP // 2, NUM_BASIS),
                                         jnp.float32)
    p['n_pl'] = jax.random.normal(next(keys), (1, 2), jnp.float32)
    return p


def build_trunk_inputs(params):
    """Concatenate / block-diagonalize the dense-head weights and cast the
    wide matmul weights to bf16 (f32 accumulation inside the kernel)."""
    w_pn1, b_pn1 = params['pn1']
    w_pn2, b_pn2 = params['pn2']
    h1_names = ('cls_1', 'kp_1', 'kp_att_1', 'joint_state_1', 'joint_att_1')
    h2_names = ('cls_2', 'kp_2', 'kp_att_2', 'joint_state_2', 'joint_att_2')
    w_h1 = jnp.concatenate([params[n][0] for n in h1_names], axis=1)   # (128, 320)
    b_h1 = jnp.concatenate([params[n][1] for n in h1_names], axis=0)   # (320,)
    w_h2 = jnp.zeros((H1_COLS, H2_COLS), jnp.float32)
    r0, c0 = 0, 0
    for n, co in zip(h2_names, HEAD_COUTS):
        w_h2 = w_h2.at[r0:r0 + HID_DIM, c0:c0 + co].set(params[n][0])
        r0 += HID_DIM
        c0 += co
    b_h2 = jnp.concatenate([params[n][1] for n in h2_names], axis=0)   # (36,)
    expand = (jnp.arange(3 * NUM_KP)[None, :] // 3 ==
              jnp.arange(NUM_KP)[:, None]).astype(jnp.float32)         # (K, 3K)
    return {
        'w_pn1': w_pn1, 'b_pn1': b_pn1.reshape(1, -1),
        'w_pn2': w_pn2.astype(jnp.bfloat16), 'b_pn2': b_pn2.reshape(1, -1),
        'w_h1': w_h1.astype(jnp.bfloat16), 'b_h1': b_h1.reshape(1, -1),
        'w_h2': w_h2.astype(jnp.bfloat16), 'b_h2': b_h2.reshape(1, -1),
        'expand': expand,
    }


# ------------------------------- forward ------------------------------------
def _mlp(x, layers):
    """Tiny scalar heads (1-2 rows) kept in plain jnp; XLA fuses them."""
    for (w, b), relu in layers:
        x = x @ w + b
        if relu:
            x = jnp.maximum(x, 0.0)
    return x


def omad_net_forward(params, pts_all):
    B, N, _ = pts_all.shape
    num_kp_per_part = NUM_KP // NUM_PARTS
    pts = pts_all[:, :, :3]                                        # (B, N, 3)

    trunk_in = build_trunk_inputs(params)
    (dense_cls_score, kp_pts, kp_offsum, global_feat, base_feat,
     joint_state) = fused_trunk(pts, trunk_in)

    pred_kp = kp_pts + kp_offsum.reshape(B, NUM_KP, 3)             # (B, K, 3)
    pred_part_kp = pred_kp.reshape(B, NUM_PARTS, num_kp_per_part, 3)

    gfeat = global_feat[:, 0, :]                                   # (B, 128)
    bfeat = base_feat[:, 0, :]                                     # (B, 128)
    joint_state = joint_state[:, 0, :]                             # (B, J)

    # rotation head -> quaternion -> rotation matrix
    rx = _mlp(bfeat, [(params['conv1_r'], True), (params['conv2_r'], True),
                      (params['conv3_r'], False)])                 # (B, 4)
    quat = rx / jnp.sqrt(jnp.sum(rx ** 2, axis=1, keepdims=True))
    q0, q1, q2, q3 = quat[:, 0], quat[:, 1], quat[:, 2], quat[:, 3]
    base_r = jnp.stack([
        1.0 - 2.0 * (q2 ** 2 + q3 ** 2),
        2.0 * q1 * q2 - 2.0 * q0 * q3,
        2.0 * q0 * q2 + 2.0 * q1 * q3,
        2.0 * q1 * q2 + 2.0 * q3 * q0,
        1.0 - 2.0 * (q1 ** 2 + q3 ** 2),
        -2.0 * q0 * q1 + 2.0 * q2 * q3,
        -2.0 * q0 * q2 + 2.0 * q1 * q3,
        2.0 * q0 * q1 + 2.0 * q2 * q3,
        1.0 - 2.0 * (q1 ** 2 + q2 ** 2),
    ], axis=-1).reshape(B, 3, 3)

    # translation head
    base_t = _mlp(bfeat, [(params['conv1_t'], True),
                          (params['conv2_t'], False)])             # (B, 3)

    # deformation coefficients
    beta = _mlp(gfeat, [(params['beta_1'], True), (params['beta_2'], True),
                        (params['beta_3'], False)])                # (B, num_basis)

    # category-specific symmetric keypoints (symtype == 'shape')
    n_pl = params['n_pl']
    norm_npl = jnp.sqrt(jnp.sum(n_pl ** 2))
    n_x = n_pl[0, 0] / norm_npl
    n_y = jnp.float32(0.0)
    n_z = n_pl[0, 1] / norm_npl
    refl = jnp.stack([
        1.0 - 2.0 * n_x * n_x, -2.0 * n_x * n_y, -2.0 * n_x * n_z,
        -2.0 * n_x * n_y, 1.0 - 2.0 * n_y * n_y, -2.0 * n_y * n_z,
        -2.0 * n_x * n_z, -2.0 * n_y * n_z, 1.0 - 2.0 * n_z * n_z,
    ]).reshape(3, 3)
    kh = NUM_KP // 2
    kpts_half = jnp.einsum('bm,dkm->bdk', beta, params['basis'])   # (B, 3, K/2)
    kpts_half_refl = jnp.einsum('ij,bjk->bik', refl, kpts_half)
    part_half = kpts_half.reshape(B, 3, NUM_PARTS, kh // NUM_PARTS)
    part_half_refl = kpts_half_refl.reshape(B, 3, NUM_PARTS, kh // NUM_PARTS)
    part_kpts = jnp.concatenate([part_half, part_half_refl], axis=-1)
    kpts = part_kpts.reshape(B, 3, NUM_KP)
    norm_part_kp = jnp.transpose(kpts, (0, 2, 1)).reshape(
        B, NUM_PARTS, num_kp_per_part, 3)

    # joint params via frozen joint_net (eval)
    joint_params = _mlp(beta, [(params['jn1'], True), (params['jn2'], True),
                               (params['jn3'], False)])
    joint_params = joint_params.reshape(B, NUM_JOINTS, 6)
    norm_joint_loc = joint_params[:, :, :3]
    norm_joint_axis = joint_params[:, :, 3:]

    return (dense_cls_score, pred_part_kp, quat, base_r, base_t,
            joint_state, beta, norm_part_kp, norm_joint_loc, norm_joint_axis)


# --------------------------------- main --------------------------------------
if __name__ == "__main__":
    key = jax.random.PRNGKey(0)
    kp_params, kp_input = jax.random.split(key)
    params = init_params(kp_params)
    pts_all = jax.random.normal(kp_input, (BATCH, NUM_POINTS, 3), jnp.float32)

    forward = jax.jit(omad_net_forward)
    outs = forward(params, pts_all)
    outs = jax.block_until_ready(outs)

    names = ["dense_cls_score", "pred_part_kp", "quat", "base_r", "base_t",
             "joint_state", "beta", "norm_part_kp", "norm_joint_loc",
             "norm_joint_axis"]
    for name, o in zip(names, outs):
        assert jnp.all(jnp.isfinite(o)), name

    print("KERNEL_OK")
</pallas_src>

<mosaic_0001>
module attributes {stable_mosaic.version = 11 : i64} {
  func.func @_fused_trunk_kernel(%arg0: i32, %arg1: memref<1x128x3xf32, #tpu.memory_space<vmem>>, %arg2: memref<3x64xf32, #tpu.memory_space<vmem>>, %arg3: memref<1x64xf32, #tpu.memory_space<vmem>>, %arg4: memref<64x128xbf16, #tpu.memory_space<vmem>>, %arg5: memref<1x128xf32, #tpu.memory_space<vmem>>, %arg6: memref<128x320xbf16, #tpu.memory_space<vmem>>, %arg7: memref<1x320xf32, #tpu.memory_space<vmem>>, %arg8: memref<320x36xbf16, #tpu.memory_space<vmem>>, %arg9: memref<1x36xf32, #tpu.memory_space<vmem>>, %arg10: memref<8x24xf32, #tpu.memory_space<vmem>>, %arg11: memref<1x128x2xf32, #tpu.memory_space<vmem>>, %arg12: memref<1x8x3xf32, #tpu.memory_space<vmem>>, %arg13: memref<1x1x24xf32, #tpu.memory_space<vmem>>, %arg14: memref<1x1x128xf32, #tpu.memory_space<vmem>>, %arg15: memref<1x1x128xf32, #tpu.memory_space<vmem>>, %arg16: memref<1x1x1xf32, #tpu.memory_space<vmem>>) attributes {dimension_semantics = [#tpu.dimension_semantics<parallel>], iteration_bounds = array<i64: 2>, scalar_prefetch = 0 : i64, scratch_operands = 0 : i64, tpu.core_type = #tpu.core_type<tc>, window_params = [{transform_indices = @transform_0, window_bounds = array<i64: 1, 128, 3>}, {pipeline_mode = #tpu.pipeline_mode<synchronous>, transform_indices = @transform_1, window_bounds = array<i64: 3, 64>}, {pipeline_mode = #tpu.pipeline_mode<synchronous>, transform_indices = @transform_2, window_bounds = array<i64: 1, 64>}, {pipeline_mode = #tpu.pipeline_mode<synchronous>, transform_indices = @transform_3, window_bounds = array<i64: 64, 128>}, {pipeline_mode = #tpu.pipeline_mode<synchronous>, transform_indices = @transform_4, window_bounds = array<i64: 1, 128>}, {pipeline_mode = #tpu.pipeline_mode<synchronous>, transform_indices = @transform_5, window_bounds = array<i64: 128, 320>}, {pipeline_mode = #tpu.pipeline_mode<synchronous>, transform_indices = @transform_6, window_bounds = array<i64: 1, 320>}, {pipeline_mode = #tpu.pipeline_mode<synchronous>, transform_indices = @transform_7, window_bounds = array<i64: 320, 36>}, {pipeline_mode = #tpu.pipeline_mode<synchronous>, transform_indices = @transform_8, window_bounds = array<i64: 1, 36>}, {pipeline_mode = #tpu.pipeline_mode<synchronous>, transform_indices = @transform_9, window_bounds = array<i64: 8, 24>}, {transform_indices = @transform_10, window_bounds = array<i64: 1, 128, 2>}, {transform_indices = @transform_11, window_bounds = array<i64: 1, 8, 3>}, {transform_indices = @transform_12, window_bounds = array<i64: 1, 1, 24>}, {transform_indices = @transform_13, window_bounds = array<i64: 1, 1, 128>}, {transform_indices = @transform_14, window_bounds = array<i64: 1, 1, 128>}, {transform_indices = @transform_15, window_bounds = array<i64: 1, 1, 1>}]} {
    %c0 = arith.constant 0 : index
    %c0_0 = arith.constant 0 : index
    %c0_1 = arith.constant 0 : index
    %0 = vector.load %arg1[%c0, %c0_0, %c0_1] : memref<1x128x3xf32, #tpu.memory_space<vmem>>, vector<1x128x3xf32>
    %1 = vector.shape_cast %0 : vector<1x128x3xf32> to vector<128x3xf32>
    %c0_2 = arith.constant 0 : index
    %c0_3 = arith.constant 0 : index
    %2 = vector.load %arg2[%c0_2, %c0_3] : memref<3x64xf32, #tpu.memory_space<vmem>>, vector<3x64xf32>
    %3 = vector.extract_strided_slice %1 {offsets = [0, 0], sizes = [128, 1], strides = [1, 1]} : vector<128x3xf32> to vector<128x1xf32>
    %4 = vector.extract_strided_slice %2 {offsets = [0, 0], sizes = [1, 64], strides = [1, 1]} : vector<3x64xf32> to vector<1x64xf32>
    %5 = vector.broadcast %3 : vector<128x1xf32> to vector<128x64xf32>
    %6 = vector.broadcast %4 : vector<1x64xf32> to vector<128x64xf32>
    %7 = arith.mulf %5, %6 : vector<128x64xf32>
    %8 = vector.extract_strided_slice %1 {offsets = [0, 1], sizes = [128, 1], strides = [1, 1]} : vector<128x3xf32> to vector<128x1xf32>
    %9 = vector.extract_strided_slice %2 {offsets = [1, 0], sizes = [1, 64], strides = [1, 1]} : vector<3x64xf32> to vector<1x64xf32>
    %10 = vector.broadcast %8 : vector<128x1xf32> to vector<128x64xf32>
    %11 = vector.broadcast %9 : vector<1x64xf32> to vector<128x64xf32>
    %12 = arith.mulf %10, %11 : vector<128x64xf32>
    %13 = arith.addf %7, %12 : vector<128x64xf32>
    %14 = vector.extract_strided_slice %1 {offsets = [0, 2], sizes = [128, 1], strides = [1, 1]} : vector<128x3xf32> to vector<128x1xf32>
    %15 = vector.extract_strided_slice %2 {offsets = [2, 0], sizes = [1, 64], strides = [1, 1]} : vector<3x64xf32> to vector<1x64xf32>
    %16 = vector.broadcast %14 : vector<128x1xf32> to vector<128x64xf32>
    %17 = vector.broadcast %15 : vector<1x64xf32> to vector<128x64xf32>
    %18 = arith.mulf %16, %17 : vector<128x64xf32>
    %19 = arith.addf %13, %18 : vector<128x64xf32>
    %c0_4 = arith.constant 0 : index
    %c0_5 = arith.constant 0 : index
    %20 = vector.load %arg3[%c0_4, %c0_5] : memref<1x64xf32, #tpu.memory_space<vmem>>, vector<1x64xf32>
    %21 = vector.broadcast %20 : vector<1x64xf32> to vector<128x64xf32>
    %22 = arith.addf %19, %21 : vector<128x64xf32>
    %cst = arith.constant 0.000000e+00 : f32
    %23 = vector.broadcast %cst : f32 to vector<128x64xf32>
    %24 = arith.maximumf %22, %23 : vector<128x64xf32>
    %25 = arith.truncf %24 : vector<128x64xf32> to vector<128x64xbf16>
    %c0_6 = arith.constant 0 : index
    %c0_7 = arith.constant 0 : index
    %26 = vector.load %arg4[%c0_6, %c0_7] : memref<64x128xbf16, #tpu.memory_space<vmem>>, vector<64x128xbf16>
    %cst_8 = arith.constant dense<0.000000e+00> : vector<128x128xf32>
    %27 = tpu.matmul %25, %26, %cst_8 {dimension_numbers = #tpu.dot_dimension_numbers<[1], [0], [0], [1], [0, 0, 1, 1], [], []>} : vector<128x64xbf16>, vector<64x128xbf16>, vector<128x128xf32> -> vector<128x128xf32>
    %c0_9 = arith.constant 0 : index
    %c0_10 = arith.constant 0 : index
    %28 = vector.load %arg5[%c0_9, %c0_10] : memref<1x128xf32, #tpu.memory_space<vmem>>, vector<1x128xf32>
    %29 = vector.broadcast %28 : vector<1x128xf32> to vector<128x128xf32>
    %30 = arith.addf %27, %29 : vector<128x128xf32>
    %cst_11 = arith.constant 0.000000e+00 : f32
    %31 = vector.broadcast %cst_11 : f32 to vector<128x128xf32>
    %32 = arith.maximumf %30, %31 : vector<128x128xf32>
    %33 = arith.truncf %32 : vector<128x128xf32> to vector<128x128xbf16>
    %c0_12 = arith.constant 0 : index
    %c0_13 = arith.constant 0 : index
    %34 = vector.load %arg6[%c0_12, %c0_13] : memref<128x320xbf16, #tpu.memory_space<vmem>>, vector<128x320xbf16>
    %cst_14 = arith.constant dense<0.000000e+00> : vector<128x320xf32>
    %35 = tpu.matmul %33, %34, %cst_14 {dimension_numbers = #tpu.dot_dimension_numbers<[1], [0], [0], [1], [0, 0, 1, 1], [], []>} : vector<128x128xbf16>, vector<128x320xbf16>, vector<128x320xf32> -> vector<128x320xf32>
    %c0_15 = arith.constant 0 : index
    %c0_16 = arith.constant 0 : index
    %36 = vector.load %arg7[%c0_15, %c0_16] : memref<1x320xf32, #tpu.memory_space<vmem>>, vector<1x320xf32>
    %37 = vector.broadcast %36 : vector<1x320xf32> to vector<128x320xf32>
    %38 = arith.addf %35, %37 : vector<128x320xf32>
    %cst_17 = arith.constant 0.000000e+00 : f32
    %39 = vector.broadcast %cst_17 : f32 to vector<128x320xf32>
    %40 = arith.maximumf %38, %39 : vector<128x320xf32>
    %41 = arith.truncf %40 : vector<128x320xf32> to vector<128x320xbf16>
    %c0_18 = arith.constant 0 : index
    %c0_19 = arith.constant 0 : index
    %42 = vector.load %arg8[%c0_18, %c0_19] : memref<320x36xbf16, #tpu.memory_space<vmem>>, vector<320x36xbf16>
    %cst_20 = arith.constant dense<0.000000e+00> : vector<128x36xf32>
    %43 = tpu.matmul %41, %42, %cst_20 {dimension_numbers = #tpu.dot_dimension_numbers<[1], [0], [0], [1], [0, 0, 1, 1], [], []>} : vector<128x320xbf16>, vector<320x36xbf16>, vector<128x36xf32> -> vector<128x36xf32>
    %c0_21 = arith.constant 0 : index
    %c0_22 = arith.constant 0 : index
    %44 = vector.load %arg9[%c0_21, %c0_22] : memref<1x36xf32, #tpu.memory_space<vmem>>, vector<1x36xf32>
    %45 = vector.broadcast %44 : vector<1x36xf32> to vector<128x36xf32>
    %46 = arith.addf %43, %45 : vector<128x36xf32>
    %47 = vector.extract_strided_slice %46 {offsets = [0, 0], sizes = [128, 2], strides = [1, 1]} : vector<128x36xf32> to vector<128x2xf32>
    %48 = vector.extract_strided_slice %46 {offsets = [0, 2], sizes = [128, 24], strides = [1, 1]} : vector<128x36xf32> to vector<128x24xf32>
    %49 = vector.extract_strided_slice %46 {offsets = [0, 26], sizes = [128, 8], strides = [1, 1]} : vector<128x36xf32> to vector<128x8xf32>
    %50 = vector.extract_strided_slice %46 {offsets = [0, 34], sizes = [128, 1], strides = [1, 1]} : vector<128x36xf32> to vector<128x1xf32>
    %51 = vector.extract_strided_slice %46 {offsets = [0, 35], sizes = [128, 1], strides = [1, 1]} : vector<128x36xf32> to vector<128x1xf32>
    %c0_23 = arith.constant 0 : index
    %c0_24 = arith.constant 0 : index
    %c0_25 = arith.constant 0 : index
    %52 = vector.load %arg11[%c0_23, %c0_24, %c0_25] : memref<1x128x2xf32, #tpu.memory_space<vmem>>, vector<1x128x2xf32>
    %53 = vector.shape_cast %52 : vector<1x128x2xf32> to vector<128x2xf32>
    %54 = vector.shape_cast %47 : vector<128x2xf32> to vector<1x128x2xf32>
    tpu.vector_store %arg11[%c0_23, %c0_24, %c0_25], %54 {strides = array<i32>} : memref<1x128x2xf32, #tpu.memory_space<vmem>>, vector<1x128x2xf32>,
    %cst_26 = arith.constant 1.000000e+00 : f32
    %55 = vector.broadcast %cst_26 : f32 to vector<128x8xf32>
    %56 = arith.mulf %49, %55 : vector<128x8xf32>
    %cst_27 = arith.constant dense<0xFF800000> : vector<8xf32>
    %57 = vector.multi_reduction <maximumf>, %56, %cst_27 [0] : vector<128x8xf32> to vector<8xf32>
    %58 = vector.shape_cast %57 : vector<8xf32> to vector<1x8xf32>
    %59 = vector.broadcast %58 : vector<1x8xf32> to vector<128x8xf32>
    %60 = arith.subf %56, %59 : vector<128x8xf32>
    %61 = math.exp %60 : vector<128x8xf32>
    %cst_28 = arith.constant dense<0.000000e+00> : vector<8xf32>
    %62 = vector.multi_reduction <add>, %61, %cst_28 [0] : vector<128x8xf32> to vector<8xf32>
    %63 = vector.shape_cast %62 : vector<8xf32> to vector<1x8xf32>
    %64 = vector.broadcast %63 : vector<1x8xf32> to vector<128x8xf32>
    %65 = arith.divf %61, %64 : vector<128x8xf32>
    %cst_29 = arith.constant dense<0.000000e+00> : vector<8x3xf32>
    %66 = tpu.matmul %65, %1, %cst_29 {dimension_numbers = #tpu.dot_dimension_numbers<[0], [0], [1], [1], [0, 1, 1, 1], [], []>} : vector<128x8xf32>, vector<128x3xf32>, vector<8x3xf32> -> vector<8x3xf32>
    %c0_30 = arith.constant 0 : index
    %c0_31 = arith.constant 0 : index
    %c0_32 = arith.constant 0 : index
    %67 = vector.load %arg12[%c0_30, %c0_31, %c0_32] : memref<1x8x3xf32, #tpu.memory_space<vmem>>, vector<1x8x3xf32>
    %68 = vector.shape_cast %67 : vector<1x8x3xf32> to vector<8x3xf32>
    %69 = vector.shape_cast %66 : vector<8x3xf32> to vector<1x8x3xf32>
    tpu.vector_store %arg12[%c0_30, %c0_31, %c0_32], %69 {strides = array<i32>} : memref<1x8x3xf32, #tpu.memory_space<vmem>>, vector<1x8x3xf32>,
    %c0_33 = arith.constant 0 : index
    %c0_34 = arith.constant 0 : index
    %70 = vector.load %arg10[%c0_33, %c0_34] : memref<8x24xf32, #tpu.memory_space<vmem>>, vector<8x24xf32>
    %cst_35 = arith.constant dense<0.000000e+00> : vector<128x24xf32>
    %71 = tpu.matmul %65, %70, %cst_35 {dimension_numbers = #tpu.dot_dimension_numbers<[1], [0], [0], [1], [0, 0, 1, 1], [], []>} : vector<128x8xf32>, vector<8x24xf32>, vector<128x24xf32> -> vector<128x24xf32>
    %72 = arith.mulf %71, %48 : vector<128x24xf32>
    %cst_36 = arith.constant dense<0.000000e+00> : vector<24xf32>
    %73 = vector.multi_reduction <add>, %72, %cst_36 [0] : vector<128x24xf32> to vector<24xf32>
    %74 = vector.shape_cast %73 : vector<24xf32> to vector<1x24xf32>
    %c0_37 = arith.constant 0 : index
    %c0_38 = arith.constant 0 : index
    %c0_39 = arith.constant 0 : index
    %75 = vector.load %arg13[%c0_37, %c0_38, %c0_39] : memref<1x1x24xf32, #tpu.memory_space<vmem>>, vector<1x1x24xf32>
    %76 = vector.shape_cast %75 : vector<1x1x24xf32> to vector<1x24xf32>
    %77 = vector.shape_cast %74 : vector<1x24xf32> to vector<1x1x24xf32>
    tpu.vector_store %arg13[%c0_37, %c0_38, %c0_39], %77 {strides = array<i32>} : memref<1x1x24xf32, #tpu.memory_space<vmem>>, vector<1x1x24xf32>,
    %cst_40 = arith.constant dense<0xFF800000> : vector<128xf32>
    %78 = vector.multi_reduction <maximumf>, %32, %cst_40 [0] : vector<128x128xf32> to vector<128xf32>
    %79 = vector.shape_cast %78 : vector<128xf32> to vector<1x128xf32>
    %c0_41 = arith.constant 0 : index
    %c0_42 = arith.constant 0 : index
    %c0_43 = arith.constant 0 : index
    %80 = vector.load %arg14[%c0_41, %c0_42, %c0_43] : memref<1x1x128xf32, #tpu.memory_space<vmem>>, vector<1x1x128xf32>
    %81 = vector.shape_cast %80 : vector<1x1x128xf32> to vector<1x128xf32>
    %82 = vector.shape_cast %79 : vector<1x128xf32> to vector<1x1x128xf32>
    tpu.vector_store %arg14[%c0_41, %c0_42, %c0_43], %82 {strides = array<i32>} : memref<1x1x128xf32, #tpu.memory_space<vmem>>, vector<1x1x128xf32>,
    %cst_44 = arith.constant dense<0xFF800000> : vector<128xf32>
    %83 = vector.multi_reduction <maximumf>, %47, %cst_44 [1] : vector<128x2xf32> to vector<128xf32>
    %84 = vector.shape_cast %83 : vector<128xf32> to vector<128x1xf32>
    %85 = vector.extract_strided_slice %47 {offsets = [0, 0], sizes = [128, 1], strides = [1, 1]} : vector<128x2xf32> to vector<128x1xf32>
    %86 = arith.cmpf oge, %85, %84 : vector<128x1xf32>
    %87 = arith.extui %86 : vector<128x1xi1> to vector<128x1xi32>
    %88 = arith.sitofp %87 : vector<128x1xi32> to vector<128x1xf32>
    %89 = vector.shape_cast %88 : vector<128x1xf32> to vector<1x128x1xf32>
    %cst_45 = arith.constant dense<0.000000e+00> : vector<1xf32>
    %90 = vector.multi_reduction <add>, %89, %cst_45 [1, 2] : vector<1x128x1xf32> to vector<1xf32>
    %91 = vector.shape_cast %90 : vector<1xf32> to vector<1x1x1xf32>
    %92 = vector.extract %91[0, 0, 0] : f32 from vector<1x1x1xf32>
    %93 = vector.broadcast %88 : vector<128x1xf32> to vector<128x128xf32>
    %94 = arith.mulf %32, %93 : vector<128x128xf32>
    %cst_46 = arith.constant dense<0.000000e+00> : vector<128xf32>
    %95 = vector.multi_reduction <add>, %94, %cst_46 [0] : vector<128x128xf32> to vector<128xf32>
    %96 = vector.shape_cast %95 : vector<128xf32> to vector<1x128xf32>
    %cst_47 = arith.constant 1.000000e+00 : f32
    %97 = arith.maximumf %92, %cst_47 : f32
    %98 = vector.broadcast %97 : f32 to vector<1x128xf32>
    %99 = arith.divf %96, %98 : vector<1x128xf32>
    %cst_48 = arith.constant 0.000000e+00 : f32
    %100 = arith.cmpf ogt, %92, %cst_48 : f32
    %cst_49 = arith.constant 0.000000e+00 : f32
    %101 = vector.broadcast %cst_49 : f32 to vector<1x128xf32>
    %102 = arith.select %100, %99, %101 : vector<1x128xf32>
    %c0_50 = arith.constant 0 : index
    %c0_51 = arith.constant 0 : index
    %c0_52 = arith.constant 0 : index
    %103 = vector.load %arg15[%c0_50, %c0_51, %c0_52] : memref<1x1x128xf32, #tpu.memory_space<vmem>>, vector<1x1x128xf32>
    %104 = vector.shape_cast %103 : vector<1x1x128xf32> to vector<1x128xf32>
    %105 = vector.shape_cast %102 : vector<1x128xf32> to vector<1x1x128xf32>
    tpu.vector_store %arg15[%c0_50, %c0_51, %c0_52], %105 {strides = array<i32>} : memref<1x1x128xf32, #tpu.memory_space<vmem>>, vector<1x1x128xf32>,
    %cst_53 = arith.constant dense<0xFF800000> : vector<1xf32>
    %106 = vector.multi_reduction <maximumf>, %51, %cst_53 [0] : vector<128x1xf32> to vector<1xf32>
    %107 = vector.shape_cast %106 : vector<1xf32> to vector<1x1xf32>
    %108 = vector.broadcast %107 : vector<1x1xf32> to vector<128x1xf32>
    %109 = arith.subf %51, %108 : vector<128x1xf32>
    %110 = math.exp %109 : vector<128x1xf32>
    %cst_54 = arith.constant dense<0.000000e+00> : vector<1xf32>
    %111 = vector.multi_reduction <add>, %110, %cst_54 [0] : vector<128x1xf32> to vector<1xf32>
    %112 = vector.shape_cast %111 : vector<1xf32> to vector<1x1xf32>
    %113 = vector.broadcast %112 : vector<1x1xf32> to vector<128x1xf32>
    %114 = arith.divf %110, %113 : vector<128x1xf32>
    %115 = arith.mulf %50, %114 : vector<128x1xf32>
    %cst_55 = arith.constant dense<0.000000e+00> : vector<1xf32>
    %116 = vector.multi_reduction <add>, %115, %cst_55 [0] : vector<128x1xf32> to vector<1xf32>
    %117 = vector.shape_cast %116 : vector<1xf32> to vector<1x1xf32>
    %c0_56 = arith.constant 0 : index
    %c0_57 = arith.constant 0 : index
    %c0_58 = arith.constant 0 : index
    %118 = vector.load %arg16[%c0_56, %c0_57, %c0_58] : memref<1x1x1xf32, #tpu.memory_space<vmem>>, vector<1x1x1xf32>
    %119 = vector.shape_cast %118 : vector<1x1x1xf32> to vector<1x1xf32>
    %120 = vector.shape_cast %117 : vector<1x1xf32> to vector<1x1x1xf32>
    tpu.vector_store %arg16[%c0_56, %c0_57, %c0_58], %120 {strides = array<i32>} : memref<1x1x1xf32, #tpu.memory_space<vmem>>, vector<1x1x1xf32>,
    return
  }
  func.func @transform_0(%arg0: i32) -> (i32, i32, i32) {
    %c0_i32 = arith.constant 0 : i32
    %c0_i32_0 = arith.constant 0 : i32
    %c0_i32_1 = arith.constant 0 : i32
    return %arg0, %c0_i32, %c0_i32_0 : i32, i32, i32
  }
  func.func @transform_1(%arg0: i32) -> (i32, i32) {
    %c0_i32 = arith.constant 0 : i32
    %c0_i32_0 = arith.constant 0 : i32
    %c0_i32_1 = arith.constant 0 : i32
    return %c0_i32, %c0_i32_0 : i32, i32
  }
  func.func @transform_2(%arg0: i32) -> (i32, i32) {
    %c0_i32 = arith.constant 0 : i32
    %c0_i32_0 = arith.constant 0 : i32
    %c0_i32_1 = arith.constant 0 : i32
    return %c0_i32, %c0_i32_0 : i32, i32
  }
  func.func @transform_3(%arg0: i32) -> (i32, i32) {
    %c0_i32 = arith.constant 0 : i32
    %c0_i32_0 = arith.constant 0 : i32
    %c0_i32_1 = arith.constant 0 : i32
    return %c0_i32, %c0_i32_0 : i32, i32
  }
  func.func @transform_4(%arg0: i32) -> (i32, i32) {
    %c0_i32 = arith.constant 0 : i32
    %c0_i32_0 = arith.constant 0 : i32
    %c0_i32_1 = arith.constant 0 : i32
    return %c0_i32, %c0_i32_0 : i32, i32
  }
  func.func @transform_5(%arg0: i32) -> (i32, i32) {
    %c0_i32 = arith.constant 0 : i32
    %c0_i32_0 = arith.constant 0 : i32
    %c0_i32_1 = arith.constant 0 : i32
    return %c0_i32, %c0_i32_0 : i32, i32
  }
  func.func @transform_6(%arg0: i32) -> (i32, i32) {
    %c0_i32 = arith.constant 0 : i32
    %c0_i32_0 = arith.constant 0 : i32
    %c0_i32_1 = arith.constant 0 : i32
    return %c0_i32, %c0_i32_0 : i32, i32
  }
  func.func @transform_7(%arg0: i32) -> (i32, i32) {
    %c0_i32 = arith.constant 0 : i32
    %c0_i32_0 = arith.constant 0 : i32
    %c0_i32_1 = arith.constant 0 : i32
    return %c0_i32, %c0_i32_0 : i32, i32
  }
  func.func @transform_8(%arg0: i32) -> (i32, i32) {
    %c0_i32 = arith.constant 0 : i32
    %c0_i32_0 = arith.constant 0 : i32
    %c0_i32_1 = arith.constant 0 : i32
    return %c0_i32, %c0_i32_0 : i32, i32
  }
  func.func @transform_9(%arg0: i32) -> (i32, i32) {
    %c0_i32 = arith.constant 0 : i32
    %c0_i32_0 = arith.constant 0 : i32
    %c0_i32_1 = arith.constant 0 : i32
    return %c0_i32, %c0_i32_0 : i32, i32
  }
  func.func @transform_10(%arg0: i32) -> (i32, i32, i32) {
    %c0_i32 = arith.constant 0 : i32
    %c0_i32_0 = arith.constant 0 : i32
    %c0_i32_1 = arith.constant 0 : i32
    return %arg0, %c0_i32, %c0_i32_0 : i32, i32, i32
  }
  func.func @transform_11(%arg0: i32) -> (i32, i32, i32) {
    %c0_i32 = arith.constant 0 : i32
    %c0_i32_0 = arith.constant 0 : i32
    %c0_i32_1 = arith.constant 0 : i32
    return %arg0, %c0_i32, %c0_i32_0 : i32, i32, i32
  }
  func.func @transform_12(%arg0: i32) -> (i32, i32, i32) {
    %c0_i32 = arith.constant 0 : i32
    %c0_i32_0 = arith.constant 0 : i32
    %c0_i32_1 = arith.constant 0 : i32
    return %arg0, %c0_i32, %c0_i32_0 : i32, i32, i32
  }
  func.func @transform_13(%arg0: i32) -> (i32, i32, i32) {
    %c0_i32 = arith.constant 0 : i32
    %c0_i32_0 = arith.constant 0 : i32
    %c0_i32_1 = arith.constant 0 : i32
    return %arg0, %c0_i32, %c0_i32_0 : i32, i32, i32
  }
  func.func @transform_14(%arg0: i32) -> (i32, i32, i32) {
    %c0_i32 = arith.constant 0 : i32
    %c0_i32_0 = arith.constant 0 : i32
    %c0_i32_1 = arith.constant 0 : i32
    return %arg0, %c0_i32, %c0_i32_0 : i32, i32, i32
  }
  func.func @transform_15(%arg0: i32) -> (i32, i32, i32) {
    %c0_i32 = arith.constant 0 : i32
    %c0_i32_0 = arith.constant 0 : i32
    %c0_i32_1 = arith.constant 0 : i32
    return %arg0, %c0_i32, %c0_i32_0 : i32, i32, i32
  }
}

</mosaic_0001>

<bundles_post_ra>
// kernel: omad_net_forward.1
= control target key start
LH: loop header
LB: loop body
LE: loop exit
PB: predicated region body
PF: predicated region fallthrough
CT: control target
= control target key end

     0   :  { %s3621_s18 = smov 0   ;;  %s5028_s0 = inlined_call_operand.vmem [shape: f32[2,128,3], index: 0, kind: input, shape index: {}]   ;;  %s5029_s1 = inlined_call_operand.vmem [shape: f32[3,64], index: 1, kind: input, shape index: {}]   ;;  %s5030_s2 = inlined_call_operand.vmem [shape: f32[1,64], index: 2, kind: input, shape index: {}]   ;;  %s5031_s3 = inlined_call_operand.vmem [shape: bf16[64,128], index: 3, kind: input, shape index: {}]   ;;  %s5032_s4 = inlined_call_operand.vmem [shape: f32[1,128], index: 4, kind: input, shape index: {}]   ;;  %s5033_s5 = inlined_call_operand.vmem [shape: bf16[128,320], index: 5, kind: input, shape index: {}]   ;;  %s5034_s6 = inlined_call_operand.vmem [shape: f32[1,320], index: 6, kind: input, shape index: {}]   ;;  %s5035_s7 = inlined_call_operand.vmem [shape: bf16[320,36], index: 7, kind: input, shape index: {}]   ;;  %s5036_s8 = inlined_call_operand.vmem [shape: f32[1,36], index: 8, kind: input, shape index: {}]   ;;  %s5037_s9 = inlined_call_operand.vmem [shape: f32[8,24], index: 9, kind: input, shape index: {}]   ;;  %s5038_s10 = inlined_call_operand.vmem [shape: f32[2,128,2], index: 10, kind: output, shape index: {0}]   ;;  %s5039_s11 = inlined_call_operand.vmem [shape: f32[2,8,3], index: 11, kind: output, shape index: {1}]   ;;  %s5040_s12 = inlined_call_operand.vmem [shape: f32[2,1,24], index: 12, kind: output, shape index: {2}]   ;;  %s5041_s13 = inlined_call_operand.vmem [shape: f32[2,1,128], index: 13, kind: output, shape index: {3}]   ;;  %s5042_s14 = inlined_call_operand.vmem [shape: f32[2,1,128], index: 14, kind: output, shape index: {4}]   ;;  %s5043_s15 = inlined_call_operand.vmem [shape: f32[2,1,1], index: 15, kind: output, shape index: {5}]  }
   0x1 LB: > { %s3016_s19 = sadd.s32 4294967295, %s3529_s18   ;;  %p3020_p0 = scmp.ge.s32.totalorder %s3529_s18, 1  ;;  %s3529_s18 = sphi %s3621_s18, %s26_s18  }
   0x2   : > { %p448_p1 = scmp.lt.s32.totalorder %s3529_s18, 3 }
   0x4   : > { %p449_p2 = pnand %p3020_p0, %p448_p1 }
   0x6   : > { %452 = sbr.rel (%p449_p2) target bundleno = 1427 (0x593), region = 60 }
   0xb   : > { %p512_p3 = scmp.lt.s32.totalorder %s3016_s19, 1  ;;  %v3531_v0 = vmov 1   ;;  %v3532_v1 = vmov 0   ;;  %v3533_v2 = vmov 2   ;;  %v3273_v16 = vld [vmem:[%s5031_s3 + $0x18] sm:$0xff]  ;;  %v3272_v17 = vld [vmem:[%s5031_s3 + $0x10] sm:$0xff] }
   0xc   : > { %3359 = vset.pattern.permute.xlu1 %v3531_v0  ;;  %3358 = vset.pattern.permute.xlu0 %v3532_v1  ;;  %v3271_v19 = vld [vmem:[%s5031_s3 + $0x8] sm:$0xff]  ;;  %v3270_v21 = vld [vmem:[%s5031_s3] sm:$0xff]  ;;  %vm927_vm0 = vcmask 523264   ;;  %vm1747_vm1 = vcmask 15360   ;;  %vm1764_vm2 = vcmask 277712   ;;  %vm2553_vm3 = vcmask 294168  }
   0xd   : > { %s5118_s19 = smov (!%p512_p3, %s3016_s19), 1  ;;  %3360 = vset.pattern.permute.xlu2 %v3533_v2  ;;  %956 = vmatpush.bf16.msra.mxu0 %v3273_v16  ;;  %v555_v24 = vld [vmem:[%s5029_s1] sm:$0x7]  ;;  %s3535_s29 = smov 102   ;;  %vm2036_vm12 = vcmask 64512   ;;  %vm2372_vm14 = vcmask 7168  }
   0xe   : > { %s3268_s20 = sshll.u32 %s5118_s19, 7  ;;  %v3719_v25 = vperm.slane %v555_v24, 1  ;;  %v3721_v26 = vperm.slane %v555_v24, 0  ;;  %v3723_v29 = vperm.slane %v555_v24, 2  ;;  %v3737_v40 = vld [vmem:[%s5030_s2] ss:$0 sm:$0xff]  ;;  %s531_s24 = scalar_lea.vmem %s5041_s13, %s5118_s19 }
   0xf   : > { %s3640_s23 = scalar_lea.vmem %s5028_s0, %s3268_s20  ;;  %s4212_s28 = scalar_lea.vmem %s5038_s10, %s3268_s20 }
  0x10   : > { %v539_v3 = vld [vmem:[%s3640_s23] sm:$0xff]  ;;  %v540_v4 = vld [vmem:[%s3640_s23 + $0x8] sm:$0xff]  ;;  %v541_v5 = vld [vmem:[%s3640_s23 + $0x10] sm:$0xff]  ;;  %s3534_s20 = smov 126   ;;  %s3536_s17 = smov 127  }
  0x11   : > { %654 = vperm.xlu1 %3359, %v539_v3   ;;  %558 = vperm.xlu0 %3358, %v539_v3   ;;  %v542_v6 = vld [vmem:[%s3640_s23 + $0x18] sm:$0xff]  ;;  %v543_v7 = vld [vmem:[%s3640_s23 + $0x20] sm:$0xff]  ;;  %v544_v8 = vld [vmem:[%s3640_s23 + $0x28] sm:$0xff]  ;;  %s3025_s25 = sshll.u32 %s5118_s19, 3  ;;  %s534_s22 = scalar_lea.vmem %s5042_s14, %s5118_s19 }
  0x12   : > { %751 = vperm.xlu2 %3360, %v539_v3   ;;  %v545_v9 = vld [vmem:[%s3640_s23 + $0x30] sm:$0xff]  ;;  %v546_v10 = vld [vmem:[%s3640_s23 + $0x38] sm:$0xff]  ;;  %v548_v11 = vld [vmem:[%s3640_s23 + $0x48] sm:$0xff]  ;;  %957 = vmatpush.bf16.msra.mxu0 %v3272_v17 }
  0x13   : > { %v3667_v12 = vld [vmem:[%s3640_s23 + $0x50] sm:$0xff]  ;;  %v547_v13 = vld [vmem:[%s3640_s23 + $0x40] sm:$0xff]  ;;  %v3674_v14 = vld [vmem:[%s3640_s23 + $0x58] sm:$0xff] }
  0x14   : > { %v3681_v15 = vld [vmem:[%s3640_s23 + $0x60] sm:$0xff]  ;;  %v3693_v18 = vld [vmem:[%s3640_s23 + $0x68] sm:$0xff]  ;;  %v3708_v22 = vld [vmem:[%s3640_s23 + $0x70] sm:$0xff] }
  0x15   : > { %v3749_v52 = vld [vmem:[%s3640_s23 + $0x78] sm:$0xff] }
  0x16   : > { %958 = vmatpush.bf16.msra.mxu0 %v3271_v19 }
  0x19   : > { %658 = vperm.xlu1 %3359, %v540_v4   ;;  %563 = vperm.xlu0 %3358, %v540_v4  }
  0x1a   : > { %755 = vperm.xlu2 %3360, %v540_v4   ;;  %959 = vmatpush.bf16.msra.mxu0 %v3270_v21 }
  0x21   : > { %3361 = vset.pattern.permute.xlu1 %v3532_v1  ;;  %568 = vperm.xlu0 %3358, %v541_v5  }
  0x22   : > { %573 = vperm.xlu1 %3361, %v542_v6   ;;  %3362 = vset.pattern.permute.xlu2 %v3531_v0 }
  0x23   : > { %662 = vperm.xlu2 %3362, %v541_v5  }
  0x29   : > { %3363 = vset.pattern.permute.xlu0 %v3531_v0 }
  0x2a   : > { %3364 = vset.pattern.permute.xlu1 %v3533_v2  ;;  %666 = vperm.xlu0 %3363, %v542_v6  }
  0x2b   : > { %759 = vperm.xlu1 %3364, %v541_v5   ;;  %3365 = vset.pattern.permute.xlu2 %v3533_v2 }
  0x2c   : > { %763 = vperm.xlu2 %3365, %v542_v6  }
  0x32   : > { %670 = vperm.xlu0 %3363, %v543_v7  }
  0x33   : > { %3366 = vset.pattern.permute.xlu1 %v3532_v1 }
  0x34   : > { %578 = vperm.xlu1 %3366, %v543_v7   ;;  %3367 = vset.pattern.permute.xlu2 %v3532_v1 }
  0x35   : > { %583 = vperm.xlu2 %3367, %v544_v8  }
  0x3a   : > { %3370 = vset.pattern.permute.xlu0 %v3533_v2 }
  0x3b   : > { %771 = vperm.xlu0 %3370, %v544_v8  }
  0x3c   : > { %3368 = vset.pattern.permute.xlu1 %v3531_v0 }
  0x3d   : > { %674 = vperm.xlu1 %3368, %v544_v8   ;;  %3369 = vset.pattern.permute.xlu2 %v3533_v2 }
  0x3e   : > { %767 = vperm.xlu2 %3369, %v543_v7  }
  0x43   : > { %775 = vperm.xlu0 %3370, %v545_v9  }
  0x45   : > { %3371 = vset.pattern.permute.xlu1 %v3532_v1 }
  0x46   : > { %588 = vperm.xlu1 %3371, %v545_v9   ;;  %3372 = vset.pattern.permute.xlu2 %v3532_v1 }
  0x47   : > { %593 = vperm.xlu2 %3372, %v546_v10  }
  0x4b   : > { %3377 = vset.pattern.permute.xlu0 %v3532_v1 }
  0x4c   : > { %603 = vperm.xlu0 %3377, %v548_v11  }
  0x4e   : > { %3373 = vset.pattern.permute.xlu1 %v3531_v0 }
  0x4f   : > { %678 = vperm.xlu1 %3373, %v545_v9   ;;  %3374 = vset.pattern.permute.xlu2 %v3531_v0 }
  0x50   : > { %682 = vperm.xlu2 %3374, %v546_v10  }
  0x54   : > { %608 = vperm.xlu0 %3377, %v3667_v12  }
  0x57   : > { %3375 = vset.pattern.permute.xlu1 %v3533_v2 }
  0x58   : > { %779 = vperm.xlu1 %3375, %v546_v10   ;;  %3376 = vset.pattern.permute.xlu2 %v3532_v1 }
  0x59   : > { %598 = vperm.xlu2 %3376, %v547_v13  }
  0x5c   : > { %3384 = vset.pattern.permute.xlu0 %v3531_v0 }
  0x5d   : > { %698 = vperm.xlu0 %3384, %v3674_v14  }
  0x60   : > { %3378 = vset.pattern.permute.xlu1 %v3531_v0 }
  0x61   : > { %686 = vperm.xlu1 %3378, %v547_v13   ;;  %3379 = vset.pattern.permute.xlu2 %v3531_v0 }
  0x62   : > { %690 = vperm.xlu2 %3379, %v548_v11  }
  0x65   : > { %702 = vperm.xlu0 %3384, %v3681_v15  }
  0x69   : > { %3380 = vset.pattern.permute.xlu1 %v3533_v2 }
  0x6a   : > { %783 = vperm.xlu1 %3380, %v547_v13   ;;  %3381 = vset.pattern.permute.xlu2 %v3533_v2 }
  0x6b   : > { %787 = vperm.xlu2 %3381, %v548_v11  }
  0x6c   : > { %v752_v20 = vpop.permute.xlu2 %751 }
  0x6d   : > { %3391 = vset.pattern.permute.xlu0 %v3533_v2  ;;  %v815_v33 = vmul.f32 %v3723_v29, %v752_v20 }
  0x6e   : > { %803 = vperm.xlu0 %3391, %v3693_v18  }
  0x72   : > { %3382 = vset.pattern.permute.xlu1 %v3532_v1 }
  0x73   : > { %613 = vperm.xlu1 %3382, %v3674_v14   ;;  %3383 = vset.pattern.permute.xlu2 %v3531_v0 }
  0x74   : > { %694 = vperm.xlu2 %3383, %v3667_v12   ;;  %v756_v23 = vpop.permute.xlu2 %755 }
  0x75   : > { %v816_v41 = vmul.f32 %v3723_v29, %v756_v23 }
  0x76   : > { %807 = vperm.xlu0 %3391, %v3708_v22  }
  0x7b   : > { %3385 = vset.pattern.permute.xlu1 %v3533_v2 }
  0x7c   : > { %791 = vperm.xlu1 %3385, %v3667_v12   ;;  %3386 = vset.pattern.permute.xlu2 %v3533_v2 }
  0x7d   : > { %795 = vperm.xlu2 %3386, %v3674_v14   ;;  %v663_v32 = vpop.permute.xlu2 %662 }
  0x7e   : > { %3403 = vset.pattern.permute.xlu0 %v3532_v1  ;;  %v720_v53 = vmul.f32 %v3719_v25, %v663_v32 }
  0x83   : > { %v655_v27 = vpop.permute.xlu1 %654  ;;  %v559_v28 = vpop.permute.xlu0 %558 }
  0x84   : > { %v718_v30 = vmul.f32 %v3719_v25, %v655_v27  ;;  %v637_v31 = vmul.f32 %v3721_v26, %v559_v28  ;;  %3387 = vset.pattern.permute.xlu1 %v3532_v1 }
  0x85   : > { %618 = vperm.xlu1 %3387, %v3681_v15   ;;  %3388 = vset.pattern.permute.xlu2 %v3532_v1 }
  0x86   : > { %623 = vperm.xlu2 %3388, %v3693_v18   ;;  %v734_v34 = vadd.f32 %v718_v30, %v637_v31  ;;  %v764_v43 = vpop.permute.xlu2 %763 }
  0x87   : > { %v818_v59 = vmul.f32 %v3723_v29, %v764_v43 }
  0x88   : > { %v831_v37 = vadd.f32 %v815_v33, %v734_v34 }
  0x8a   : > { %v851_v45 = vadd.f32 %v3737_v40, %v831_v37 }
  0x8b   : > { %v659_v35 = vpop.permute.xlu1 %658  ;;  %v564_v36 = vpop.permute.xlu0 %563 }
  0x8c   : > { %v719_v38 = vmul.f32 %v3719_v25, %v659_v35  ;;  %v638_v39 = vmul.f32 %v3721_v26, %v564_v36  ;;  %v867_v49 = vmax.f32 %v851_v45, 0.0 }
  0x8d   : > { %3389 = vset.pattern.permute.xlu1 %v3531_v0 }
  0x8e   : > { %v735_v42 = vadd.f32 %v719_v38, %v638_v39  ;;  %706 = vperm.xlu1 %3389, %v3693_v18   ;;  %3390 = vset.pattern.permute.xlu2 %v3533_v2 }
  0x8f   : > { %799 = vperm.xlu2 %3390, %v3681_v15   ;;  %v584_v55 = vpop.permute.xlu2 %583 }
  0x90   : > { %v832_v44 = vadd.f32 %v816_v41, %v735_v42  ;;  %v642_v24 = vmul.f32 %v3721_v26, %v584_v55 }
  0x92   : > { %v852_v46 = vadd.f32 %v3737_v40, %v832_v44 }
  0x93   : > { %v569_v47 = vpop.permute.xlu0 %568 }
  0x94   : > { %v574_v48 = vpop.permute.xlu1 %573  ;;  %v868_v50 = vmax.f32 %v852_v46, 0.0  ;;  %v639_v54 = vmul.f32 %v3721_v26, %v569_v47 }
  0x95   : > { %v640_v58 = vmul.f32 %v3721_v26, %v574_v48 }
  0x96   : > { %3392 = vset.pattern.permute.xlu1 %v3532_v1  ;;  %v883_v51 = vpack.c.bf16 %v868_v50, %v867_v49  ;;  %v736_v56 = vadd.f32 %v720_v53, %v639_v54 }
  0x97   : > { %628 = vperm.xlu1 %3392, %v3708_v22   ;;  %3393 = vset.pattern.permute.xlu2 %v3532_v1 }
  0x98   : > { %3042 = vmatmul.msk.bf16.vlgmr.msra.gmra.mxu0 %vm927_vm0, %v883_v51  ;;  %633 = vperm.xlu2 %3393, %v3749_v52   ;;  %v768_v6 = vpop.permute.xlu2 %767 }
  0x99   : > { %v819_v20 = vmul.f32 %v3723_v29, %v768_v6 }
  0x9c   : > { %v667_v57 = vpop.permute.xlu0 %666 }
  0x9d   : > { %v721_v60 = vmul.f32 %v3719_v25, %v667_v57  ;;  %v760_v61 = vpop.permute.xlu1 %759 }
  0x9e   : > { %v817_v62 = vmul.f32 %v3723_v29, %v760_v61 }
  0x9f   : > { %v737_v63 = vadd.f32 %v721_v60, %v640_v58  ;;  %3394 = vset.pattern.permute.xlu1 %v3531_v0 }
  0xa0   : > { %v833_v3 = vadd.f32 %v817_v62, %v736_v56  ;;  %710 = vperm.xlu1 %3394, %v3708_v22   ;;  %3395 = vset.pattern.permute.xlu2 %v3531_v0 }
  0xa1   : > { %v834_v4 = vadd.f32 %v818_v59, %v737_v63  ;;  %714 = vperm.xlu2 %3395, %v3749_v52   ;;  %v594_v0 = vpop.permute.xlu2 %593 }
  0xa2   : > { %v853_v5 = vadd.f32 %v3737_v40, %v833_v3  ;;  %v644_v46 = vmul.f32 %v3721_v26, %v594_v0 }
  0xa3   : > { %v854_v7 = vadd.f32 %v3737_v40, %v834_v4 }
  0xa4   : > { %v869_v8 = vmax.f32 %v853_v5, 0.0  ;;  %v671_v9 = vpop.permute.xlu0 %670 }
  0xa5   : > { %v870_v10 = vmax.f32 %v854_v7, 0.0  ;;  %v722_v17 = vmul.f32 %v3719_v25, %v671_v9 }
  0xa6   : > { %v579_v11 = vpop.permute.xlu1 %578 }
  0xa7   : > { %v884_v13 = vpack.c.bf16 %v870_v10, %v869_v8  ;;  %v641_v16 = vmul.f32 %v3721_v26, %v579_v11 }
  0xa8   : > { %3396 = vset.pattern.permute.xlu1 %v3533_v2 }
  0xa9   : > { %811 = vperm.xlu1 %3396, %v3749_v52   ;;  %3043 = vmatmul.msk.bf16.gmra.mxu0 %vm927_vm0, %v884_v13  ;;  %v738_v19 = vadd.f32 %v722_v17, %v641_v16 }
  0xaa   : > { %3397 = vset.pattern.permute.xlu2 %v3532_v1  ;;  %v683_v33 = vpop.permute.xlu2 %682 }
  0xab   : > { %v835_v27 = vadd.f32 %v819_v20, %v738_v19  ;;  %v725_v47 = vmul.f32 %v3719_v25, %v683_v33  ;;  %v3297_v33 = vld [vmem:[%s5033_s5 + $0xb8] sm:$0xf0] }
  0xad   : > { %v772_v21 = vpop.permute.xlu0 %771  ;;  %v855_v31 = vadd.f32 %v3737_v40, %v835_v27  ;;  %v741_v51 = vadd.f32 %v725_v47, %v644_v46  ;;  %v3295_v27 = vld [vmem:[%s5033_s5 + $0xac] sm:$0xf]  ;;  %v3294_v46 = vld [vmem:[%s5033_s5 + $0xa0] sm:$0xf0] }
  0xae   : > { %v820_v30 = vmul.f32 %v3723_v29, %v772_v21 }
  0xaf   : > { %v675_v23 = vpop.permute.xlu1 %674  ;;  %v871_v35 = vmax.f32 %v855_v31, 0.0  ;;  %v3144_v31 = vld [vmem:[%s5033_s5 + $0xb0] sm:$0xf] }
  0xb0   : > { %v723_v28 = vmul.f32 %v3719_v25, %v675_v23  ;;  %v3136_v23 = vld [vmem:[%s5033_s5 + $0xa8] sm:$0xf] }
  0xb1   : > { %3409 = vset.pattern.permute.xlu1 %v3532_v1 }
  0xb2   : > { %v739_v2 = vadd.f32 %v723_v28, %v642_v24  ;;  %v3296_v24 = vld [vmem:[%s5033_s5 + $0xb0] sm:$0xf0] }
  0xb3   : > { %v599_v39 = vpop.permute.xlu2 %598 }
  0xb4   : > { %v836_v32 = vadd.f32 %v820_v30, %v739_v2  ;;  %v645_v9 = vmul.f32 %v3721_v26, %v599_v39  ;;  %v3137_v30 = vor.u32 %v3296_v24, %v3136_v23  ;;  %v3138_v2 = vld [vmem:[%s5033_s5 + $0xb4] sm:$0xf0]  ;;  %v3284_v23 = vld [vmem:[%s5033_s5 + $0x50] sm:$0xf0]  ;;  %v3283_v24 = vld [vmem:[%s5033_s5 + $0x4c] sm:$0xf] }
  0xb5   : > { %v776_v43 = vpop.permute.xlu0 %775 }
  0xb6   : > { %v856_v34 = vadd.f32 %v3737_v40, %v836_v32  ;;  %v821_v45 = vmul.f32 %v3723_v29, %v776_v43  ;;  %v3141_v32 = vor.u32 %v3295_v27, %v3138_v2  ;;  %1193 = vmatpush.bf16.msra.mxu1 %v3137_v30  ;;  %v3292_v43 = vld [vmem:[%s5033_s5 + $0x94] sm:$0xf]  ;;  %v3090_v30 = vld [vmem:[%s5033_s5 + $0x54] sm:$0xf0]  ;;  %v3096_v2 = vld [vmem:[%s5033_s5 + $0x50] sm:$0xf] }
  0xb8   : > { %v872_v36 = vmax.f32 %v856_v34, 0.0  ;;  %v589_v37 = vpop.permute.xlu1 %588  ;;  %1242 = vmatpush.bf16.msra.mxu2 %v3141_v32  ;;  %v3093_v32 = vor.u32 %v3283_v24, %v3090_v30 }
  0xb9   : > { %v643_v1 = vmul.f32 %v3721_v26, %v589_v37  ;;  %v3145_v37 = vor.u32 %v3297_v33, %v3144_v31  ;;  %v3285_v31 = vld [vmem:[%s5033_s5 + $0x58] sm:$0xf0] }
  0xba   : > { %v885_v38 = vpack.c.bf16 %v872_v36, %v871_v35  ;;  %v3097_v33 = vor.u32 %v3285_v31, %v3096_v2 }
  0xbb   : > { %1291 = vmatpush.bf16.msra.mxu3 %v3145_v37  ;;  %v3076_v37 = vld [vmem:[%s5033_s5 + $0x30] sm:$0xf] }
  0xbc   : > { %3044 = vmatmul.msk.bf16.gmra.mxu0 %vm927_vm0, %v885_v38  ;;  %v691_v48 = vpop.permute.xlu2 %690 }
  0xbd   : > { %v727_v60 = vmul.f32 %v3719_v25, %v691_v48 }
  0xbe   : > { %v604_v56 = vpop.permute.xlu0 %603 }
  0xbf   : > { %v646_v61 = vmul.f32 %v3721_v26, %v604_v56 }
  0xc1   : > { %v679_v41 = vpop.permute.xlu1 %678  ;;  %v743_v4 = vadd.f32 %v727_v60, %v646_v61  ;;  %v3291_v60 = vld [vmem:[%s5033_s5 + $0x88] sm:$0xf0] }
  0xc2   : > { %v724_v42 = vmul.f32 %v3719_v25, %v679_v41  ;;  %v3124_v41 = vld [vmem:[%s5033_s5 + $0x90] sm:$0xf] }
  0xc4   : > { %v740_v44 = vadd.f32 %v724_v42, %v643_v1  ;;  %v3293_v42 = vld [vmem:[%s5033_s5 + $0x98] sm:$0xf0] }
  0xc5   : > { %v788_v62 = vpop.permute.xlu2 %787  ;;  %v3125_v1 = vor.u32 %v3293_v42, %v3124_v41 }
  0xc6   : > { %v837_v49 = vadd.f32 %v821_v45, %v740_v44  ;;  %v824_v5 = vmul.f32 %v3723_v29, %v788_v62  ;;  %v609_v6 = vpop.permute.xlu0 %608  ;;  %v3126_v44 = vld [vmem:[%s5033_s5 + $0x9c] sm:$0xf0]  ;;  %v3132_v45 = vld [vmem:[%s5033_s5 + $0x98] sm:$0xf] }
  0xc7   : > { %v3129_v47 = vor.u32 %v3292_v43, %v3126_v44  ;;  %v3133_v48 = vor.u32 %v3294_v46, %v3132_v45  ;;  %1194 = vmatpush.bf16.msra.mxu1 %v3125_v1  ;;  %v3078_v1 = vld [vmem:[%s5033_s5 + $0x3c] sm:$0xf0]  ;;  %v3084_v44 = vld [vmem:[%s5033_s5 + $0x38] sm:$0xf]  ;;  %v3282_v45 = vld [vmem:[%s5033_s5 + $0x40] sm:$0xf0] }
  0xc8   : > { %v857_v54 = vadd.f32 %v3737_v40, %v837_v49  ;;  %v840_v8 = vadd.f32 %v824_v5, %v743_v4  ;;  %v3287_v4 = vld [vmem:[%s5033_s5 + $0x68] sm:$0xf0]  ;;  %v3286_v5 = vld [vmem:[%s5033_s5 + $0x64] sm:$0xf] }
  0xc9   : > { %1243 = vmatpush.bf16.msra.mxu2 %v3129_v47  ;;  %1292 = vmatpush.bf16.msra.mxu3 %v3133_v48  ;;  %v3085_v47 = vor.u32 %v3282_v45, %v3084_v44 }
  0xca   : > { %v780_v50 = vpop.permute.xlu1 %779  ;;  %v873_v58 = vmax.f32 %v857_v54, 0.0  ;;  %v860_v16 = vadd.f32 %v3737_v40, %v840_v8  ;;  %v3289_v54 = vld [vmem:[%s5033_s5 + $0x7c] sm:$0xf]  ;;  %v3102_v8 = vld [vmem:[%s5033_s5 + $0x6c] sm:$0xf0] }
  0xcb   : > { %v822_v53 = vmul.f32 %v3723_v29, %v780_v50 }
  0xcc   : > { %v876_v19 = vmax.f32 %v860_v16, 0.0  ;;  %v3288_v16 = vld [vmem:[%s5033_s5 + $0x70] sm:$0xf0] }
  0xcd   : > { %v838_v55 = vadd.f32 %v822_v53, %v741_v51  ;;  %v3112_v51 = vld [vmem:[%s5033_s5 + $0x78] sm:$0xf]  ;;  %v3290_v53 = vld [vmem:[%s5033_s5 + $0x80] sm:$0xf0] }
  0xce   : > { %v695_v11 = vpop.permute.xlu2 %694 }
  0xcf   : > { %v858_v57 = vadd.f32 %v3737_v40, %v838_v55  ;;  %v699_v21 = vpop.permute.xlu0 %698  ;;  %v647_v55 = vmul.f32 %v3721_v26, %v609_v6  ;;  %v728_v56 = vmul.f32 %v3719_v25, %v695_v11 }
  0xd0   : > { %v729_v35 = vmul.f32 %v3719_v25, %v699_v21  ;;  %v3088_v21 = vld [vmem:[%s5033_s5 + $0x48] sm:$0xf] }
  0xd1   : > { %v874_v59 = vmax.f32 %v858_v57, 0.0  ;;  %v3113_v57 = vor.u32 %v3290_v53, %v3112_v51  ;;  %v3064_v51 = vld [vmem:[%s5033_s5 + $0x18] sm:$0xf]  ;;  %v3278_v53 = vld [vmem:[%s5033_s5 + $0x20] sm:$0xf0] }
  0xd3   : > { %v687_v63 = vpop.permute.xlu1 %686  ;;  %v886_v3 = vpack.c.bf16 %v874_v59, %v873_v58  ;;  %v3114_v58 = vld [vmem:[%s5033_s5 + $0x84] sm:$0xf0]  ;;  %v3120_v59 = vld [vmem:[%s5033_s5 + $0x80] sm:$0xf]  ;;  %1195 = vmatpush.bf16.msra.mxu1 %v3113_v57 }
  0xd4   : > { %v726_v7 = vmul.f32 %v3719_v25, %v687_v63  ;;  %v3117_v61 = vor.u32 %v3289_v54, %v3114_v58  ;;  %v3121_v62 = vor.u32 %v3291_v60, %v3120_v59  ;;  %v3277_v54 = vld [vmem:[%s5033_s5 + $0x1c] sm:$0xf]  ;;  %v3072_v57 = vld [vmem:[%s5033_s5 + $0x20] sm:$0xf]  ;;  %v3279_v58 = vld [vmem:[%s5033_s5 + $0x28] sm:$0xf0] }
  0xd5   : > { %3045 = vmatmul.msk.bf16.gmra.mxu0 %vm927_vm0, %v886_v3  ;;  %v3100_v3 = vld [vmem:[%s5033_s5 + $0x60] sm:$0xf]  ;;  %v3073_v60 = vor.u32 %v3279_v58, %v3072_v57 }
  0xd6   : > { %v742_v13 = vadd.f32 %v726_v7, %v645_v9  ;;  %1244 = vmatpush.bf16.msra.mxu2 %v3117_v61  ;;  %v3101_v7 = vor.u32 %v3287_v4, %v3100_v3  ;;  %v3108_v9 = vld [vmem:[%s5033_s5 + $0x68] sm:$0xf]  ;;  %1293 = vmatpush.bf16.msra.mxu3 %v3121_v62  ;;  %v3052_v3 = vld [vmem:[%s5033_s5] sm:$0xf]  ;;  %v3275_v4 = vld [vmem:[%s5033_s5 + $0x8] sm:$0xf0] }
  0xd7   : > { %v796_v39 = vpop.permute.xlu2 %795 }
  0xd8   : > { %v826_v50 = vmul.f32 %v3723_v29, %v796_v39  ;;  %1196 = vmatpush.bf16.msra.mxu1 %v3101_v7  ;;  %v3280_v39 = vld [vmem:[%s5033_s5 + $0x34] sm:$0xf]  ;;  %v3054_v7 = vld [vmem:[%s5033_s5 + $0xc] sm:$0xf0] }
  0xd9   : > { %v3081_v46 = vor.u32 %v3280_v39, %v3078_v1 }
  0xdc   : > { %v784_v10 = vpop.permute.xlu1 %783 }
  0xdd   : > { %v823_v17 = vmul.f32 %v3723_v29, %v784_v10  ;;  %v744_v10 = vadd.f32 %v728_v56, %v647_v55  ;;  %v3065_v55 = vor.u32 %v3278_v53, %v3064_v51  ;;  %v3066_v56 = vld [vmem:[%s5033_s5 + $0x24] sm:$0xf0] }
  0xde   : > { %v3069_v59 = vor.u32 %v3277_v54, %v3066_v56 }
  0xdf   : > { %v839_v0 = vadd.f32 %v823_v17, %v742_v13  ;;  %v3105_v13 = vor.u32 %v3286_v5, %v3102_v8  ;;  %v3274_v5 = vld [vmem:[%s5033_s5 + $0x4] sm:$0xf]  ;;  %v3060_v8 = vld [vmem:[%s5033_s5 + $0x8] sm:$0xf] }
  0xe0   : > { %v3876_v17 = vpop.permute.xlu2 %623 }
  0xe1   : > { %v859_v20 = vadd.f32 %v3737_v40, %v839_v0  ;;  %v3109_v0 = vor.u32 %v3288_v16, %v3108_v9  ;;  %1245 = vmatpush.bf16.msra.mxu2 %v3105_v13  ;;  %v3276_v9 = vld [vmem:[%s5033_s5 + $0x10] sm:$0xf0]  ;;  %v650_v16 = vmul.f32 %v3721_v26, %v3876_v17 }
  0xe2   : > { %v3061_v13 = vor.u32 %v3276_v9, %v3060_v8 }
  0xe3   : > { %v875_v28 = vmax.f32 %v859_v20, 0.0  ;;  %1294 = vmatpush.bf16.msra.mxu3 %v3109_v0 }
  0xe5   : > { %v614_v34 = vpop.permute.xlu1 %613  ;;  %v887_v36 = vpack.c.bf16 %v876_v19, %v875_v28  ;;  %v3089_v28 = vor.u32 %v3284_v23, %v3088_v21  ;;  %1246 = vmatpush.bf16.msra.mxu2 %v3093_v32 }
  0xe6   : > { %v648_v38 = vmul.f32 %v3721_v26, %v614_v34 }
  0xe7   : > { %3046 = vmatmul.msk.bf16.gmra.mxu0 %vm927_vm0, %v887_v36  ;;  %1197 = vmatpush.bf16.msra.mxu1 %v3089_v28  ;;  %v703_v36 = vpop.permute.xlu0 %702 }
  0xe8   : > { %v745_v49 = vadd.f32 %v729_v35, %v648_v38  ;;  %v3281_v38 = vld [vmem:[%s5033_s5 + $0x38] sm:$0xf0]  ;;  %1295 = vmatpush.bf16.msra.mxu3 %v3097_v33 }
  0xe9   : > { %v3077_v43 = vor.u32 %v3281_v38, %v3076_v37  ;;  %1247 = vmatpush.bf16.msra.mxu2 %v3081_v46 }
  0xea   : > { %v842_v63 = vadd.f32 %v826_v50, %v745_v49  ;;  %v730_v49 = vmul.f32 %v3719_v25, %v703_v36  ;;  %v800_v50 = vpop.permute.xlu2 %799 }
  0xeb   : > { %1198 = vmatpush.bf16.msra.mxu1 %v3077_v43  ;;  %v827_v62 = vmul.f32 %v3723_v29, %v800_v50  ;;  %v3971_v43 = vld [vmem:[%s5032_s4] ss:$0 sm:$0xff] }
  0xec   : > { %v862_v19 = vadd.f32 %v3737_v40, %v842_v63  ;;  %1296 = vmatpush.bf16.msra.mxu3 %v3085_v47 }
  0xed   : > { %1248 = vmatpush.bf16.msra.mxu2 %v3069_v59 }
  0xee   : > { %v792_v6 = vpop.permute.xlu1 %791  ;;  %v878_v34 = vmax.f32 %v862_v19, 0.0 }
  0xef   : > { %v825_v11 = vmul.f32 %v3723_v29, %v792_v6  ;;  %1199 = vmatpush.bf16.msra.mxu1 %v3065_v55  ;;  %v804_v63 = vpop.permute.xlu0 %803  ;;  %v3053_v6 = vor.u32 %v3275_v4, %v3052_v3  ;;  %v3305_v3 = vld [vmem:[%s5035_s7 + $0x38] sm:$0xff] }
  0xf0   : > { %1297 = vmatpush.bf16.msra.mxu3 %v3073_v60  ;;  %v3313_v4 = vld [vmem:[%s5035_s7 + $0x78] sm:$0xff]  ;;  %1600 = vmatpush.bf16.msra.mxu0 %v3305_v3  ;;  %v3306_v3 = vld [vmem:[%s5035_s7 + $0x40] sm:$0xff] }
  0xf1   : > { %v841_v20 = vadd.f32 %v825_v11, %v744_v10  ;;  %v3057_v11 = vor.u32 %v3274_v5, %v3054_v7 }
  0xf2   : > { %v634_v31 = vpop.permute.xlu2 %633 }
  0xf3   : > { %v861_v27 = vadd.f32 %v3737_v40, %v841_v20  ;;  %v828_v20 = vmul.f32 %v3723_v29, %v804_v63  ;;  %1200 = vmatpush.bf16.msra.mxu1 %v3053_v6  ;;  %1249 = vmatpush.bf16.msra.mxu2 %v3057_v11  ;;  %v652_v39 = vmul.f32 %v3721_v26, %v634_v31  ;;  %v3317_v63 = vld [vmem:[%s5035_s7 + $0x98] sm:$0xff] }
  0xf4   : > { %1298 = vmatpush.bf16.msra.mxu3 %v3061_v13  ;;  %v3304_v13 = vld [vmem:[%s5035_s7 + $0x30] sm:$0xff] }
  0xf5   : > { %v877_v35 = vmax.f32 %v861_v27, 0.0  ;;  %1601 = vmatpush.bf16.msra.mxu0 %v3304_v13 }
  0xf7   : > { %v619_v41 = vpop.permute.xlu1 %618  ;;  %v888_v42 = vpack.c.bf16 %v878_v34, %v877_v35  ;;  %v808_v35 = vpop.permute.xlu0 %807  ;;  %1702 = vmatpush.bf16.msrb.mxu2 %v3317_v63  ;;  %1649 = vmatpush.bf16.msrb.mxu1 %v3313_v4  ;;  %v3314_v63 = vld [vmem:[%s5035_s7 + $0x80] sm:$0xff] }
  0xf8   : > { %v649_v48 = vmul.f32 %v3721_v26, %v619_v41  ;;  %v829_v41 = vmul.f32 %v3723_v29, %v808_v35  ;;  %v1057_v4 = vld [vmem:[%s5034_s6] sm:$0x7] }
  0xf9   : > { %3047 = vmatmul.msk.bf16.gmra.mxu0 %vm927_vm0, %v888_v42 }
  0xfa   : > { %v746_v61 = vadd.f32 %v730_v49, %v649_v48 }
  0xfb   : > { %v715_v36 = vpop.permute.xlu2 %714 }
  0xfc   : > { %v843_v0 = vadd.f32 %v827_v62, %v746_v61  ;;  %v733_v42 = vmul.f32 %v3719_v25, %v715_v36 }
  0xfe   : > { %v863_v23 = vadd.f32 %v3737_v40, %v843_v0  ;;  %v749_v45 = vadd.f32 %v733_v42, %v652_v39  ;;  %v3301_v42 = vld [vmem:[%s5035_s7 + $0x18] sm:$0xff] }
 0x100   : > { %v707_v10 = vpop.permute.xlu1 %706  ;;  %v879_v28 = vmax.f32 %v863_v23, 0.0 }
 0x101   : > { %v731_v19 = vmul.f32 %v3719_v25, %v707_v10 }
 0x103   : > { %v747_v21 = vadd.f32 %v731_v19, %v650_v16  ;;  %v3312_v16 = vld [vmem:[%s5035_s7 + $0x70] sm:$0xff] }
 0x104   : > { %1650 = vmatpush.bf16.msrb.mxu1 %v3312_v16  ;;  %v3316_v19 = vld [vmem:[%s5035_s7 + $0x90] sm:$0xff] }
 0x105   : > { %v844_v24 = vadd.f32 %v828_v20, %v747_v21  ;;  %1703 = vmatpush.bf16.msrb.mxu2 %v3316_v19 }
 0x107   : > { %v864_v27 = vadd.f32 %v3737_v40, %v844_v24  ;;  %v3303_v24 = vld [vmem:[%s5035_s7 + $0x28] sm:$0xff] }
 0x108   : > { %1602 = vmatpush.bf16.msra.mxu0 %v3303_v24 }
 0x109   : > { %v880_v30 = vmax.f32 %v864_v27, 0.0  ;;  %v629_v2 = vpop.permute.xlu1 %628  ;;  %v3311_v27 = vld [vmem:[%s5035_s7 + $0x68] sm:$0xff] }
 0x10a   : > { %v651_v34 = vmul.f32 %v3721_v26, %v629_v2  ;;  %1651 = vmatpush.bf16.msrb.mxu1 %v3311_v27 }
 0x10b   : > { %v889_v32 = vpack.c.bf16 %v880_v30, %v879_v28 }
 0x10d   : > { %3048 = vmatmul.msk.bf16.gmra.mxu0 %vm927_vm0, %v889_v32  ;;  %v3302_v32 = vld [vmem:[%s5035_s7 + $0x20] sm:$0xff] }
 0x10e   : > { %1603 = vmatpush.bf16.msra.mxu0 %v3302_v32 }
 0x112   : > { %v711_v17 = vpop.permute.xlu1 %710  ;;  %1604 = vmatpush.bf16.msra.mxu0 %v3301_v42 }
 0x113   : > { %v732_v33 = vmul.f32 %v3719_v25, %v711_v17  ;;  %v3310_v17 = vld [vmem:[%s5035_s7 + $0x60] sm:$0xff] }
 0x114   : > { %1652 = vmatpush.bf16.msrb.mxu1 %v3310_v17 }
 0x115   : > { %v961_v37 = vpop.f32.mrf.mxu0  ;;  %v748_v38 = vadd.f32 %v732_v33, %v651_v34 }
 0x116   : > { %v962_v46 = vadd.f32 %v3971_v43, %v961_v37 }
 0x117   : > { %v845_v1 = vadd.f32 %v829_v41, %v748_v38  ;;  %v3315_v41 = vld [vmem:[%s5035_s7 + $0x88] sm:$0xff] }
 0x118   : > { %v3977_v51 = vmax.f32 %v962_v46, 0.0  ;;  %1704 = vmatpush.bf16.msrb.mxu2 %v3315_v41 }
 0x119   : > { %v865_v50 = vadd.f32 %v3737_v40, %v845_v1  ;;  %v3309_v1 = vld [vmem:[%s5035_s7 + $0x58] sm:$0xff] }
 0x11a   : > { %5065 = vst [vmem:[#allocation2_spill] sm:$0xff] %v3977_v51  ;;  %1653 = vmatpush.bf16.msrb.mxu1 %v3309_v1 }
 0x11b   : > { %v812_v44 = vpop.permute.xlu1 %811  ;;  %v881_v56 = vmax.f32 %v865_v50, 0.0  ;;  %v3299_v50 = vld [vmem:[%s5035_s7 + $0x8] sm:$0xff] }
 0x11c   : > { %v830_v47 = vmul.f32 %v3723_v29, %v812_v44  ;;  %1705 = vmatpush.bf16.msrb.mxu2 %v3314_v63 }
 0x11d   : > { %v963_v48 = vpop.f32.mrf.mxu0 }
 0x11e   : > { %v846_v49 = vadd.f32 %v830_v47, %v749_v45  ;;  %v964_v26 = vadd.f32 %v3971_v43, %v963_v48 }
 0x120   : > { %v866_v25 = vadd.f32 %v3737_v40, %v846_v49  ;;  %v3980_v53 = vmax.f32 %v964_v26, 0.0  ;;  %v3300_v26 = vld [vmem:[%s5035_s7 + $0x10] sm:$0xff] }
 0x121   : > { %1605 = vmatpush.bf16.msra.mxu0 %v3300_v26 }
 0x122   : > { %5066 = vst [vmem:[#allocation3_spill] sm:$0xff] %v3980_v53  ;;  %v882_v54 = vmax.f32 %v866_v25, 0.0  ;;  %v1017_v55 = vpack.c.bf16 %v3980_v53, %v3977_v51 }
 0x124   : > { %1201 = vmatmul.bf16.vlgmr.msra.gmra.mxu1 %v1017_v55  ;;  %1250 = vmatmul.bf16.vlgmr.msra.gmra.mxu2 %v1017_v55  ;;  %v890_v29 = vpack.c.bf16 %v882_v54, %v881_v56  ;;  %v3308_v54 = vld [vmem:[%s5035_s7 + $0x50] sm:$0xff] }
 0x125   : > { %1299 = vmatmul.bf16.vlgmr.msra.gmra.mxu3 %v1017_v55  ;;  %1606 = vmatpush.bf16.msra.mxu0 %v3299_v50  ;;  %v3298_v55 = vld [vmem:[%s5035_s7] sm:$0xff] }
 0x126   : > { %v966_v57 = vpop.f32.mrf.mxu0  ;;  %3049 = vmatmul.msk.bf16.gmra.mxu0 %vm927_vm0, %v890_v29  ;;  %1654 = vmatpush.bf16.msrb.mxu1 %v3308_v54 }
 0x127   : > { %v967_v58 = vadd.f32 %v3971_v43, %v966_v57 }
 0x129   : > { %v3987_v40 = vmax.f32 %v967_v58, 0.0  ;;  %1607 = vmatpush.bf16.msra.mxu0 %v3298_v55  ;;  %v4127_v55 = vperm.slane %v1057_v4, 1 }
 0x12b   : > { %5067 = vst [vmem:[#allocation4_spill] sm:$0xff] %v3987_v40 }
 0x12e   : > { %v968_v59 = vpop.f32.mrf.mxu0 }
 0x12f   : > { %v969_v60 = vadd.f32 %v3971_v43, %v968_v59 }
 0x131   : > { %v3989_v61 = vmax.f32 %v969_v60, 0.0 }
 0x133   : > { %5068 = vst [vmem:[#allocation5_spill] sm:$0xff] %v3989_v61  ;;  %v1018_v62 = vpack.c.bf16 %v3989_v61, %v3987_v40 }
 0x135   : > { %1206 = vmatmul.bf16.gmra.mxu1 %v1018_v62  ;;  %1255 = vmatmul.bf16.gmra.mxu2 %v1018_v62 }
 0x136   : > { %1304 = vmatmul.bf16.gmra.mxu3 %v1018_v62  ;;  %v3307_v62 = vld [vmem:[%s5035_s7 + $0x48] sm:$0xff] }
 0x137   : > { %1655 = vmatpush.bf16.msrb.mxu1 %v3307_v62 }
 0x139   : > { %v971_v5 = vpop.f32.mrf.mxu0 }
 0x13a   : > { %v972_v6 = vadd.f32 %v3971_v43, %v971_v5 }
 0x13b   : > { %1656 = vmatpush.bf16.msrb.mxu1 %v3306_v3 }
 0x13c   : > { %v4004_v9 = vmax.f32 %v972_v6, 0.0 }
 0x13e   : > { %5069 = vst [vmem:[#allocation6_spill] sm:$0xff] %v4004_v9 }
 0x141   : > { %v973_v7 = vpop.f32.mrf.mxu0 }
 0x142   : > { %v974_v8 = vadd.f32 %v3971_v43, %v973_v7  ;;  %v4096_v7 = vperm.slane %v1057_v4, 0 }
 0x144   : > { %v4006_v10 = vmax.f32 %v974_v8, 0.0 }
 0x146   : > { %5070 = vst [vmem:[#allocation7_spill] sm:$0xff] %v4006_v10  ;;  %v1019_v11 = vpack.c.bf16 %v4006_v10, %v4004_v9 }
 0x148   : > { %1211 = vmatmul.bf16.gmra.mxu1 %v1019_v11  ;;  %1260 = vmatmul.bf16.gmra.mxu2 %v1019_v11 }
 0x149   : > { %1309 = vmatmul.bf16.gmra.mxu3 %v1019_v11 }
 0x152   : > { %v976_v0 = vpop.f32.mrf.mxu0 }
 0x153   : > { %v977_v20 = vadd.f32 %v3971_v43, %v976_v0  ;;  %v2255_v0 = vmax.f32 %v3980_v53, %v4006_v10 }
 0x155   : > { %v4027_v28 = vmax.f32 %v977_v20, 0.0 }
 0x157   : > { %5071 = vst [vmem:[#allocation8_spill] sm:$0xff] %v4027_v28 }
 0x15a   : > { %v978_v21 = vpop.f32.mrf.mxu0 }
 0x15b   : > { %v979_v23 = vadd.f32 %v3971_v43, %v978_v21  ;;  %v2254_v21 = vmax.f32 %v3977_v51, %v4004_v9 }
 0x15d   : > { %v4029_v30 = vmax.f32 %v979_v23, 0.0  ;;  %v2256_v23 = vmax.f32 %v3987_v40, %v4027_v28 }
 0x15f   : > { %5072 = vst [vmem:[#allocation9_spill] sm:$0xff] %v4029_v30  ;;  %v1020_v2 = vpack.c.bf16 %v4029_v30, %v4027_v28  ;;  %v2257_v24 = vmax.f32 %v3989_v61, %v4029_v30 }
 0x161   : > { %1216 = vmatmul.bf16.gmra.mxu1 %v1020_v2  ;;  %1265 = vmatmul.bf16.gmra.mxu2 %v1020_v2 }
 0x162   : > { %1314 = vmatmul.bf16.gmra.mxu3 %v1020_v2 }
 0x164   : > { %v981_v31 = vpop.f32.mrf.mxu0 }
 0x165   : > { %v982_v33 = vadd.f32 %v3971_v43, %v981_v31 }
 0x167   : > { %v4041_v36 = vmax.f32 %v982_v33, 0.0 }
 0x169   : > { %5073 = vst [vmem:[#allocation10_spill] sm:$0xff] %v4041_v36 }
 0x16c   : > { %v983_v34 = vpop.f32.mrf.mxu0 }
 0x16d   : > { %v984_v35 = vadd.f32 %v3971_v43, %v983_v34  ;;  %v2258_v34 = vmax.f32 %v2254_v21, %v4041_v36 }
 0x16f   : > { %v4043_v37 = vmax.f32 %v984_v35, 0.0 }
 0x171   : > { %5074 = vst [vmem:[#allocation11_spill] sm:$0xff] %v4043_v37  ;;  %v1021_v38 = vpack.c.bf16 %v4043_v37, %v4041_v36  ;;  %v2259_v27 = vmax.f32 %v2255_v0, %v4043_v37 }
 0x173   : > { %1221 = vmatmul.bf16.gmra.mxu1 %v1021_v38  ;;  %1270 = vmatmul.bf16.gmra.mxu2 %v1021_v38 }
 0x174   : > { %1319 = vmatmul.bf16.gmra.mxu3 %v1021_v38 }
 0x176   : > { %v986_v39 = vpop.f32.mrf.mxu0 }
 0x177   : > { %v987_v44 = vadd.f32 %v3971_v43, %v986_v39 }
 0x179   : > { %v4058_v47 = vmax.f32 %v987_v44, 0.0 }
 0x17b   : > { %5075 = vst [vmem:[#allocation12_spill] sm:$0xff] %v4058_v47  ;;  %v2260_v35 = vmax.f32 %v2256_v23, %v4058_v47  ;;  %v3514_v23 = vld [vmem:[%s3640_s23 + $0x40] sm:$0xff] }
 0x17e   : > { %v988_v45 = vpop.f32.mrf.mxu0 }
 0x17f   : > { %v989_v46 = vadd.f32 %v3971_v43, %v988_v45 }
 0x181   : > { %v4060_v48 = vmax.f32 %v989_v46, 0.0 }
 0x183   : > { %5076 = vst [vmem:[#allocation13_spill] sm:$0xff] %v4060_v48  ;;  %v1022_v49 = vpack.c.bf16 %v4060_v48, %v4058_v47  ;;  %v2261_v38 = vmax.f32 %v2257_v24, %v4060_v48 }
 0x185   : > { %1226 = vmatmul.bf16.gmra.mxu1 %v1022_v49  ;;  %1275 = vmatmul.bf16.gmra.mxu2 %v1022_v49 }
 0x186   : > { %1324 = vmatmul.bf16.gmra.mxu3 %v1022_v49 }
 0x18a   : > { %v991_v25 = vpop.f32.mrf.mxu0 }
 0x18b   : > { %v992_v56 = vadd.f32 %v3971_v43, %v991_v25 }
 0x18d   : > { %v4078_v58 = vmax.f32 %v992_v56, 0.0  ;;  %v4129_v56 = vperm.slane %v1057_v4, 2 }
 0x18f   : > { %5077 = vst [vmem:[#allocation14_spill] sm:$0xff] %v4078_v58  ;;  %v2262_v44 = vmax.f32 %v2258_v34, %v4078_v58  ;;  %v3516_v34 = vld [vmem:[%s3640_s23 + $0x30] sm:$0xff] }
 0x192   : > { %v993_v29 = vpop.f32.mrf.mxu0 }
 0x193   : > { %v994_v57 = vadd.f32 %v3971_v43, %v993_v29 }
 0x195   : > { %v4080_v59 = vmax.f32 %v994_v57, 0.0 }
 0x197   : > { %5078 = vst [vmem:[#allocation15_spill] sm:$0xff] %v4080_v59  ;;  %v1023_v60 = vpack.c.bf16 %v4080_v59, %v4078_v58  ;;  %v2263_v39 = vmax.f32 %v2259_v27, %v4080_v59 }
 0x199   : > { %1231 = vmatmul.bf16.gmra.mxu1 %v1023_v60  ;;  %1280 = vmatmul.bf16.gmra.mxu2 %v1023_v60  ;;  %v2266_v26 = vmax.f32 %v2262_v44, %v2263_v39 }
 0x19a   : > { %1329 = vmatmul.bf16.gmra.mxu3 %v1023_v60 }
 0x1a1   : > { %v1202_v5 = vpop.f32.mrf.mxu1 }
 0x1a2   : > { %v1203_v11 = vadd.f32 %v1202_v5, %v4096_v7 }
 0x1a3   : > { %v996_v6 = vpop.f32.mrf.mxu0 }
 0x1a4   : > { %v997_v13 = vadd.f32 %v3971_v43, %v996_v6  ;;  %v1340_v31 = vmax.f32 %v1203_v11, 0.0 }
 0x1a6   : > { %v4110_v32 = vmax.f32 %v997_v13, 0.0 }
 0x1a7   : > { %v1251_v8 = vpop.f32.mrf.mxu2 }
 0x1a8   : > { %v1300_v16 = vpop.f32.mrf.mxu3  ;;  %5079 = vst [vmem:[#allocation16_spill] sm:$0xff] %v4110_v32  ;;  %v2264_v45 = vmax.f32 %v2260_v35, %v4110_v32  ;;  %v3517_v35 = vld [vmem:[%s3640_s23 + $0x28] sm:$0xff] }
 0x1a9   : > { %v1204_v19 = vpop.f32.mrf.mxu1 }
 0x1aa   : > { %v1205_v20 = vadd.f32 %v1204_v19, %v4096_v7 }
 0x1ab   : > { %v998_v2 = vpop.f32.mrf.mxu0 }
 0x1ac   : > { %v1343_v17 = vmax.f32 %v1205_v20, 0.0  ;;  %v999_v33 = vadd.f32 %v3971_v43, %v998_v2  ;;  %v3513_v20 = vld [vmem:[%s3640_s23 + $0x48] sm:$0xff] }
 0x1ae   : > { %v1388_v41 = vpack.c.bf16 %v1343_v17, %v1340_v31  ;;  %v4117_v42 = vmax.f32 %v999_v33, 0.0  ;;  %v3515_v31 = vld [vmem:[%s3640_s23 + $0x38] sm:$0xff] }
 0x1af   : > { %v1253_v1 = vpop.f32.mrf.mxu2 }
 0x1b0   : > { %5080 = vst [vmem:[#allocation17_spill] sm:$0xff] %v4117_v42  ;;  %v2265_v46 = vmax.f32 %v2261_v38, %v4117_v42  ;;  %v1302_v49 = vpop.f32.mrf.mxu3  ;;  %1608 = vmatmul.bf16.vlgmr.msra.gmra.mxu0 %v1388_v41  ;;  %v1024_v43 = vpack.c.bf16 %v4117_v42, %v4110_v32  ;;  %v3518_v41 = vld [vmem:[%s3640_s23 + $0x20] sm:$0xff] }
 0x1b1   : > { %2013 = vmatpush.msra.mxu0 %v3749_v52  ;;  %v1254_v52 = vadd.f32 %v1253_v1, %v4127_v55  ;;  %v1303_v60 = vadd.f32 %v1302_v49, %v4129_v56 }
 0x1b2   : > { %v2267_v50 = vmax.f32 %v2264_v45, %v2265_v46  ;;  %v1207_v25 = vpop.f32.mrf.mxu1  ;;  %1236 = vmatmul.bf16.gmra.mxu1 %v1024_v43  ;;  %1285 = vmatmul.bf16.gmra.mxu2 %v1024_v43  ;;  %v3519_v46 = vld [vmem:[%s3640_s23 + $0x18] sm:$0xff] }
 0x1b3   : > { %1334 = vmatmul.bf16.gmra.mxu3 %v1024_v43  ;;  %2014 = vmatpush.msra.mxu0 %v3708_v22  ;;  %v1208_v62 = vadd.f32 %v1207_v25, %v4096_v7  ;;  %v1301_v22 = vadd.f32 %v1300_v16, %v4129_v56  ;;  %v1344_v11 = vmax.f32 %v1254_v52, 0.0  ;;  %v1345_v13 = vmax.f32 %v1303_v60, 0.0  ;;  %v3521_v60 = vld [vmem:[%s3640_s23 + $0x8] sm:$0xff] }
 0x1b4   : > { %v2268_v54 = vmax.f32 %v2266_v26, %v2267_v50 }
 0x1b5   : > { %2015 = vmatpush.msra.mxu0 %v3693_v18  ;;  %v1252_v18 = vadd.f32 %v1251_v8, %v4127_v55  ;;  %v1346_v0 = vmax.f32 %v1208_v62, 0.0  ;;  %v1342_v8 = vmax.f32 %v1301_v22, 0.0 }
 0x1b6   : > { %v2269_v29 = vrot.slane %v2268_v54, 4 }
 0x1b7   : > { %2016 = vmatpush.msra.mxu0 %v3681_v15  ;;  %v1390_v24 = vpack.c.bf16 %v1345_v13, %v1342_v8 }
 0x1b8   : > { %v2270_v57 = vmax.f32 %v2268_v54, %v2269_v29  ;;  %v1256_v63 = vpop.f32.mrf.mxu2  ;;  %v3520_v54 = vld [vmem:[%s3640_s23 + $0x10] sm:$0xff] }
 0x1b9   : > { %2017 = vmatpush.msra.mxu0 %v3674_v14  ;;  %v1305_v4 = vpop.f32.mrf.mxu3  ;;  %v1341_v14 = vmax.f32 %v1252_v18, 0.0  ;;  %v1257_v1 = vadd.f32 %v1256_v63, %v4127_v55 }
 0x1ba   : > { %v2271_v3 = vrot.slane %v2270_v57, 2  ;;  %v1209_v15 = vpop.f32.mrf.mxu1  ;;  %v1306_v44 = vadd.f32 %v1305_v4, %v4129_v56 }
 0x1bb   : > { %v1210_v5 = vadd.f32 %v1209_v15, %v4096_v7  ;;  %2018 = vmatpush.msra.mxu0 %v3667_v12  ;;  %v1389_v27 = vpack.c.bf16 %v1344_v11, %v1341_v14  ;;  %v1347_v29 = vmax.f32 %v1257_v1, 0.0 }
 0x1bc   : > { %v2272_v6 = vmax.f32 %v2270_v57, %v2271_v3  ;;  %v1348_v57 = vmax.f32 %v1306_v44, 0.0  ;;  %v3522_v3 = vld [vmem:[%s3640_s23] sm:$0xff]  ;;  %s3538_s23 = smov 94  }
 0x1bd   : > { %v1349_v19 = vmax.f32 %v1210_v5, 0.0  ;;  %2019 = vmatpush.msra.mxu0 %v3513_v20 }
 0x1be   : > { %v2273_v16 = vrot.slane %v2272_v6, 1 }
 0x1bf   : > { %v1391_v21 = vpack.c.bf16 %v1349_v19, %v1346_v0  ;;  %2020 = vmatpush.msra.mxu0 %v3514_v23 }
 0x1c0   : > { %v2274_v12 = vmax.f32 %v2272_v6, %v2273_v16  ;;  %v1258_v2 = vpop.f32.mrf.mxu2 }
 0x1c1   : > { %1613 = vmatmul.bf16.gmra.mxu0 %v1391_v21  ;;  %v1307_v17 = vpop.f32.mrf.mxu3  ;;  %v1259_v38 = vadd.f32 %v1258_v2, %v4127_v55 }
 0x1c2   : > { %2275 = vst [vmem:[%s531_s24] sm:$0x1] %v2274_v12  ;;  %1657 = vmatmul.bf16.vlgmr.msrb.gmra.mxu1 %v1389_v27  ;;  %3226 = vmatmul.msk.bf16.vlgmr.msrb.gmra.mxu2 %vm927_vm0, %v1390_v24  ;;  %v1308_v39 = vadd.f32 %v1307_v17, %v4129_v56  ;;  %s528_s24 = scalar_lea.vmem %s5040_s12, %s5118_s19 }
 0x1c3   : > { %2021 = vmatpush.msra.mxu0 %v3515_v31  ;;  %v1350_v49 = vmax.f32 %v1259_v38, 0.0 }
 0x1c4   : > { %v1351_v43 = vmax.f32 %v1308_v39, 0.0 }
 0x1c5   : > { %v1212_v33 = vpop.f32.mrf.mxu1  ;;  %2022 = vmatpush.msra.mxu0 %v3516_v34  ;;  %v1392_v18 = vpack.c.bf16 %v1350_v49, %v1347_v29 }
 0x1c6   : > { %v1213_v26 = vadd.f32 %v1212_v33, %v4096_v7  ;;  %v1393_v22 = vpack.c.bf16 %v1351_v43, %v1348_v57 }
 0x1c7   : > { %2023 = vmatpush.msra.mxu0 %v3517_v35 }
 0x1c8   : > { %v1352_v62 = vmax.f32 %v1213_v26, 0.0 }
 0x1c9   : > { %2024 = vmatpush.msra.mxu0 %v3518_v41 }
 0x1cb   : > { %v1261_v45 = vpop.f32.mrf.mxu2  ;;  %2025 = vmatpush.msra.mxu0 %v3519_v46 }
 0x1cc   : > { %v1310_v50 = vpop.f32.mrf.mxu3  ;;  %v1262_v13 = vadd.f32 %v1261_v45, %v4127_v55 }
 0x1cd   : > { %v1214_v25 = vpop.f32.mrf.mxu1  ;;  %2026 = vmatpush.msra.mxu0 %v3520_v54  ;;  %v1311_v0 = vadd.f32 %v1310_v50, %v4129_v56 }
 0x1ce   : > { %v1215_v52 = vadd.f32 %v1214_v25, %v4096_v7  ;;  %v1353_v14 = vmax.f32 %v1262_v13, 0.0 }
 0x1cf   : > { %2027 = vmatpush.msra.mxu0 %v3521_v60  ;;  %v1354_v8 = vmax.f32 %v1311_v0, 0.0 }
 0x1d0   : > { %v1355_v63 = vmax.f32 %v1215_v52, 0.0 }
 0x1d1   : > { %2028 = vmatpush.msra.mxu0 %v3522_v3 }
 0x1d2   : > { %1662 = vmatmul.bf16.gmra.mxu1 %v1392_v18  ;;  %3227 = vmatmul.msk.bf16.gmra.mxu2 %vm927_vm0, %v1393_v22  ;;  %v1394_v4 = vpack.c.bf16 %v1355_v63, %v1352_v62 }
 0x1d3   : > { %v1263_v15 = vpop.f32.mrf.mxu2 }
 0x1d4   : > { %1618 = vmatmul.bf16.gmra.mxu0 %v1394_v4  ;;  %v1312_v5 = vpop.f32.mrf.mxu3  ;;  %v1264_v6 = vadd.f32 %v1263_v15, %v4127_v55 }
 0x1d5   : > { %v1313_v11 = vadd.f32 %v1312_v5, %v4129_v56 }
 0x1d6   : > { %v1356_v19 = vmax.f32 %v1264_v6, 0.0 }
 0x1d7   : > { %v1357_v20 = vmax.f32 %v1313_v11, 0.0 }
 0x1d8   : > { %v1395_v21 = vpack.c.bf16 %v1356_v19, %v1353_v14 }
 0x1d9   : > { %v1396_v23 = vpack.c.bf16 %v1357_v20, %v1354_v8 }
 0x1de   : > { %v1217_v16 = vpop.f32.mrf.mxu1 }
 0x1df   : > { %v1218_v24 = vadd.f32 %v1217_v16, %v4096_v7 }
 0x1e1   : > { %v1358_v17 = vmax.f32 %v1218_v24, 0.0 }
 0x1e2   : > { %1667 = vmatmul.bf16.gmra.mxu1 %v1395_v21  ;;  %3228 = vmatmul.msk.bf16.gmra.mxu2 %vm927_vm0, %v1396_v23 }
 0x1e4   : > { %v1266_v12 = vpop.f32.mrf.mxu2 }
 0x1e5   : > { %v1315_v27 = vpop.f32.mrf.mxu3  ;;  %v1267_v34 = vadd.f32 %v1266_v12, %v4127_v55 }
 0x1e6   : > { %v1219_v2 = vpop.f32.mrf.mxu1  ;;  %v1316_v38 = vadd.f32 %v1315_v27, %v4129_v56 }
 0x1e7   : > { %v1220_v31 = vadd.f32 %v1219_v2, %v4096_v7  ;;  %v1359_v45 = vmax.f32 %v1267_v34, 0.0 }
 0x1e8   : > { %v1360_v49 = vmax.f32 %v1316_v38, 0.0 }
 0x1e9   : > { %v1361_v33 = vmax.f32 %v1220_v31, 0.0 }
 0x1eb   : > { %v1397_v35 = vpack.c.bf16 %v1361_v33, %v1358_v17 }
 0x1ec   : > { %v1268_v39 = vpop.f32.mrf.mxu2 }
 0x1ed   : > { %v1269_v41 = vadd.f32 %v1268_v39, %v4127_v55  ;;  %v1317_v1 = vpop.f32.mrf.mxu3  ;;  %1623 = vmatmul.bf16.gmra.mxu0 %v1397_v35 }
 0x1ee   : > { %v1318_v44 = vadd.f32 %v1317_v1, %v4129_v56 }
 0x1ef   : > { %v1362_v46 = vmax.f32 %v1269_v41, 0.0 }
 0x1f0   : > { %v1363_v43 = vmax.f32 %v1318_v44, 0.0  ;;  %v1222_v26 = vpop.f32.mrf.mxu1 }
 0x1f1   : > { %v1398_v50 = vpack.c.bf16 %v1362_v46, %v1359_v45  ;;  %v1223_v29 = vadd.f32 %v1222_v26, %v4096_v7 }
 0x1f2   : > { %v1399_v25 = vpack.c.bf16 %v1363_v43, %v1360_v49 }
 0x1f3   : > { %1672 = vmatmul.bf16.gmra.mxu1 %v1398_v50  ;;  %v1364_v62 = vmax.f32 %v1223_v29, 0.0 }
 0x1f4   : > { %3229 = vmatmul.msk.bf16.gmra.mxu2 %vm927_vm0, %v1399_v25 }
 0x1f6   : > { %v1271_v54 = vpop.f32.mrf.mxu2 }
 0x1f7   : > { %v1320_v57 = vpop.f32.mrf.mxu3  ;;  %v1272_v18 = vadd.f32 %v1271_v54, %v4127_v55 }
 0x1f8   : > { %v1224_v52 = vpop.f32.mrf.mxu1  ;;  %v1321_v3 = vadd.f32 %v1320_v57, %v4129_v56 }
 0x1f9   : > { %v1225_v60 = vadd.f32 %v1224_v52, %v4096_v7  ;;  %v1365_v11 = vmax.f32 %v1272_v18, 0.0 }
 0x1fa   : > { %v1366_v0 = vmax.f32 %v1321_v3, 0.0 }
 0x1fb   : > { %v1367_v63 = vmax.f32 %v1225_v60, 0.0 }
 0x1fd   : > { %v1400_v22 = vpack.c.bf16 %v1367_v63, %v1364_v62 }
 0x1fe   : > { %v1273_v4 = vpop.f32.mrf.mxu2 }
 0x1ff   : > { %v1274_v15 = vadd.f32 %v1273_v4, %v4127_v55  ;;  %v1322_v5 = vpop.f32.mrf.mxu3  ;;  %1628 = vmatmul.bf16.gmra.mxu0 %v1400_v22 }
 0x200   : > { %v1323_v6 = vadd.f32 %v1322_v5, %v4129_v56 }
 0x201   : > { %v1368_v13 = vmax.f32 %v1274_v15, 0.0 }
 0x202   : > { %v1369_v19 = vmax.f32 %v1323_v6, 0.0  ;;  %v1227_v20 = vpop.f32.mrf.mxu1 }
 0x203   : > { %v1401_v14 = vpack.c.bf16 %v1368_v13, %v1365_v11  ;;  %v1228_v21 = vadd.f32 %v1227_v20, %v4096_v7 }
 0x204   : > { %v1402_v8 = vpack.c.bf16 %v1369_v19, %v1366_v0 }
 0x205   : > { %1677 = vmatmul.bf16.gmra.mxu1 %v1401_v14  ;;  %v1370_v27 = vmax.f32 %v1228_v21, 0.0 }
 0x206   : > { %3230 = vmatmul.msk.bf16.gmra.mxu2 %vm927_vm0, %v1402_v8 }
 0x208   : > { %v1276_v16 = vpop.f32.mrf.mxu2 }
 0x209   : > { %v1325_v23 = vpop.f32.mrf.mxu3  ;;  %v1277_v31 = vadd.f32 %v1276_v16, %v4127_v55 }
 0x20a   : > { %v1229_v12 = vpop.f32.mrf.mxu1  ;;  %v1326_v33 = vadd.f32 %v1325_v23, %v4129_v56 }
 0x20b   : > { %v1230_v24 = vadd.f32 %v1229_v12, %v4096_v7  ;;  %v1371_v41 = vmax.f32 %v1277_v31, 0.0 }
 0x20c   : > { %v1372_v44 = vmax.f32 %v1326_v33, 0.0  ;;  %v4202_v33 = vld [vmem:[%s5036_s8] ss:$0 sm:$0xff] }
 0x20d   : > { %v1373_v2 = vmax.f32 %v1230_v24, 0.0 }
 0x20f   : > { %v1403_v17 = vpack.c.bf16 %v1373_v2, %v1370_v27 }
 0x210   : > { %v1278_v34 = vpop.f32.mrf.mxu2 }
 0x211   : > { %v1279_v35 = vadd.f32 %v1278_v34, %v4127_v55  ;;  %v1327_v38 = vpop.f32.mrf.mxu3  ;;  %1633 = vmatmul.bf16.gmra.mxu0 %v1403_v17 }
 0x212   : > { %v1328_v39 = vadd.f32 %v1327_v38, %v4129_v56 }
 0x213   : > { %v1374_v1 = vmax.f32 %v1279_v35, 0.0 }
 0x214   : > { %v1375_v45 = vmax.f32 %v1328_v39, 0.0 }
 0x215   : > { %v1404_v46 = vpack.c.bf16 %v1374_v1, %v1371_v41 }
 0x216   : > { %v1405_v49 = vpack.c.bf16 %v1375_v45, %v1372_v44  ;;  %v1232_v43 = vpop.f32.mrf.mxu1 }
 0x217   : > { %1682 = vmatmul.bf16.gmra.mxu1 %v1404_v46  ;;  %v1233_v50 = vadd.f32 %v1232_v43, %v4096_v7 }
 0x218   : > { %3231 = vmatmul.msk.bf16.gmra.mxu2 %vm927_vm0, %v1405_v49 }
 0x219   : > { %v1376_v57 = vmax.f32 %v1233_v50, 0.0 }
 0x21c   : > { %v1281_v26 = vpop.f32.mrf.mxu2 }
 0x21d   : > { %v1330_v25 = vpop.f32.mrf.mxu3  ;;  %v1282_v60 = vadd.f32 %v1281_v26, %v4127_v55 }
 0x21e   : > { %v1234_v54 = vpop.f32.mrf.mxu1  ;;  %v1331_v63 = vadd.f32 %v1330_v25, %v4129_v56 }
 0x21f   : > { %v1235_v29 = vadd.f32 %v1234_v54, %v4096_v7  ;;  %v1377_v15 = vmax.f32 %v1282_v60, 0.0 }
 0x220   : > { %v1378_v6 = vmax.f32 %v1331_v63, 0.0 }
 0x221   : > { %v1379_v52 = vmax.f32 %v1235_v29, 0.0 }
 0x223   : > { %v1406_v62 = vpack.c.bf16 %v1379_v52, %v1376_v57 }
 0x224   : > { %v1283_v18 = vpop.f32.mrf.mxu2 }
 0x225   : > { %v1284_v22 = vadd.f32 %v1283_v18, %v4127_v55  ;;  %v1332_v3 = vpop.f32.mrf.mxu3  ;;  %1638 = vmatmul.bf16.gmra.mxu0 %v1406_v62 }
 0x226   : > { %v1333_v4 = vadd.f32 %v1332_v3, %v4129_v56 }
 0x227   : > { %v1380_v5 = vmax.f32 %v1284_v22, 0.0 }
 0x228   : > { %v1381_v11 = vmax.f32 %v1333_v4, 0.0 }
 0x229   : > { %v1407_v13 = vpack.c.bf16 %v1380_v5, %v1377_v15 }
 0x22a   : > { %v1408_v0 = vpack.c.bf16 %v1381_v11, %v1378_v6 }
 0x22b   : > { %1687 = vmatmul.bf16.gmra.mxu1 %v1407_v13 }
 0x22c   : > { %3232 = vmatmul.msk.bf16.gmra.mxu2 %vm927_vm0, %v1408_v0 }
 0x22d   : > { %v1609_v16 = vpop.f32.mrf.mxu0 }
 0x22e   : > { %v1610_v46 = vadd.f32 %v4202_v33, %v1609_v16 }
 0x22f   : > { %v1237_v19 = vpop.f32.mrf.mxu1 }
 0x230   : > { %v1238_v14 = vadd.f32 %v1237_v19, %v4096_v7 }
 0x232   : > { %v1382_v12 = vmax.f32 %v1238_v14, 0.0 }
 0x235   : > { %v1286_v20 = vpop.f32.mrf.mxu2  ;;  %v1611_v44 = vpop.f32.mrf.mxu0 }
 0x236   : > { %v1335_v8 = vpop.f32.mrf.mxu3  ;;  %v1287_v27 = vadd.f32 %v1286_v20, %v4127_v55  ;;  %v1612_v25 = vadd.f32 %v4202_v33, %v1611_v44 }
 0x237   : > { %v1239_v21 = vpop.f32.mrf.mxu1  ;;  %v1336_v31 = vadd.f32 %v1335_v8, %v4129_v56 }
 0x238   : > { %v1240_v23 = vadd.f32 %v1239_v21, %v4096_v7  ;;  %v1383_v39 = vmax.f32 %v1287_v27, 0.0 }
 0x239   : > { %v1384_v1 = vmax.f32 %v1336_v31, 0.0 }
 0x23a   : > { %v1385_v24 = vmax.f32 %v1240_v23, 0.0 }
 0x23c   : > { %v1409_v2 = vpack.c.bf16 %v1385_v24, %v1382_v12 }
 0x23d   : > { %v1288_v17 = vpop.f32.mrf.mxu2 }
 0x23e   : > { %v1289_v34 = vadd.f32 %v1288_v17, %v4127_v55  ;;  %v1337_v35 = vpop.f32.mrf.mxu3  ;;  %1643 = vmatmul.bf16.gmra.mxu0 %v1409_v2  ;;  %v1614_v54 = vpop.f32.mrf.mxu0 }
 0x23f   : > { %v1338_v7 = vadd.f32 %v1337_v35, %v4129_v56  ;;  %v1658_v38 = vpop.f32.mrf.mxu1  ;;  %v1615_v62 = vadd.f32 %v4202_v33, %v1614_v54 }
 0x240   : > { %v1386_v41 = vmax.f32 %v1289_v34, 0.0  ;;  %v1659_v26 = vadd.f32 %v1658_v38, %v1610_v46 }
 0x241   : > { %v1387_v45 = vmax.f32 %v1338_v7, 0.0 }
 0x242   : > { %v1410_v49 = vpack.c.bf16 %v1386_v41, %v1383_v39 }
 0x243   : > { %v1411_v43 = vpack.c.bf16 %v1387_v45, %v1384_v1 }
 0x244   : > { %1692 = vmatmul.bf16.gmra.mxu1 %v1410_v49 }
 0x245   : > { %3233 = vmatmul.msk.bf16.gmra.mxu2 %vm927_vm0, %v1411_v43  ;;  %v1707_v55 = vpop.f32.mrf.mxu2 }
 0x246   : > { %v4215_v56 = vadd.f32 %v1707_v55, %v1659_v26  ;;  %v1616_v18 = vpop.f32.mrf.mxu0 }
 0x247   : > { %v1660_v50 = vpop.f32.mrf.mxu1  ;;  %v1617_v15 = vadd.f32 %v4202_v33, %v1616_v18 }
 0x248   : > { %5081 = vst [vmem:[#allocation18_spill] sm:$0xff] %v4215_v56  ;;  %v1661_v29 = vadd.f32 %v1660_v50, %v1612_v25 }
 0x249   : > { %1748 = vst.msk [vmem:[%s4212_s28] sm:$0xff] %vm1747_vm1, %v4215_v56 }
 0x24d   : > { %v1709_v57 = vpop.f32.mrf.mxu2 }
 0x24e   : > { %v4221_v52 = vadd.f32 %v1709_v57, %v1661_v29 }
 0x24f   : > { %v1663_v60 = vpop.f32.mrf.mxu1 }
 0x250   : > { %1749 = vst.msk [vmem:[%s4212_s28 + $0x8] sm:$0xff] %vm1747_vm1, %v4221_v52  ;;  %2152 = vrot.lane.b32.xlu1 %v4221_v52, %s3534_s20  ;;  %v1664_v63 = vadd.f32 %v1663_v60, %v1615_v62 }
 0x251   : > { %v1619_v6 = vpop.f32.mrf.mxu0 }
 0x252   : > { %v1620_v19 = vadd.f32 %v4202_v33, %v1619_v6 }
 0x255   : > { %v1712_v22 = vpop.f32.mrf.mxu2 }
 0x256   : > { %v4229_v3 = vadd.f32 %v1712_v22, %v1664_v63 }
 0x257   : > { %v1665_v4 = vpop.f32.mrf.mxu1 }
 0x258   : > { %1750 = vst.msk [vmem:[%s4212_s28 + $0x10] sm:$0xff] %vm1747_vm1, %v4229_v3  ;;  %v1666_v5 = vadd.f32 %v1665_v4, %v1617_v15 }
 0x259   : > { %v1621_v16 = vpop.f32.mrf.mxu0 }
 0x25a   : > { %v1622_v23 = vadd.f32 %v4202_v33, %v1621_v16 }
 0x25d   : > { %v1714_v11 = vpop.f32.mrf.mxu2 }
 0x25e   : > { %v4235_v13 = vadd.f32 %v1714_v11, %v1666_v5 }
 0x25f   : > { %v1668_v0 = vpop.f32.mrf.mxu1 }
 0x260   : > { %1751 = vst.msk [vmem:[%s4212_s28 + $0x18] sm:$0xff] %vm1747_vm1, %v4235_v13  ;;  %v1669_v20 = vadd.f32 %v1668_v0, %v1620_v19 }
 0x265   : > { %v1717_v14 = vpop.f32.mrf.mxu2 }
 0x266   : > { %v4241_v8 = vadd.f32 %v1717_v14, %v1669_v20 }
 0x267   : > { %v1670_v21 = vpop.f32.mrf.mxu1 }
 0x268   : > { %5082 = vst [vmem:[#allocation19_spill] sm:$0xff] %v4241_v8  ;;  %2158 = vrot.lane.b32.xlu1 %v4241_v8, %s3534_s20  ;;  %v1671_v12 = vadd.f32 %v1670_v21, %v1622_v23 }
 0x269   : > { %1752 = vst.msk [vmem:[%s4212_s28 + $0x20] sm:$0xff] %vm1747_vm1, %v4241_v8 }
 0x26a   : > { %v1624_v2 = vpop.f32.mrf.mxu0 }
 0x26b   : > { %v1625_v17 = vadd.f32 %v4202_v33, %v1624_v2 }
 0x26d   : > { %v1719_v24 = vpop.f32.mrf.mxu2 }
 0x26e   : > { %v4249_v27 = vadd.f32 %v1719_v24, %v1671_v12 }
 0x270   : > { %1753 = vst.msk [vmem:[%s4212_s28 + $0x28] sm:$0xff] %vm1747_vm1, %v4249_v27  ;;  %v1673_v31 = vpop.f32.mrf.mxu1 }
 0x271   : > { %v1674_v34 = vadd.f32 %v1673_v31, %v1625_v17 }
 0x272   : > { %v1626_v38 = vpop.f32.mrf.mxu0 }
 0x273   : > { %v1627_v41 = vadd.f32 %v4202_v33, %v1626_v38 }
 0x277   : > { %v1722_v35 = vpop.f32.mrf.mxu2 }
 0x278   : > { %v4255_v7 = vadd.f32 %v1722_v35, %v1674_v34  ;;  %v1675_v39 = vpop.f32.mrf.mxu1 }
 0x279   : > { %v1676_v1 = vadd.f32 %v1675_v39, %v1627_v41 }
 0x27a   : > { %1754 = vst.msk [vmem:[%s4212_s28 + $0x30] sm:$0xff] %vm1747_vm1, %v4255_v7 }
 0x27c   : > { %v1629_v46 = vpop.f32.mrf.mxu0 }
 0x27d   : > { %v1630_v43 = vadd.f32 %v4202_v33, %v1629_v46 }
 0x27f   : > { %v1724_v44 = vpop.f32.mrf.mxu2 }
 0x280   : > { %v4261_v45 = vadd.f32 %v1724_v44, %v1676_v1  ;;  %v1765_v44 = vsel %vm1764_vm2, %v4215_v56, -inf }
 0x282   : > { %1755 = vst.msk [vmem:[%s4212_s28 + $0x38] sm:$0xff] %vm1747_vm1, %v4261_v45  ;;  %v1678_v49 = vpop.f32.mrf.mxu1 }
 0x283   : > { %v1679_v26 = vadd.f32 %v1678_v49, %v1630_v43  ;;  %v2554_v49 = vsel %vm2553_vm3, %v4215_v56, -inf  ;;  %v1766_v43 = vsel %vm1764_vm2, %v4221_v52, -inf }
 0x284   : > { %v1631_v25 = vpop.f32.mrf.mxu0 }
 0x285   : > { %v1632_v29 = vadd.f32 %v4202_v33, %v1631_v25  ;;  %v2556_v25 = vsel %vm2553_vm3, %v4229_v3, -inf }
 0x289   : > { %v1727_v55 = vpop.f32.mrf.mxu2 }
 0x28a   : > { %v4267_v50 = vadd.f32 %v1727_v55, %v1679_v26  ;;  %v1680_v54 = vpop.f32.mrf.mxu1  ;;  %v2555_v26 = vsel %vm2553_vm3, %v4221_v52, -inf  ;;  %v1767_v55 = vsel %vm1764_vm2, %v4229_v3, -inf }
 0x28b   : > { %v1681_v57 = vadd.f32 %v1680_v54, %v1632_v29  ;;  %v1769_v54 = vsel %vm1764_vm2, %v4241_v8, -inf  ;;  %v2558_v29 = vsel %vm2553_vm3, %v4241_v8, -inf }
 0x28c   : > { %1756 = vst.msk [vmem:[%s4212_s28 + $0x40] sm:$0xff] %vm1747_vm1, %v4267_v50 }
 0x28e   : > { %v1634_v63 = vpop.f32.mrf.mxu0 }
 0x28f   : > { %v1635_v22 = vadd.f32 %v4202_v33, %v1634_v63  ;;  %v1771_v63 = vsel %vm1764_vm2, %v4249_v27, -inf }
 0x291   : > { %v1729_v60 = vpop.f32.mrf.mxu2 }
 0x292   : > { %v4273_v62 = vadd.f32 %v1729_v60, %v1681_v57  ;;  %v1768_v60 = vsel %vm1764_vm2, %v4235_v13, -inf }
 0x294   : > { %1757 = vst.msk [vmem:[%s4212_s28 + $0x48] sm:$0xff] %vm1747_vm1, %v4273_v62  ;;  %v1683_v18 = vpop.f32.mrf.mxu1 }
 0x295   : > { %v1684_v4 = vadd.f32 %v1683_v18, %v1635_v22  ;;  %v2560_v18 = vsel %vm2553_vm3, %v4249_v27, -inf  ;;  %v1773_v22 = vsel %vm1764_vm2, %v4255_v7, -inf }
 0x296   : > { %v1636_v6 = vpop.f32.mrf.mxu0 }
 0x297   : > { %v1637_v0 = vadd.f32 %v4202_v33, %v1636_v6  ;;  %v1775_v6 = vsel %vm1764_vm2, %v4261_v45, -inf }
 0x29b   : > { %v1732_v15 = vpop.f32.mrf.mxu2 }
 0x29c   : > { %v4279_v5 = vadd.f32 %v1732_v15, %v1684_v4  ;;  %v1685_v11 = vpop.f32.mrf.mxu1  ;;  %v2562_v15 = vsel %vm2553_vm3, %v4255_v7, -inf }
 0x29d   : > { %v1686_v19 = vadd.f32 %v1685_v11, %v1637_v0  ;;  %v2564_v11 = vsel %vm2553_vm3, %v4261_v45, -inf }
 0x29e   : > { %1758 = vst.msk [vmem:[%s4212_s28 + $0x50] sm:$0xff] %vm1747_vm1, %v4279_v5 }
 0x2a2   : > { %v1639_v16 = vpop.f32.mrf.mxu0 }
 0x2a3   : > { %v1734_v20 = vpop.f32.mrf.mxu2  ;;  %v1640_v23 = vadd.f32 %v4202_v33, %v1639_v16  ;;  %v2559_v16 = vmax.f32 %v2554_v49, %v2558_v29  ;;  %v1781_v49 = vsel %vm1764_vm2, %v4279_v5, -inf  ;;  %v2570_v29 = vsel %vm2553_vm3, %v4279_v5, -inf }
 0x2a4   : > { %v4285_v14 = vadd.f32 %v1734_v20, %v1686_v19  ;;  %v2557_v19 = vsel %vm2553_vm3, %v4235_v13, -inf  ;;  %v1770_v20 = vmax.f32 %v1765_v44, %v1769_v54 }
 0x2a6   : > { %1759 = vst.msk [vmem:[%s4212_s28 + $0x58] sm:$0xff] %vm1747_vm1, %v4285_v14 }
 0x2a8   : > { %v1688_v21 = vpop.f32.mrf.mxu1 }
 0x2a9   : > { %v1689_v12 = vadd.f32 %v1688_v21, %v1640_v23  ;;  %v1777_v21 = vsel %vm1764_vm2, %v4267_v50, -inf }
 0x2aa   : > { %v1641_v31 = vpop.f32.mrf.mxu0  ;;  %v1778_v44 = vmax.f32 %v1770_v20, %v1777_v21 }
 0x2ab   : > { %v1642_v34 = vadd.f32 %v4202_v33, %v1641_v31  ;;  %v2566_v31 = vsel %vm2553_vm3, %v4267_v50, -inf }
 0x2af   : > { %v1737_v24 = vpop.f32.mrf.mxu2 }
 0x2b0   : > { %v4291_v2 = vadd.f32 %v1737_v24, %v1689_v12  ;;  %v1690_v17 = vpop.f32.mrf.mxu1  ;;  %v1772_v12 = vmax.f32 %v1766_v43, %v1771_v63  ;;  %v2561_v24 = vmax.f32 %v2555_v26, %v2560_v18  ;;  %v2567_v26 = vmax.f32 %v2559_v16, %v2566_v31 }
 0x2b1   : > { %v1691_v35 = vadd.f32 %v1690_v17, %v1642_v34  ;;  %v1779_v17 = vsel %vm1764_vm2, %v4273_v62, -inf  ;;  %v1774_v34 = vmax.f32 %v1767_v55, %v1773_v22  ;;  %v1783_v55 = vsel %vm1764_vm2, %v4285_v14, -inf }
 0x2b2   : > { %1760 = vst.msk [vmem:[%s4212_s28 + $0x60] sm:$0xff] %vm1747_vm1, %v4291_v2  ;;  %v1780_v54 = vmax.f32 %v1772_v12, %v1779_v17  ;;  %v1785_v22 = vsel %vm1764_vm2, %v4291_v2, -inf }
 0x2b3   : > { %v1782_v18 = vmax.f32 %v1774_v34, %v1781_v49 }
 0x2b7   : > { %v1739_v38 = vpop.f32.mrf.mxu2 }
 0x2b8   : > { %v4297_v39 = vadd.f32 %v1739_v38, %v1691_v35  ;;  %v2563_v35 = vmax.f32 %v2556_v25, %v2562_v15  ;;  %v1776_v38 = vmax.f32 %v1768_v60, %v1775_v6  ;;  %v2572_v25 = vsel %vm2553_vm3, %v4285_v14, -inf }
 0x2ba   : > { %1761 = vst.msk [vmem:[%s4212_s28 + $0x68] sm:$0xff] %vm1747_vm1, %v4297_v39  ;;  %v2576_v60 = vsel %vm2553_vm3, %v4297_v39, -inf  ;;  %v2571_v6 = vmax.f32 %v2563_v35, %v2570_v29  ;;  %v1784_v16 = vmax.f32 %v1776_v38, %v1783_v55 }
 0x2bb   : > { %v1644_v41 = vpop.f32.mrf.mxu0 }
 0x2bc   : > { %v1645_v46 = vadd.f32 %v4202_v33, %v1644_v41  ;;  %v2565_v41 = vmax.f32 %v2557_v19, %v2564_v11 }
 0x2be   : > { %v2573_v21 = vmax.f32 %v2565_v41, %v2572_v25 }
 0x2c1   : > { %v1693_v1 = vpop.f32.mrf.mxu1 }
 0x2c2   : > { %v1694_v57 = vadd.f32 %v1693_v1, %v1645_v46  ;;  %v2568_v46 = vsel %vm2553_vm3, %v4273_v62, -inf }
 0x2c3   : > { %v1646_v23 = vpop.f32.mrf.mxu0 }
 0x2c4   : > { %v1647_v43 = vadd.f32 %v4202_v33, %v1646_v23  ;;  %v2569_v33 = vmax.f32 %v2561_v24, %v2568_v46  ;;  %v1786_v24 = vmax.f32 %v1778_v44, %v1785_v22 }
 0x2c6   : > { %v2577_v12 = vmax.f32 %v2569_v33, %v2576_v60 }
 0x2c8   : > { %v1742_v4 = vpop.f32.mrf.mxu2 }
 0x2c9   : > { %v4333_v0 = vadd.f32 %v1742_v4, %v1694_v57  ;;  %v1695_v1 = vpop.f32.mrf.mxu1  ;;  %v1787_v57 = vsel %vm1764_vm2, %v4297_v39, -inf  ;;  %v2574_v4 = vsel %vm2553_vm3, %v4291_v2, -inf }
 0x2ca   : > { %v1696_v63 = vadd.f32 %v1695_v1, %v1647_v43  ;;  %v1788_v23 = vmax.f32 %v1780_v54, %v1787_v57  ;;  %v2575_v31 = vmax.f32 %v2567_v26, %v2574_v4 }
 0x2cb   : > { %1762 = vst.msk [vmem:[%s4212_s28 + $0x70] sm:$0xff] %vm1747_vm1, %v4333_v0  ;;  %v1789_v11 = vsel %vm1764_vm2, %v4333_v0, -inf  ;;  %v2578_v19 = vsel %vm2553_vm3, %v4333_v0, -inf }
 0x2cc   : > { %v1790_v35 = vmax.f32 %v1782_v18, %v1789_v11  ;;  %v2579_v1 = vmax.f32 %v2571_v6, %v2578_v19  ;;  %v1793_v43 = vmax.f32 %v1786_v24, %v1788_v23  ;;  %v2582_v38 = vmax.f32 %v2575_v31, %v2577_v12 }
 0x2d0   : > { %v1744_v15 = vpop.f32.mrf.mxu2 }
 0x2d1   : > { %v4369_v20 = vadd.f32 %v1744_v15, %v1696_v63 }
 0x2d3   : > { %1763 = vst.msk [vmem:[%s4212_s28 + $0x78] sm:$0xff] %vm1747_vm1, %v4369_v20  ;;  %v1791_v17 = vsel %vm1764_vm2, %v4369_v20, -inf  ;;  %v2580_v34 = vsel %vm2553_vm3, %v4369_v20, -inf  ;;  %s525_s28 = scalar_lea.vmem %s5039_s11, %s3025_s25  ;;  %s537_s25 = scalar_lea.vmem %s5043_s15, %s5118_s19 }
 0x2d4   : > { %v1792_v46 = vmax.f32 %v1784_v16, %v1791_v17  ;;  %v2581_v49 = vmax.f32 %v2573_v21, %v2580_v34 }
 0x2d6   : > { %v1794_v41 = vmax.f32 %v1790_v35, %v1792_v46  ;;  %v2583_v54 = vmax.f32 %v2579_v1, %v2581_v49 }
 0x2d8   : > { %v1795_v29 = vmax.f32 %v1793_v43, %v1794_v41  ;;  %v2584_v44 = vmax.f32 %v2582_v38, %v2583_v54 }
 0x2da   : > { %v1796_v26 = vrot.slane %v1795_v29, 4  ;;  %v2585_v25 = vrot.slane %v2584_v44, 4 }
 0x2dc   : > { %v1797_v55 = vmax.f32 %v1795_v29, %v1796_v26  ;;  %v2586_v63 = vmax.f32 %v2584_v44, %v2585_v25 }
 0x2de   : > { %v1798_v57 = vrot.slane %v1797_v55, 2  ;;  %v2587_v4 = vrot.slane %v2586_v63, 2 }
 0x2e0   : > { %v1799_v60 = vmax.f32 %v1797_v55, %v1798_v57  ;;  %v2588_v11 = vmax.f32 %v2586_v63, %v2587_v4 }
 0x2e2   : > { %v1800_v33 = vrot.slane %v1799_v60, 1  ;;  %v2589_v24 = vrot.slane %v2588_v11, 1 }
 0x2e4   : > { %v4378_v22 = vmax.f32 %v1799_v60, %v1800_v33  ;;  %v4394_v1 = vmax.f32 %v2588_v11, %v2589_v24 }
 0x2e6   : > { %v1802_v18 = vsub.f32 %v4215_v56, %v4378_v22  ;;  %v1803_v15 = vsub.f32 %v4221_v52, %v4378_v22  ;;  %v1804_v6 = vsub.f32 %v4229_v3, %v4378_v22  ;;  %v1805_v19 = vsub.f32 %v4235_v13, %v4378_v22 }
 0x2e7   : > { %v1806_v16 = vsub.f32 %v4241_v8, %v4378_v22  ;;  %v1807_v31 = vsub.f32 %v4249_v27, %v4378_v22  ;;  %v1808_v34 = vsub.f32 %v4255_v7, %v4378_v22  ;;  %v1809_v46 = vsub.f32 %v4261_v45, %v4378_v22 }
 0x2e8   : > { %v1818_v21 = vmul.f32 1.442695, %v1802_v18  ;;  %v1820_v23 = vmul.f32 1.442695, %v1803_v15  ;;  %v1822_v12 = vmul.f32 1.442695, %v1804_v6  ;;  %v1810_v43 = vsub.f32 %v4267_v50, %v4378_v22 }
 0x2e9   : > { %v1824_v17 = vmul.f32 1.442695, %v1805_v19  ;;  %v1826_v35 = vmul.f32 1.442695, %v1806_v16  ;;  %v1828_v49 = vmul.f32 1.442695, %v1807_v31  ;;  %v1811_v38 = vsub.f32 %v4273_v62, %v4378_v22 }
 0x2ea   : > { %3443 = vpow2.f32 %v1818_v21  ;;  %v1830_v41 = vmul.f32 1.442695, %v1808_v34  ;;  %v1812_v29 = vsub.f32 %v4279_v5, %v4378_v22  ;;  %v1832_v26 = vmul.f32 1.442695, %v1809_v46 }
 0x2eb   : > { %3445 = vpow2.f32 %v1820_v23  ;;  %v2591_v25 = vsub.f32 %v4215_v56, %v4394_v1  ;;  %v1834_v60 = vmul.f32 1.442695, %v1810_v43  ;;  %v2592_v33 = vsub.f32 %v4221_v52, %v4394_v1 }
 0x2ec   : > { %3447 = vpow2.f32 %v1822_v12  ;;  %v1836_v18 = vmul.f32 1.442695, %v1811_v38  ;;  %v2593_v6 = vsub.f32 %v4229_v3, %v4394_v1  ;;  %v1817_v11 = vsub.f32 %v4369_v20, %v4378_v22 }
 0x2ed   : > { %3449 = vpow2.f32 %v1824_v17  ;;  %v1838_v19 = vmul.f32 1.442695, %v1812_v29  ;;  %v2594_v21 = vsub.f32 %v4235_v13, %v4394_v1  ;;  %v1813_v12 = vsub.f32 %v4285_v14, %v4378_v22 }
 0x2ee   : > { %3451 = vpow2.f32 %v1826_v35  ;;  %v2607_v31 = vmul.f32 1.442695, %v2591_v25  ;;  %v2595_v34 = vsub.f32 %v4241_v8, %v4394_v1  ;;  %v2609_v35 = vmul.f32 1.442695, %v2592_v33 }
 0x2ef   : > { %3453 = vpow2.f32 %v1828_v49  ;;  %v1814_v49 = vsub.f32 %v4291_v2, %v4378_v22  ;;  %v2611_v38 = vmul.f32 1.442695, %v2593_v6  ;;  %v2596_v29 = vsub.f32 %v4249_v27, %v4394_v1 }
 0x2f0   : > { %v4402_v54 = vpop.eup %3443  ;;  %3455 = vpow2.f32 %v1830_v41  ;;  %v1815_v25 = vsub.f32 %v4297_v39, %v4378_v22 }
 0x2f1   : > { %v4406_v44 = vpop.eup %3445  ;;  %v1850_v55 = vsel %vm1764_vm2, %v4402_v54, 0.0  ;;  %3457 = vpow2.f32 %v1832_v26  ;;  %v2613_v26 = vmul.f32 1.442695, %v2594_v21 }
 0x2f2   : > { %v4412_v57 = vpop.eup %3447  ;;  %v1851_v63 = vsel %vm1764_vm2, %v4406_v44, 0.0  ;;  %3459 = vpow2.f32 %v1834_v60  ;;  %v1840_v60 = vmul.f32 1.442695, %v1813_v12 }
 0x2f3   : > { %v4418_v4 = vpop.eup %3449  ;;  %v1852_v15 = vadd.f32 %v1851_v63, %v1850_v55  ;;  %v1853_v16 = vsel %vm1764_vm2, %v4412_v57, 0.0  ;;  %3461 = vpow2.f32 %v1836_v18  ;;  %v2597_v18 = vsub.f32 %v4255_v7, %v4394_v1 }
 0x2f4   : > { %v4428_v23 = vpop.eup %3451  ;;  %v1855_v17 = vsel %vm1764_vm2, %v4418_v4, 0.0  ;;  %3463 = vpow2.f32 %v1838_v19  ;;  %v1816_v19 = vsub.f32 %v4333_v0, %v4378_v22 }
 0x2f5   : > { %v1854_v24 = vadd.f32 %v1853_v16, %v1852_v15  ;;  %v4436_v46 = vpop.eup %3453  ;;  %v1857_v41 = vsel %vm1764_vm2, %v4428_v23, 0.0  ;;  %3465 = vpow2.f32 %v2607_v31  ;;  %v2615_v15 = vmul.f32 1.442695, %v2595_v34 }
 0x2f6   : > { %v4444_v55 = vpop.eup %3455  ;;  %v1859_v33 = vsel %vm1764_vm2, %v4436_v46, 0.0  ;;  %3467 = vpow2.f32 %v2609_v35  ;;  %v1842_v16 = vmul.f32 1.442695, %v1814_v49  ;;  %v2598_v31 = vsub.f32 %v4261_v45, %v4394_v1 }
 0x2f7   : > { %v1856_v43 = vadd.f32 %v1855_v17, %v1854_v24  ;;  %v4452_v6 = vpop.eup %3457  ;;  %3469 = vpow2.f32 %v2611_v38  ;;  %v1861_v12 = vsel %vm1764_vm2, %v4444_v55, 0.0  ;;  %v2617_v17 = vmul.f32 1.442695, %v2596_v29 }
 0x2f8   : > { %v4456_v24 = vpop.eup %3459  ;;  %3471 = vpow2.f32 %v2613_v26  ;;  %v1848_v34 = vmul.f32 1.442695, %v1817_v11  ;;  %v1863_v49 = vsel %vm1764_vm2, %v4452_v6, 0.0  ;;  %v2599_v38 = vsub.f32 %v4267_v50, %v4394_v1 }
 0x2f9   : > { %v1858_v63 = vadd.f32 %v1857_v41, %v1856_v43  ;;  %v4462_v35 = vpop.eup %3461  ;;  %3473 = vpow2.f32 %v1840_v60  ;;  %v1844_v43 = vmul.f32 1.442695, %v1815_v25  ;;  %v1846_v29 = vmul.f32 1.442695, %v1816_v19 }
 0x2fa   : > { %v4464_v22 = vpop.eup %3463  ;;  %3475 = vpow2.f32 %v2615_v15  ;;  %v2600_v11 = vsub.f32 %v4273_v62, %v4394_v1  ;;  %v1865_v60 = vsel %vm1764_vm2, %v4456_v24, 0.0  ;;  %v2601_v19 = vsub.f32 %v4279_v5, %v4394_v1 }
 0x2fb   : > { %v1860_v21 = vadd.f32 %v1859_v33, %v1858_v63  ;;  %v2619_v63 = vmul.f32 1.442695, %v2597_v18  ;;  %v4470_v33 = vpop.eup %3465  ;;  %3477 = vpow2.f32 %v1842_v16  ;;  %v1869_v59 = vsel %vm1764_vm2, %v4464_v22, 0.0 }
 0x2fc   : > { %v4474_v25 = vpop.eup %3467  ;;  %3479 = vpow2.f32 %v2617_v17  ;;  %v2625_v58 = vmul.f32 1.442695, %v2600_v11  ;;  %v2627_v48 = vmul.f32 1.442695, %v2601_v19 }
 0x2fd   : > { %v1862_v41 = vadd.f32 %v1861_v12, %v1860_v21  ;;  %v2621_v21 = vmul.f32 1.442695, %v2598_v31  ;;  %v2639_v12 = vsel %vm2553_vm3, %v4470_v33, 0.0  ;;  %v4480_v15 = vpop.eup %3469  ;;  %3481 = vpow2.f32 %v1844_v43 }
 0x2fe   : > { %v2640_v16 = vsel %vm2553_vm3, %v4474_v25, 0.0  ;;  %3483 = vpow2.f32 %v2619_v63  ;;  %v2623_v31 = vmul.f32 1.442695, %v2599_v38  ;;  %v2602_v43 = vsub.f32 %v4285_v14, %v4394_v1 }
 0x2ff   : > { %v1864_v26 = vadd.f32 %v1863_v49, %v1862_v41  ;;  %v4486_v41 = vpop.eup %3471  ;;  %v1867_v49 = vsel %vm1764_vm2, %v4462_v35, 0.0  ;;  %v2641_v17 = vadd.f32 %v2640_v16, %v2639_v12  ;;  %3485 = vpow2.f32 %v1846_v29 }
 0x300   : > { %v4490_v42 = vpop.eup %3473  ;;  %3487 = vpow2.f32 %v2621_v21  ;;  %v2603_v29 = vsub.f32 %v4291_v2, %v4394_v1  ;;  %v2629_v47 = vmul.f32 1.442695, %v2602_v43  ;;  %v2606_v43 = vsub.f32 %v4369_v20, %v4394_v1 }
 0x301   : > { %v1866_v18 = vadd.f32 %v1865_v60, %v1864_v26  ;;  %v2642_v26 = vsel %vm2553_vm3, %v4480_v15, 0.0  ;;  %v4496_v60 = vpop.eup %3475  ;;  %3489 = vpow2.f32 %v1848_v34 }
 0x302   : > { %v2643_v63 = vadd.f32 %v2642_v26, %v2641_v17  ;;  %v4500_v38 = vpop.eup %3477  ;;  %3491 = vpow2.f32 %v2623_v31  ;;  %v2631_v36 = vmul.f32 1.442695, %v2603_v29 }
 0x303   : > { %v1868_v32 = vadd.f32 %v1867_v49, %v1866_v18  ;;  %v2644_v18 = vsel %vm2553_vm3, %v4486_v41, 0.0  ;;  %v4506_v16 = vpop.eup %3479  ;;  %v1871_v49 = vsel %vm1764_vm2, %v4490_v42, 0.0  ;;  %v1873_v26 = vsel %vm1764_vm2, %v4500_v38, 0.0 }
 0x304   : > { %v2645_v21 = vadd.f32 %v2644_v18, %v2643_v63  ;;  %v4510_v11 = vpop.eup %3481  ;;  %3493 = vpow2.f32 %v2625_v58  ;;  %v2605_v63 = vsub.f32 %v4333_v0, %v4394_v1 }
 0x305   : > { %v1870_v12 = vadd.f32 %v1869_v59, %v1868_v32  ;;  %v2604_v59 = vsub.f32 %v4297_v39, %v4394_v1  ;;  %v2646_v32 = vsel %vm2553_vm3, %v4496_v60, 0.0  ;;  %v4516_v34 = vpop.eup %3483  ;;  %3495 = vpow2.f32 %v2627_v48 }
 0x306   : > { %v2647_v37 = vadd.f32 %v2646_v32, %v2645_v21  ;;  %v4520_v31 = vpop.eup %3485  ;;  %3497 = vpow2.f32 %v2629_v47  ;;  %v2637_v47 = vmul.f32 1.442695, %v2606_v43 }
 0x307   : > { %v1872_v17 = vadd.f32 %v1871_v49, %v1870_v12  ;;  %v2648_v12 = vsel %vm2553_vm3, %v4506_v16, 0.0  ;;  %v4526_v18 = vpop.eup %3487  ;;  %v1875_v49 = vsel %vm1764_vm2, %v4510_v11, 0.0  ;;  %v2633_v28 = vmul.f32 1.442695, %v2604_v59 }
 0x308   : > { %v2649_v30 = vadd.f32 %v2648_v12, %v2647_v37  ;;  %v4530_v58 = vpop.eup %3489  ;;  %v2652_v37 = vsel %vm2553_vm3, %v4526_v18, 0.0  ;;  %3499 = vpow2.f32 %v2631_v36 }
 0x309   : > { %v1874_v19 = vadd.f32 %v1873_v26, %v1872_v17  ;;  %v2650_v17 = vsel %vm2553_vm3, %v4516_v34, 0.0  ;;  %v4536_v32 = vpop.eup %3491  ;;  %v1877_v26 = vsel %vm1764_vm2, %v4520_v31, 0.0  ;;  %v1879_v1 = vsel %vm1764_vm2, %v4530_v58, 0.0 }
 0x30a   : > { %5083 = vst [vmem:[#allocation20_spill] sm:$0xff] %v4536_v32  ;;  %v2651_v10 = vadd.f32 %v2650_v17, %v2649_v30  ;;  %v4542_v29 = vpop.eup %3493  ;;  %v2654_v9 = vsel %vm2553_vm3, %v4536_v32, 0.0  ;;  %3501 = vpow2.f32 %v2633_v28 }
 0x30b   : > { %v1876_v21 = vadd.f32 %v1875_v49, %v1874_v19  ;;  %5084 = vst [vmem:[#allocation21_spill] sm:$0xff] %v4542_v29  ;;  %v2635_v19 = vmul.f32 1.442695, %v2605_v63  ;;  %v4548_v61 = vpop.eup %3495 }
 0x30c   : > { %v2653_v12 = vadd.f32 %v2652_v37, %v2651_v10  ;;  %v4552_v17 = vpop.eup %3497  ;;  %v2658_v10 = vsel %vm2553_vm3, %v4548_v61, 0.0 }
 0x30d   : > { %v1878_v48 = vadd.f32 %v1877_v26, %v1876_v21  ;;  %v2656_v21 = vsel %vm2553_vm3, %v4542_v29, 0.0  ;;  %3503 = vpow2.f32 %v2635_v19 }
 0x30e   : > { %v2655_v30 = vadd.f32 %v2654_v9, %v2653_v12  ;;  %v4556_v63 = vpop.eup %3499  ;;  %3505 = vpow2.f32 %v2637_v47  ;;  %v2660_v9 = vsel %vm2553_vm3, %v4552_v17, 0.0 }
 0x30f   : > { %v1880_v49 = vadd.f32 %v1879_v1, %v1878_v48  ;;  %5085 = vst [vmem:[#allocation22_spill] sm:$0xff] %v4556_v63  ;;  %v2662_v19 = vsel %vm2553_vm3, %v4556_v63, 0.0 }
 0x310   : > { %v2657_v26 = vadd.f32 %v2656_v21, %v2655_v30  ;;  %v4560_v28 = vpop.eup %3501 }
 0x311   : > { %v1881_v59 = vrot.slane %v1880_v49, 4 }
 0x312   : > { %v2659_v48 = vadd.f32 %v2658_v10, %v2657_v26 }
 0x313   : > { %v1882_v36 = vadd.f32 %v1881_v59, %v1880_v49  ;;  %v4564_v12 = vpop.eup %3503  ;;  %v2664_v59 = vsel %vm2553_vm3, %v4560_v28, 0.0 }
 0x314   : > { %v2661_v43 = vadd.f32 %v2660_v9, %v2659_v48  ;;  %v4568_v47 = vpop.eup %3505  ;;  %v2666_v10 = vsel %vm2553_vm3, %v4564_v12, 0.0 }
 0x315   : > { %v1883_v37 = vrot.slane %v1882_v36, 2 }
 0x316   : > { %v2663_v49 = vadd.f32 %v2662_v19, %v2661_v43 }
 0x317   : > { %v1884_v1 = vadd.f32 %v1883_v37, %v1882_v36  ;;  %v2668_v36 = vsel %vm2553_vm3, %v4568_v47, 0.0  ;;  %vm2214_vm3 = vcmask 195584  }
 0x318   : > { %v2665_v21 = vadd.f32 %v2664_v59, %v2663_v49 }
 0x319   : > { %v1885_v30 = vrot.slane %v1884_v1, 1 }
 0x31a   : > { %v2667_v40 = vadd.f32 %v2666_v10, %v2665_v21 }
 0x31b   : > { %v1886_v26 = vadd.f32 %v1885_v30, %v1884_v1 }
 0x31c   : > { %v2669_v48 = vadd.f32 %v2668_v36, %v2667_v40 }
 0x31d   : > { %3507 = vrcp.f32 %v1886_v26  ;;  %v1898_v32 = vand.u32 2147483648, %v1886_v26  ;;  %v1896_v1 = vand.u32 2147483647, %v1886_v26  ;;  %vm1892_vm5 = vweird.f32 %v1886_v26 }
 0x31e   : > { %v2670_v37 = vrot.slane %v2669_v48, 4 }
 0x31f   : > { %v1899_v21 = vor.u32 1.1754944e-38, %v1898_v32  ;;  %vm1897_vm7 = vcmp.eq.f32.partialorder %v1896_v1, 8.507059e+37 }
 0x320   : > { %v2671_v9 = vadd.f32 %v2670_v37, %v2669_v48 }
 0x322   : > { %v2672_v51 = vrot.slane %v2671_v9, 2 }
 0x323   : > { %v3508_v43 = vpop.eup %3507 }
 0x324   : > { %v1888_v19 = vmul.f32 %v3508_v43, %v1886_v26  ;;  %v2673_v63 = vadd.f32 %v2672_v51, %v2671_v9  ;;  %vm1893_vm4 = vweird.f32 %v3508_v43 }
 0x325   : > { %vm1894_vm6 = vmor %vm1892_vm5, %vm1893_vm4 }
 0x326   : > { %v1889_v53 = vsub.f32 1.0, %v1888_v19  ;;  %v2674_v49 = vrot.slane %v2673_v63, 1 }
 0x328   : > { %v1890_v29 = vmul.f32 %v3508_v43, %v1889_v53  ;;  %v2675_v59 = vadd.f32 %v2674_v49, %v2673_v63 }
 0x32a   : > { %v1891_v30 = vadd.f32 %v3508_v43, %v1890_v29  ;;  %3509 = vrcp.f32 %v2675_v59  ;;  %vm2681_vm9 = vweird.f32 %v2675_v59 }
 0x32c   : > { %v1895_v10 = vsel %vm1894_vm6, %v3508_v43, %v1891_v30 }
 0x32d   : > { %v4574_v40 = vsel %vm1897_vm7, %v1899_v21, %v1895_v10  ;;  %v2279_v10 = vsel %vm1747_vm1, %v4221_v52, -inf }
 0x32e   : > { %v1903_v36 = vmul.f32 %v4412_v57, %v4574_v40  ;;  %v1902_v51 = vmul.f32 %v4406_v44, %v4574_v40  ;;  %v1901_v53 = vmul.f32 %v4402_v54, %v4574_v40  ;;  %v1911_v32 = vmul.f32 %v4464_v22, %v4574_v40 }
 0x32f   : > { %v1910_v29 = vmul.f32 %v4462_v35, %v4574_v40  ;;  %v1914_v57 = vmul.f32 %v4510_v11, %v4574_v40  ;;  %v1913_v44 = vmul.f32 %v4500_v38, %v4574_v40  ;;  %v4595_v54 = vmul.f32 %v4520_v31, %v4574_v40 }
 0x330   : > { %1937 = vrot.lane.b32.xlu1 %v1903_v36, %s3535_s29  ;;  %1935 = vrot.lane.b32.xlu0 %v1902_v51, %s3535_s29  ;;  %v3510_v63 = vpop.eup %3509  ;;  %v2687_v22 = vand.u32 2147483648, %v2675_v59  ;;  %v2685_v35 = vand.u32 2147483647, %v2675_v59  ;;  %v1906_v49 = vmul.f32 %v4436_v46, %v4574_v40  ;;  %v1905_v30 = vmul.f32 %v4428_v23, %v4574_v40 }
 0x331   : > { %1933 = vrot.lane.b32.xlu2 %v1901_v53, %s3535_s29  ;;  %v2677_v26 = vmul.f32 %v3510_v63, %v2675_v59  ;;  %vm2682_vm8 = vweird.f32 %v3510_v63  ;;  %v1909_v23 = vmul.f32 %v4456_v24, %v4574_v40  ;;  %v1908_v46 = vmul.f32 %v4452_v6, %v4574_v40  ;;  %v2035_v24 = vld [vmem:[%s5037_s9] sm:$0xff] }
 0x332   : > { %vm2683_vm10 = vmor %vm2681_vm9, %vm2682_vm8  ;;  %v2688_v31 = vor.u32 1.1754944e-38, %v2687_v22  ;;  %vm2686_vm11 = vcmp.eq.f32.partialorder %v2685_v35, 8.507059e+37  ;;  %2084 = vmatpush.msrb.mxu3 %v2035_v24  ;;  %v2288_v6 = vsel %vm1747_vm1, %v4241_v8, -inf }
 0x333   : > { %v2678_v48 = vsub.f32 1.0, %v2677_v26  ;;  %v2294_v26 = vsel %vm1747_vm1, %v4255_v7, -inf }
 0x335   : > { %v2679_v37 = vmul.f32 %v3510_v63, %v2678_v48 }
 0x337   : > { %v2680_v38 = vadd.f32 %v3510_v63, %v2679_v37 }
 0x338   : > { %2164 = vrot.lane.b32.xlu1 %v4261_v45, %s3534_s20  ;;  %2150 = vrot.lane.b32.xlu0 %v4215_v56, %s3534_s20 }
 0x339   : > { %2154 = vrot.lane.b32.xlu2 %v4229_v3, %s3534_s20  ;;  %v2684_v11 = vsel %vm2683_vm10, %v3510_v63, %v2680_v38 }
 0x33a   : > { %v4603_v9 = vsel %vm2686_vm11, %v2688_v31, %v2684_v11  ;;  %v1916_v11 = vmul.f32 %v4530_v58, %v4574_v40  ;;  %v2312_v31 = vsel %vm1747_vm1, %v4291_v2, -inf }
 0x33b   : > { %v4611_v43 = vmul.f32 %v4552_v17, %v4603_v9  ;;  %v4615_v19 = vmul.f32 %v4564_v12, %v4603_v9  ;;  %v4621_v1 = vmul.f32 %v4560_v28, %v4603_v9  ;;  %v1904_v17 = vmul.f32 %v4418_v4, %v4574_v40  ;;  %v4675_v12 = vpop.permute.xlu1 %2152 }
 0x33c   : > { %v1912_v4 = vmul.f32 %v4490_v42, %v4574_v40  ;;  %v1907_v28 = vmul.f32 %v4444_v55, %v4574_v40  ;;  %v2276_v42 = vsel %vm1747_vm1, %v4215_v56, -inf }
 0x340   : > { %2170 = vrot.lane.b32.xlu1 %v4279_v5, %s3534_s20  ;;  %2156 = vrot.lane.b32.xlu0 %v4235_v13, %s3534_s20 }
 0x341   : > { %2160 = vrot.lane.b32.xlu2 %v4249_v27, %s3534_s20 }
 0x343   : > { %v4679_v21 = vpop.permute.xlu1 %2158 }
 0x348   : > { %1943 = vrot.lane.b32.xlu1 %v1906_v49, %s3535_s29  ;;  %1941 = vrot.lane.b32.xlu0 %v1905_v30, %s3535_s29 }
 0x349   : > { %1939 = vrot.lane.b32.xlu2 %v1904_v17, %s3535_s29  ;;  %v2321_v17 = vsel %vm1747_vm1, %v4369_v20, -inf }
 0x350   : > { %2176 = vrot.lane.b32.xlu1 %v4297_v39, %s3534_s20  ;;  %2162 = vrot.lane.b32.xlu0 %v4255_v7, %s3534_s20 }
 0x351   : > { %2166 = vrot.lane.b32.xlu2 %v4267_v50, %s3534_s20 }
 0x358   : > { %1949 = vrot.lane.b32.xlu1 %v1909_v23, %s3535_s29  ;;  %2168 = vrot.lane.b32.xlu0 %v4273_v62, %s3534_s20 }
 0x359   : > { %2172 = vrot.lane.b32.xlu2 %v4285_v14, %s3534_s20 }
 0x360   : > { %1955 = vrot.lane.b32.xlu1 %v1912_v4, %s3535_s29  ;;  %1947 = vrot.lane.b32.xlu0 %v1908_v46, %s3535_s29  ;;  %v2297_v46 = vsel %vm1747_vm1, %v4261_v45, -inf }
 0x361   : > { %1945 = vrot.lane.b32.xlu2 %v1907_v28, %s3535_s29 }
 0x368   : > { %2174 = vrot.lane.b32.xlu0 %v4291_v2, %s3534_s20 }
 0x369   : > { %2178 = vrot.lane.b32.xlu2 %v4333_v0, %s3534_s20 }
 0x370   : > { %1953 = vrot.lane.b32.xlu0 %v1911_v32, %s3535_s29  ;;  %v2285_v32 = vsel %vm1747_vm1, %v4235_v13, -inf }
 0x371   : > { %1951 = vrot.lane.b32.xlu2 %v1910_v29, %s3535_s29  ;;  %v2282_v29 = vsel %vm1747_vm1, %v4229_v3, -inf }
 0x378   : > { %1959 = vrot.lane.b32.xlu0 %v1914_v57, %s3535_s29 }
 0x379   : > { %1957 = vrot.lane.b32.xlu2 %v1913_v44, %s3535_s29 }
 0x380   : > { %2180 = vrot.lane.b32.xlu0 %v4369_v20, %s3534_s20 }
 0x38a   : > { %2277 = vmax.xlane.f32.xlu1 %v2276_v42  ;;  %v2306_v42 = vsel %vm1747_vm1, %v4279_v5, -inf }
 0x38b   : > { %v4669_v55 = vpop.permute.xlu2 %1933 }
 0x38c   : > { %3234 = vmatmul.msk.f32.vlgmr.msrb.gmra.mxu3 %vm2036_vm12, %v4669_v55 }
 0x392   : > { %2289 = vmax.xlane.f32.xlu1 %v2288_v6 }
 0x393   : > { %v4677_v59 = vpop.permute.xlu2 %2154 }
 0x39b   : > { %v4683_v36 = vpop.permute.xlu2 %2160 }
 0x3a2   : > { %2280 = vmax.xlane.f32.xlu2 %v2279_v10  ;;  %v4685_v51 = vpop.permute.xlu0 %1935  ;;  %v4689_v53 = vpop.permute.xlu1 %1937 }
 0x3a3   : > { %3235 = vmatmul.msk.f32.gmra.mxu3 %vm2036_vm12, %v4685_v51  ;;  %v4701_v44 = vpop.permute.xlu2 %1939 }
 0x3aa   : > { %2286 = vmax.xlane.f32.xlu2 %v2285_v32  ;;  %2283 = vmax.xlane.f32.xlu0 %v2282_v29  ;;  %v4695_v57 = vpop.permute.xlu0 %2150  ;;  %v4703_v63 = vpop.permute.xlu1 %2164  ;;  %v2315_v32 = vsel %vm1747_vm1, %v4297_v39, -inf }
 0x3ab   : > { %1961 = vrot.lane.b32.xlu1 %v4595_v54, %s3535_s29  ;;  %3236 = vmatmul.msk.f32.gmra.mxu3 %vm2036_vm12, %v4689_v53  ;;  %v4711_v37 = vpop.permute.xlu2 %2166  ;;  %v2303_v54 = vsel %vm1747_vm1, %v4273_v62, -inf }
 0x3b2   : > { %2295 = vmax.xlane.f32.xlu0 %v2294_v26  ;;  %v4707_v48 = vpop.permute.xlu0 %2156  ;;  %v4713_v22 = vpop.permute.xlu1 %2170  ;;  %v2291_v26 = vsel %vm1747_vm1, %v4249_v27, -inf }
 0x3b3   : > { %3237 = vmatmul.msk.f32.gmra.mxu3 %vm2036_vm12, %v4701_v44  ;;  %5086 = vst [vmem:[#allocation23_spill] sm:$0xff] %v4713_v22  ;;  %v4721_v38 = vpop.permute.xlu2 %2172 }
 0x3b4   : > { %5087 = vst [vmem:[#allocation24_spill] sm:$0xff] %v4721_v38 }
 0x3ba   : > { %2304 = vmax.xlane.f32.xlu0 %v2303_v54  ;;  %v4717_v35 = vpop.permute.xlu0 %1941  ;;  %v4727_v49 = vpop.permute.xlu1 %1943 }
 0x3bb   : > { %3238 = vmatmul.msk.f32.gmra.mxu3 %vm2036_vm12, %v4717_v35  ;;  %v4736_v23 = vpop.permute.xlu2 %1945 }
 0x3c2   : > { %1963 = vrot.lane.b32.xlu2 %v1916_v11, %s3535_s29  ;;  %2313 = vmax.xlane.f32.xlu0 %v2312_v31  ;;  %v4730_v30 = vpop.permute.xlu0 %2162  ;;  %v4742_v40 = vpop.permute.xlu1 %2176  ;;  %v2300_v11 = vsel %vm1747_vm1, %v4267_v50, -inf  ;;  %s3539_s29 = smov 1.0  }
 0x3c3   : > { %3239 = vmatmul.msk.f32.gmra.mxu3 %vm2036_vm12, %v4727_v49  ;;  %5088 = vst [vmem:[#allocation25_spill] sm:$0xff] %v4742_v40  ;;  %v4750_v28 = vpop.permute.xlu2 %2178 }
 0x3c4   : > { %5089 = vst [vmem:[#allocation26_spill] sm:$0xff] %v4750_v28 }
 0x3ca   : > { %2322 = vmax.xlane.f32.xlu0 %v2321_v17  ;;  %v4738_v58 = vpop.permute.xlu0 %2168  ;;  %v4752_v24 = vpop.permute.xlu1 %1949  ;;  %v2309_v17 = vsel %vm1747_vm1, %v4285_v14, -inf }
 0x3cb   : > { %3240 = vmatmul.msk.f32.gmra.mxu3 %vm2036_vm12, %v4736_v23  ;;  %v4760_v10 = vpop.permute.xlu2 %1951 }
 0x3d2   : > { %v4744_v4 = vpop.permute.xlu0 %1947  ;;  %v4772_v54 = vpop.permute.xlu1 %1955 }
 0x3d3   : > { %3241 = vmatmul.msk.f32.gmra.mxu3 %vm2036_vm12, %v4744_v4  ;;  %v4778_v31 = vpop.permute.xlu2 %1957 }
 0x3d5   : > { %2298 = vmax.xlane.f32.xlu1 %v2297_v46  ;;  %v2690_v46 = vmul.f32 %v4470_v33, %v4603_v9  ;;  %v2697_v33 = vmul.f32 %v4526_v18, %v4603_v9 }
 0x3da   : > { %v4758_v6 = vpop.permute.xlu0 %2174 }
 0x3db   : > { %3242 = vmatmul.msk.f32.gmra.mxu3 %vm2036_vm12, %v4752_v24  ;;  %5090 = vst [vmem:[#allocation27_spill] sm:$0xff] %v4758_v6 }
 0x3dd   : > { %2307 = vmax.xlane.f32.xlu1 %v2306_v42 }
 0x3e2   : > { %v4766_v29 = vpop.permute.xlu0 %1953 }
 0x3e3   : > { %3243 = vmatmul.msk.f32.gmra.mxu3 %vm2036_vm12, %v4760_v10 }
 0x3e5   : > { %2316 = vmax.xlane.f32.xlu1 %v2315_v32  ;;  %v2318_v32 = vsel %vm1747_vm1, %v4333_v0, -inf }
 0x3ea   : > { %v1960_v42 = vpop.permute.xlu0 %1959 }
 0x3eb   : > { %2292 = vmax.xlane.f32.xlu2 %v2291_v26  ;;  %3244 = vmatmul.msk.f32.gmra.mxu3 %vm2036_vm12, %v4766_v29  ;;  %v2692_v26 = vmul.f32 %v4480_v15, %v4603_v9 }
 0x3f2   : > { %v4800_v15 = vpop.permute.xlu0 %2180 }
 0x3f3   : > { %2301 = vmax.xlane.f32.xlu2 %v2300_v11  ;;  %3245 = vmatmul.msk.f32.gmra.mxu3 %vm2036_vm12, %v4772_v54 }
 0x3fb   : > { %2310 = vmax.xlane.f32.xlu2 %v2309_v17  ;;  %3246 = vmatmul.msk.f32.gmra.mxu3 %vm2036_vm12, %v4778_v31  ;;  %v2694_v17 = vmul.f32 %v4496_v60, %v4603_v9 }
 0x3fd   : > { %v2278_v11 = vpop.xlane.xlu1 %2277 }
 0x3fe   : > { %2722 = vrot.lane.b32.xlu1 %v2690_v46, %s3536_s17  ;;  %vm2324_vm13 = vcmp.ge.f32.partialorder %v4215_v56, %v2278_v11  ;;  %v3537_v46 = vmov 0.0   ;;  %v2700_v56 = vmul.f32 %v4548_v61, %v4603_v9 }
 0x403   : > { %2319 = vmax.xlane.f32.xlu2 %v2318_v32  ;;  %3247 = vmatmul.msk.f32.gmra.mxu3 %vm2036_vm12, %v1960_v42  ;;  %v3250_v32 = vsel %vm2324_vm13, 1.0, %v3537_v46 }
 0x405   : > { %v2290_v28 = vpop.xlane.xlu1 %2289 }
 0x406   : > { %2726 = vrot.lane.b32.xlu1 %v2692_v26, %s3536_s17  ;;  %v2373_v26 = vsel %vm2372_vm14, %v3250_v32, 0.0  ;;  %vm2328_vm1 = vcmp.ge.f32.partialorder %v4241_v8, %v2290_v28 }
 0x40e   : > { %2730 = vrot.lane.b32.xlu1 %v2694_v17, %s3536_s17 }
 0x40f   : > { %v2086_v22 = vpop.f32.mrf.mxu3 }
 0x415   : > { %v2281_v40 = vpop.xlane.xlu2 %2280 }
 0x416   : > { %vm2325_vm15 = vcmp.ge.f32.partialorder %v4221_v52, %v2281_v40  ;;  %2736 = vrot.lane.b32.xlu1 %v2697_v33, %s3536_s17 }
 0x417   : > { %v3251_v60 = vsel %vm2325_vm15, 1.0, %v3537_v46 }
 0x418   : > { %v3398_v11 = vpack.i.bf16 %v3251_v60, %v3250_v32  ;;  %v2374_v17 = vsel %vm2372_vm14, %v3251_v60, 0.0 }
 0x419   : > { %v2375_v18 = vadd.f32 %v2374_v17, %v2373_v26  ;;  %v2691_v26 = vmul.f32 %v4474_v25, %v4603_v9 }
 0x41b   : > { %3399 = vperm.xlu2 %3397, %v3398_v11  }
 0x41d   : > { %v2287_v6 = vpop.xlane.xlu2 %2286  ;;  %v1962_v38 = vpop.permute.xlu1 %1961 }
 0x41e   : > { %vm2327_vm0 = vcmp.ge.f32.partialorder %v4235_v13, %v2287_v6  ;;  %v2284_v40 = vpop.xlane.xlu0 %2283  ;;  %2742 = vrot.lane.b32.xlu1 %v2700_v56, %s3536_s17  ;;  %3248 = vmatmul.msk.f32.gmra.mxu3 %vm2036_vm12, %v1962_v38  ;;  %v4820_v6 = vsel %vm2328_vm1, 1.0, %v3537_v46  ;;  %vm2033_vm1 = vcmask 23552  }
 0x41f   : > { %v3253_v33 = vsel %vm2327_vm0, 1.0, %v3537_v46  ;;  %vm2326_vm2 = vcmp.ge.f32.partialorder %v4229_v3, %v2284_v40  ;;  %v2380_v17 = vsel %vm2372_vm14, %v4820_v6, 0.0  ;;  %v2198_v40 = vmul.f32 %v4695_v57, %v2086_v22 }
 0x420   : > { %v3252_v32 = vsel %vm2326_vm2, 1.0, %v3537_v46  ;;  %v2378_v11 = vsel %vm2372_vm14, %v3253_v33, 0.0  ;;  %v2696_v57 = vmul.f32 %v4516_v34, %v4603_v9  ;;  %v2695_v34 = vmul.f32 %v4506_v16, %v4603_v9 }
 0x421   : > { %v2376_v61 = vsel %vm2372_vm14, %v3252_v32, 0.0  ;;  %v3404_v60 = vpack.i.bf16 %v3253_v33, %v3252_v32  ;;  %v2215_v33 = vsel %vm2214_vm3, %v2198_v40, 0.0  ;;  %vm2786_vm0 = vcmask 285968  }
 0x422   : > { %v2377_v56 = vadd.f32 %v2376_v61, %v2375_v18 }
 0x423   : > { %2724 = vrot.lane.b32.xlu2 %v2691_v26, %s3536_s17  ;;  %3405 = vperm.xlu0 %3403, %v3404_v60   ;;  %v2693_v60 = vmul.f32 %v4486_v41, %v4603_v9 }
 0x424   : > { %v2379_v28 = vadd.f32 %v2378_v11, %v2377_v56 }
 0x425   : > { %v1964_v8 = vpop.permute.xlu2 %1963 }
 0x426   : > { %3321 = vmatpush.lsf.msrb.mxu0 %v1964_v8  ;;  %v2089_v32 = vpop.f32.mrf.mxu3  ;;  %3249 = vmatmul.msk.f32.gmra.mxu3 %vm2036_vm12, %v1964_v8  ;;  %v4828_v25 = vadd.f32 %v2380_v17, %v2379_v28  ;;  %v2705_v28 = vmul.f32 %v4568_v47, %v4603_v9 }
 0x427   : > { %v2199_v18 = vmul.f32 %v4675_v12, %v2089_v32 }
 0x428   : > { %3322 = vmatpush.lsf.msrb.mxu0 %v1962_v38  ;;  %v5091_v38 = vld [vmem:[#allocation21_spill] sm:$0xff] }
 0x429   : > { %v2216_v61 = vsel %vm2214_vm3, %v2199_v18, 0.0 }
 0x42a   : > { %v2217_v22 = vadd.f32 %v2216_v61, %v2215_v33  ;;  %3323 = vmatpush.lsf.msrb.mxu0 %v1960_v42  ;;  %v2699_v42 = vmul.f32 %v5091_v38, %v4603_v9 }
 0x42b   : > { %2728 = vrot.lane.b32.xlu2 %v2693_v60, %s3536_s17  ;;  %2734 = vrot.lane.b32.xlu0 %v2696_v57, %s3536_s17 }
 0x42c   : > { %3324 = vmatpush.lsf.msrb.mxu0 %v4778_v31 }
 0x42e   : > { %3325 = vmatpush.lsf.msrb.mxu0 %v4772_v54  ;;  %v2092_v8 = vpop.f32.mrf.mxu3  ;;  %v5092_v54 = vld [vmem:[#allocation20_spill] sm:$0xff] }
 0x42f   : > { %v2200_v12 = vmul.f32 %v4677_v59, %v2092_v8  ;;  %v2698_v31 = vmul.f32 %v5092_v54, %v4603_v9 }
 0x430   : > { %3326 = vmatpush.lsf.msrb.mxu0 %v4766_v29 }
 0x431   : > { %v2218_v41 = vsel %vm2214_vm3, %v2200_v12, 0.0 }
 0x432   : > { %v2219_v26 = vadd.f32 %v2218_v41, %v2217_v22  ;;  %3327 = vmatpush.lsf.msrb.mxu0 %v4760_v10  ;;  %v5093_v10 = vld [vmem:[#allocation22_spill] sm:$0xff] }
 0x433   : > { %2732 = vrot.lane.b32.xlu2 %v2695_v34, %s3536_s17  ;;  %2740 = vrot.lane.b32.xlu0 %v2699_v42, %s3536_s17  ;;  %v2702_v56 = vmul.f32 %v5093_v10, %v4603_v9 }
 0x434   : > { %3328 = vmatpush.lsf.msrb.mxu0 %v4752_v24 }
 0x436   : > { %3329 = vmatpush.lsf.msrb.mxu0 %v4744_v4  ;;  %v2095_v59 = vpop.f32.mrf.mxu3  ;;  %v2296_v4 = vpop.xlane.xlu0 %2295 }
 0x437   : > { %v2201_v29 = vmul.f32 %v4707_v48, %v2095_v59  ;;  %vm2330_vm5 = vcmp.ge.f32.partialorder %v4255_v7, %v2296_v4 }
 0x438   : > { %3330 = vmatpush.lsf.msrb.mxu0 %v4736_v23  ;;  %v3256_v9 = vsel %vm2330_vm5, 1.0, %v3537_v46 }
 0x439   : > { %v2220_v16 = vsel %vm2214_vm3, %v2201_v29, 0.0  ;;  %v2384_v22 = vsel %vm2372_vm14, %v3256_v9, 0.0 }
 0x43a   : > { %v2221_v11 = vadd.f32 %v2220_v16, %v2219_v26  ;;  %3331 = vmatpush.lsf.msrb.mxu0 %v4727_v49 }
 0x43b   : > { %2738 = vrot.lane.b32.xlu2 %v2698_v31, %s3536_s17  ;;  %2746 = vrot.lane.b32.xlu0 %v2702_v56, %s3536_s17 }
 0x43c   : > { %3332 = vmatpush.lsf.msrb.mxu0 %v4717_v35 }
 0x43e   : > { %3333 = vmatpush.lsf.msrb.mxu0 %v4701_v44  ;;  %v2098_v48 = vpop.f32.mrf.mxu3 }
 0x43f   : > { %v2202_v23 = vmul.f32 %v4679_v21, %v2098_v48 }
 0x440   : > { %3334 = vmatpush.lsf.msrb.mxu0 %v4689_v53  ;;  %v2305_v53 = vpop.xlane.xlu0 %2304 }
 0x441   : > { %v2222_v24 = vsel %vm2214_vm3, %v2202_v23, 0.0  ;;  %vm2333_vm9 = vcmp.ge.f32.partialorder %v4273_v62, %v2305_v53 }
 0x442   : > { %v4870_v49 = vadd.f32 %v2222_v24, %v2221_v11  ;;  %3335 = vmatpush.lsf.msrb.mxu0 %v4685_v51  ;;  %v3259_v38 = vsel %vm2333_vm9, 1.0, %v3537_v46 }
 0x443   : > { %2744 = vrot.lane.b32.xlu2 %v4611_v43, %s3536_s17  ;;  %2752 = vrot.lane.b32.xlu0 %v2705_v28, %s3536_s17  ;;  %v2390_v16 = vsel %vm2372_vm14, %v3259_v38, 0.0 }
 0x444   : > { %3336 = vmatpush.lsf.msrb.mxu0 %v4669_v55 }
 0x445   : > { %3337 = vllmr.1.mxu0 }
 0x446   : > { %v4877_v44 = vpop.f32.mrf.mxu3 }
 0x448   : > { %v2299_v21 = vpop.xlane.xlu1 %2298  ;;  %v2314_v55 = vpop.xlane.xlu0 %2313 }
 0x449   : > { %vm2331_vm4 = vcmp.ge.f32.partialorder %v4261_v45, %v2299_v21  ;;  %vm2336_vm6 = vcmp.ge.f32.partialorder %v4291_v2, %v2314_v55 }
 0x44a   : > { %v3257_v47 = vsel %vm2331_vm4, 1.0, %v3537_v46  ;;  %v3262_v40 = vsel %vm2336_vm6, 1.0, %v3537_v46 }
 0x44b   : > { %2750 = vrot.lane.b32.xlu2 %v4615_v19, %s3536_s17  ;;  %v3415_v51 = vpack.i.bf16 %v3257_v47, %v3256_v9  ;;  %v2386_v41 = vsel %vm2372_vm14, %v3257_v47, 0.0  ;;  %v2396_v21 = vsel %vm2372_vm14, %v3262_v40, 0.0 }
 0x44e   : > { %v4885_v35 = vpop.f32.mrf.mxu3 }
 0x450   : > { %v2308_v43 = vpop.xlane.xlu1 %2307  ;;  %v2323_v24 = vpop.xlane.xlu0 %2322 }
 0x451   : > { %vm2334_vm11 = vcmp.ge.f32.partialorder %v4279_v5, %v2308_v43  ;;  %vm2339_vm13 = vcmp.ge.f32.partialorder %v4369_v20, %v2323_v24 }
 0x452   : > { %v4908_v54 = vsel %vm2334_vm11, 1.0, %v3537_v46  ;;  %v3265_v43 = vsel %vm2339_vm13, 1.0, %v3537_v46 }
 0x453   : > { %3416 = vperm.xlu2 %3397, %v3415_v51   ;;  %v2392_v56 = vsel %vm2372_vm14, %v4908_v54, 0.0 }
 0x456   : > { %v2107_v18 = vpop.f32.mrf.mxu3 }
 0x458   : > { %v2317_v17 = vpop.xlane.xlu1 %2316 }
 0x459   : > { %vm2337_vm7 = vcmp.ge.f32.partialorder %v4297_v39, %v2317_v17 }
 0x45a   : > { %v3263_v19 = vsel %vm2337_vm7, 1.0, %v3537_v46  ;;  %vm2828_vm7 = vcmask 0  }
 0x45b   : > { %v3430_v32 = vpack.i.bf16 %v3263_v19, %v3262_v40  ;;  %v2398_v9 = vsel %vm2372_vm14, %v3263_v19, 0.0  ;;  %v2402_v40 = vsel %vm2372_vm14, %v3265_v43, 0.0  ;;  %v2203_v19 = vmul.f32 %v4683_v36, %v4877_v44 }
 0x45d   : > { %3431 = vperm.xlu2 %3397, %v3430_v32  }
 0x45e   : > { %v2293_v33 = vpop.xlane.xlu2 %2292  ;;  %v2110_v34 = vpop.f32.mrf.mxu3 }
 0x45f   : > { %vm2329_vm8 = vcmp.ge.f32.partialorder %v4249_v27, %v2293_v33 }
 0x460   : > { %v4893_v61 = vsel %vm2329_vm8, 1.0, %v3537_v46 }
 0x461   : > { %v2382_v60 = vsel %vm2372_vm14, %v4893_v61, 0.0 }
 0x462   : > { %v2383_v57 = vadd.f32 %v2382_v60, %v4828_v25 }
 0x464   : > { %v2385_v8 = vadd.f32 %v2384_v22, %v2383_v57 }
 0x466   : > { %v2302_v12 = vpop.xlane.xlu2 %2301  ;;  %3338 = vmatmul.lmr.bf16.vlgmr.msra.gmra.1.mxu0  ;;  %v2387_v42 = vadd.f32 %v2386_v41, %v2385_v8  ;;  %v2113_v23 = vpop.f32.mrf.mxu3  ;;  %v2205_v41 = vmul.f32 %v4703_v63, %v2107_v18 }
 0x467   : > { %vm2332_vm10 = vcmp.ge.f32.partialorder %v4267_v50, %v2302_v12  ;;  %v2204_v12 = vmul.f32 %v4730_v30, %v4885_v35  ;;  %v2207_v36 = vmul.f32 %v4738_v58, %v2113_v23  ;;  %v5094_v35 = vld [vmem:[#allocation23_spill] sm:$0xff]  ;;  %v5097_v23 = vld [vmem:[#allocation25_spill] sm:$0xff] }
 0x468   : > { %v3258_v26 = vsel %vm2332_vm10, 1.0, %v3537_v46 }
 0x469   : > { %v3420_v25 = vpack.i.bf16 %v3259_v38, %v3258_v26  ;;  %v2388_v59 = vsel %vm2372_vm14, %v3258_v26, 0.0  ;;  %v2226_v38 = vsel %vm2214_vm3, %v2204_v12, 0.0  ;;  %v2232_v18 = vsel %vm2214_vm3, %v2207_v36, 0.0 }
 0x46a   : > { %v2389_v29 = vadd.f32 %v2388_v59, %v2387_v42  ;;  %v2206_v42 = vmul.f32 %v4711_v37, %v2110_v34  ;;  %v2228_v59 = vsel %vm2214_vm3, %v2205_v41, 0.0 }
 0x46b   : > { %3421 = vperm.xlu0 %3403, %v3420_v25  }
 0x46c   : > { %v2391_v31 = vadd.f32 %v2390_v16, %v2389_v29  ;;  %v2230_v30 = vsel %vm2214_vm3, %v2206_v42, 0.0  ;;  %v5095_v16 = vld [vmem:[#allocation24_spill] sm:$0xff] }
 0x46e   : > { %v2311_v10 = vpop.xlane.xlu2 %2310  ;;  %v2393_v11 = vadd.f32 %v2392_v56, %v2391_v31  ;;  %v2116_v60 = vpop.f32.mrf.mxu3  ;;  %v5096_v31 = vld [vmem:[#allocation27_spill] sm:$0xff] }
 0x46f   : > { %vm2335_vm12 = vcmp.ge.f32.partialorder %v4285_v14, %v2311_v10  ;;  %v2208_v29 = vmul.f32 %v5094_v35, %v2116_v60 }
 0x470   : > { %v3261_v48 = vsel %vm2335_vm12, 1.0, %v3537_v46 }
 0x471   : > { %v2394_v4 = vsel %vm2372_vm14, %v3261_v48, 0.0 }
 0x472   : > { %v2395_v28 = vadd.f32 %v2394_v4, %v2393_v11 }
 0x474   : > { %v2397_v53 = vadd.f32 %v2396_v21, %v2395_v28  ;;  %v3425_v21 = vpack.i.bf16 %v3261_v48, %v4908_v54 }
 0x476   : > { %v2320_v47 = vpop.xlane.xlu2 %2319  ;;  %v2399_v55 = vadd.f32 %v2398_v9, %v2397_v53  ;;  %v2119_v22 = vpop.f32.mrf.mxu3 }
 0x477   : > { %vm2338_vm15 = vcmp.ge.f32.partialorder %v4333_v0, %v2320_v47  ;;  %v2209_v37 = vmul.f32 %v5095_v16, %v2119_v22 }
 0x478   : > { %v3264_v51 = vsel %vm2338_vm15, 1.0, %v3537_v46  ;;  %v2224_v46 = vsel %vm2214_vm3, %v2203_v19, 0.0  ;;  %v2723_v19 = vpop.permute.xlu1 %2722 }
 0x479   : > { %v3435_v17 = vpack.i.bf16 %v3265_v43, %v3264_v51  ;;  %v2400_v32 = vsel %vm2372_vm14, %v3264_v51, 0.0  ;;  %v2225_v26 = vadd.f32 %v2224_v46, %v4870_v49  ;;  %v2234_v49 = vsel %vm2214_vm3, %v2208_v29, 0.0 }
 0x47a   : > { %v2401_v33 = vadd.f32 %v2400_v32, %v2399_v55  ;;  %v2236_v11 = vsel %vm2214_vm3, %v2209_v37, 0.0  ;;  %vm2252_vm14 = vcmask 188416  }
 0x47b   : > { %3436 = vperm.xlu0 %3403, %v3435_v17   ;;  %v2227_v44 = vadd.f32 %v2226_v38, %v2225_v26 }
 0x47c   : > { %v2403_v57 = vadd.f32 %v2402_v40, %v2401_v33 }
 0x47d   : > { %v2229_v63 = vadd.f32 %v2228_v59, %v2227_v44  ;;  %v5099_v59 = vld [vmem:[#allocation18_spill] sm:$0xff] }
 0x47e   : > { %2404 = vadd.xlane.f32.xlu1 %v2403_v57  ;;  %v2122_v8 = vpop.f32.mrf.mxu3  ;;  %v4957_v46 = vpop.permute.xlu2 %3399  ;;  %v2770_v36 = vmul.f32 %v2723_v19, %v5099_v59 }
 0x47f   : > { %v2231_v34 = vadd.f32 %v2230_v30, %v2229_v63  ;;  %v2210_v10 = vmul.f32 %v5096_v31, %v2122_v8  ;;  %v3402_v19 = vunpack.i.h.bf16 %v4957_v46 }
 0x480   : > { %v2727_v12 = vpop.permute.xlu1 %2726  ;;  %v2787_v30 = vsel %vm2786_vm0, %v2770_v36, 0.0  ;;  %v5101_v36 = vld [vmem:[#allocation3_spill] sm:$0xff] }
 0x481   : > { %v2233_v58 = vadd.f32 %v2232_v18, %v2231_v34  ;;  %v2238_v28 = vsel %vm2214_vm3, %v2210_v10, 0.0  ;;  %v2772_v35 = vmul.f32 %v2727_v12, %v4229_v3  ;;  %v3401_v12 = vunpack.i.l.bf16 %v4957_v46  ;;  %v5103_v46 = vld [vmem:[#allocation4_spill] sm:$0xff] }
 0x483   : > { %v2235_v24 = vadd.f32 %v2234_v49, %v2233_v58  ;;  %v2790_v37 = vsel %vm2786_vm0, %v2772_v35, 0.0  ;;  %v5100_v49 = vld [vmem:[#allocation19_spill] sm:$0xff] }
 0x485   : > { %v2237_v53 = vadd.f32 %v2236_v11, %v2235_v24 }
 0x486   : > { %v2125_v25 = vpop.f32.mrf.mxu3  ;;  %v2725_v41 = vpop.permute.xlu2 %2724 }
 0x487   : > { %v2211_v4 = vmul.f32 %v5097_v23, %v2125_v25  ;;  %v2239_v9 = vadd.f32 %v2238_v28, %v2237_v53  ;;  %v2771_v25 = vmul.f32 %v2725_v41, %v4221_v52 }
 0x489   : > { %v2240_v47 = vsel %vm2214_vm3, %v2211_v4, 0.0  ;;  %v2788_v44 = vsel %vm2786_vm0, %v2771_v25, 0.0 }
 0x48a   : > { %v2241_v51 = vadd.f32 %v2240_v47, %v2239_v9  ;;  %v2789_v63 = vadd.f32 %v2788_v44, %v2787_v30  ;;  %v2494_v44 = vmul.f32 %v3402_v19, %v5101_v36  ;;  %v5112_v36 = vld [vmem:[#allocation13_spill] sm:$0xff] }
 0x48c   : > { %v2791_v52 = vadd.f32 %v2790_v37, %v2789_v63 }
 0x48e   : > { %v2729_v42 = vpop.permute.xlu2 %2728 }
 0x48f   : > { %v2773_v29 = vmul.f32 %v2729_v42, %v4235_v13 }
 0x491   : > { %v2792_v34 = vsel %vm2786_vm0, %v2773_v29, 0.0 }
 0x492   : > { %v2793_v58 = vadd.f32 %v2792_v34, %v2791_v52 }
 0x495   : > { %v4959_v26 = vpop.permute.xlu0 %3405 }
 0x496   : > { %v2733_v18 = vpop.permute.xlu2 %2732  ;;  %v3407_v41 = vunpack.i.l.bf16 %v4959_v26  ;;  %v3408_v34 = vunpack.i.h.bf16 %v4959_v26 }
 0x497   : > { %2748 = vrot.lane.b32.xlu1 %v4621_v1, %s3536_s17  ;;  %v3410_v1 = vpack.i.bf16 %v4893_v61, %v4820_v6  ;;  %v5098_v6 = vld [vmem:[#allocation26_spill] sm:$0xff]  ;;  %v2775_v10 = vmul.f32 %v2733_v18, %v4249_v27 }
 0x498   : > { %v2495_v63 = vmul.f32 %v3407_v41, %v5103_v46  ;;  %v5114_v46 = vld [vmem:[#allocation15_spill] sm:$0xff] }
 0x499   : > { %v2796_v13 = vsel %vm2786_vm0, %v2775_v10, 0.0 }
 0x49d   : > { %v2735_v16 = vpop.permute.xlu0 %2734 }
 0x49e   : > { %v2739_v24 = vpop.permute.xlu2 %2738 }
 0x49f   : > { %3411 = vperm.xlu1 %3409, %v3410_v1  }
 0x4a1   : > { %v2128_v56 = vpop.f32.mrf.mxu3 }
 0x4a2   : > { %v2212_v61 = vmul.f32 %v5098_v6, %v2128_v56  ;;  %v2776_v56 = vmul.f32 %v2735_v16, %v4255_v7 }
 0x4a4   : > { %v2242_v43 = vsel %vm2214_vm3, %v2212_v61, 0.0  ;;  %v2798_v28 = vsel %vm2786_vm0, %v2776_v56, 0.0  ;;  %v5104_v56 = vld [vmem:[#allocation5_spill] sm:$0xff] }
 0x4a5   : > { %v2243_v32 = vadd.f32 %v2242_v43, %v2241_v51  ;;  %v2778_v43 = vmul.f32 %v2739_v24, %v4267_v50  ;;  %v5105_v24 = vld [vmem:[#allocation6_spill] sm:$0xff] }
 0x4a7   : > { %3426 = vperm.xlu1 %3409, %v3425_v21   ;;  %v2741_v21 = vpop.permute.xlu0 %2740 }
 0x4a8   : > { %v2779_v51 = vmul.f32 %v2741_v21, %v4273_v62  ;;  %v5106_v21 = vld [vmem:[#allocation7_spill] sm:$0xff] }
 0x4a9   : > { %v2131_v55 = vpop.f32.mrf.mxu3 }
 0x4aa   : > { %v2213_v17 = vmul.f32 %v4800_v15, %v2131_v55  ;;  %v2731_v15 = vpop.permute.xlu1 %2730 }
 0x4ab   : > { %v2774_v31 = vmul.f32 %v2731_v15, %v5100_v49 }
 0x4ac   : > { %v2244_v33 = vsel %vm2214_vm3, %v2213_v17, 0.0 }
 0x4ad   : > { %v2245_v60 = vadd.f32 %v2244_v33, %v2243_v32  ;;  %v2794_v3 = vsel %vm2786_vm0, %v2774_v31, 0.0  ;;  %v2745_v33 = vpop.permute.xlu2 %2744 }
 0x4ae   : > { %v2795_v4 = vadd.f32 %v2794_v3, %v2793_v58  ;;  %v2781_v50 = vmul.f32 %v2745_v33, %v4285_v14  ;;  %v5102_v14 = vld [vmem:[#allocation2_spill] sm:$0xff] }
 0x4af   : > { %v2246_v40 = vrot.slane %v2245_v60, 4  ;;  %v2493_v30 = vmul.f32 %v3401_v12, %v5102_v14 }
 0x4b0   : > { %v2797_v61 = vadd.f32 %v2796_v13, %v2795_v4 }
 0x4b1   : > { %v2247_v57 = vadd.f32 %v2246_v40, %v2245_v60  ;;  %v2802_v60 = vsel %vm2786_vm0, %v2778_v43, 0.0  ;;  %v2804_v40 = vsel %vm2786_vm0, %v2779_v51, 0.0  ;;  %v2509_v37 = vadd.f32 %v2494_v44, %v2493_v30  ;;  %v5113_v30 = vld [vmem:[#allocation14_spill] sm:$0xff] }
 0x4b2   : > { %v2737_v38 = vpop.permute.xlu1 %2736  ;;  %v2799_v27 = vadd.f32 %v2798_v28, %v2797_v61 }
 0x4b3   : > { %v2248_v22 = vrot.slane %v2247_v57, 2  ;;  %v2777_v53 = vmul.f32 %v2737_v38, %v4261_v45  ;;  %v2747_v45 = vpop.permute.xlu0 %2746  ;;  %v2808_v38 = vsel %vm2786_vm0, %v2781_v50, 0.0  ;;  %v2510_v31 = vadd.f32 %v2509_v37, %v2495_v63  ;;  %v5115_v37 = vld [vmem:[#allocation16_spill] sm:$0xff] }
 0x4b4   : > { %v2782_v62 = vmul.f32 %v2747_v45, %v4291_v2  ;;  %v5109_v45 = vld [vmem:[#allocation10_spill] sm:$0xff] }
 0x4b5   : > { %v2249_v54 = vadd.f32 %v2248_v22, %v2247_v57  ;;  %v2800_v7 = vsel %vm2786_vm0, %v2777_v53, 0.0  ;;  %v2751_v15 = vpop.permute.xlu2 %2750 }
 0x4b6   : > { %v2801_v17 = vadd.f32 %v2800_v7, %v2799_v27  ;;  %v2810_v42 = vsel %vm2786_vm0, %v2782_v62, 0.0  ;;  %v2784_v2 = vmul.f32 %v2751_v15, %v4333_v0 }
 0x4b7   : > { %v2250_v48 = vrot.slane %v2249_v54, 1 }
 0x4b8   : > { %v2803_v57 = vadd.f32 %v2802_v60, %v2801_v17  ;;  %v2814_v52 = vsel %vm2786_vm0, %v2784_v2, 0.0 }
 0x4b9   : > { %v2251_v8 = vadd.f32 %v2250_v48, %v2249_v54 }
 0x4ba   : > { %v2743_v1 = vpop.permute.xlu1 %2742  ;;  %v2805_v54 = vadd.f32 %v2804_v40, %v2803_v57 }
 0x4bb   : > { %2253 = vst.msk [vmem:[%s528_s24] sm:$0x1] %vm2252_vm14, %v2251_v8  ;;  %v2780_v22 = vmul.f32 %v2743_v1, %v4279_v5  ;;  %v2753_v25 = vpop.permute.xlu0 %2752 }
 0x4bc   : > { %v2785_v1 = vmul.f32 %v2753_v25, %v4369_v20 }
 0x4bd   : > { %v2806_v48 = vsel %vm2786_vm0, %v2780_v22, 0.0  ;;  %v3417_v0 = vpop.permute.xlu2 %3416 }
 0x4be   : > { %v2807_v8 = vadd.f32 %v2806_v48, %v2805_v54  ;;  %v2816_v10 = vsel %vm2786_vm0, %v2785_v1, 0.0  ;;  %v3418_v4 = vunpack.i.l.bf16 %v3417_v0  ;;  %v3419_v61 = vunpack.i.h.bf16 %v3417_v0 }
 0x4c0   : > { %v2809_v5 = vadd.f32 %v2808_v38, %v2807_v8  ;;  %v5110_v8 = vld [vmem:[#allocation11_spill] sm:$0xff]  ;;  %v5111_v38 = vld [vmem:[#allocation12_spill] sm:$0xff] }
 0x4c2   : > { %v2811_v29 = vadd.f32 %v2810_v42, %v2809_v5 }
 0x4c5   : > { %v3432_v50 = vpop.permute.xlu2 %3431 }
 0x4c6   : > { %v3433_v41 = vunpack.i.l.bf16 %v3432_v50 }
 0x4c8   : > { %v2505_v2 = vmul.f32 %v3433_v41, %v5113_v30 }
 0x4f1   : > { %v2405_v11 = vpop.xlane.xlu1 %2404 }
 0x4f2   : > { %v2406_v23 = vrot.slane %v2405_v11, 4 }
 0x4f4   : > { %v2407_v6 = vadd.f32 %v2406_v23, %v2405_v11  ;;  %v2496_v11 = vmul.f32 %v3408_v34, %v5104_v56 }
 0x4f6   : > { %v2408_v47 = vrot.slane %v2407_v6, 2  ;;  %v2511_v23 = vadd.f32 %v2510_v31, %v2496_v11 }
 0x4f8   : > { %v2409_v9 = vadd.f32 %v2408_v47, %v2407_v6  ;;  %v3422_v6 = vpop.permute.xlu0 %3421 }
 0x4f9   : > { %v3423_v43 = vunpack.i.l.bf16 %v3422_v6  ;;  %v3424_v60 = vunpack.i.h.bf16 %v3422_v6 }
 0x4fa   : > { %v2410_v55 = vrot.slane %v2409_v9, 1 }
 0x4fb   : > { %v2501_v22 = vmul.f32 %v3423_v43, %v5109_v45  ;;  %v2502_v19 = vmul.f32 %v3424_v60, %v5110_v8 }
 0x4fc   : > { %v2411_v32 = vadd.f32 %v2410_v55, %v2409_v9  ;;  %v5107_v9 = vld [vmem:[#allocation8_spill] sm:$0xff] }
 0x4fd   : > { %v2499_v7 = vmul.f32 %v3418_v4, %v5107_v9 }
 0x4fe   : > { %3339 = vpush %v2411_v32  ;;  %v5108_v32 = vld [vmem:[#allocation9_spill] sm:$0xff] }
 0x4ff   : > { %v2500_v33 = vmul.f32 %v3419_v61, %v5108_v32 }
 0x500   : > { %v3437_v25 = vpop.permute.xlu0 %3436 }
 0x501   : > { %v3439_v1 = vunpack.i.h.bf16 %v3437_v25 }
 0x509   : > { %v2749_v59 = vpop.permute.xlu1 %2748 }
 0x50a   : > { %v2783_v35 = vmul.f32 %v2749_v59, %v4297_v39  ;;  %v3434_v59 = vunpack.i.h.bf16 %v3432_v50 }
 0x50c   : > { %v2812_v18 = vsel %vm2786_vm0, %v2783_v35, 0.0  ;;  %v3438_v35 = vunpack.i.l.bf16 %v3437_v25  ;;  %v2506_v63 = vmul.f32 %v3434_v59, %v5114_v46 }
 0x50d   : > { %v2813_v16 = vadd.f32 %v2812_v18, %v2811_v29 }
 0x50e   : > { %v2507_v34 = vmul.f32 %v3438_v35, %v5115_v37 }
 0x50f   : > { %v2815_v49 = vadd.f32 %v2814_v52, %v2813_v16  ;;  %v2030_v16 = vpop.f32.mrf.mxu0 }
 0x510   : > { %2034 = vst.msk [vmem:[%s525_s28] sm:$0xff] %vm2033_vm1, %v2030_v16 }
 0x511   : > { %v2817_v58 = vadd.f32 %v2816_v10, %v2815_v49  ;;  %v3412_v39 = vpop.permute.xlu1 %3411  ;;  %v5116_v49 = vld [vmem:[#allocation17_spill] sm:$0xff] }
 0x512   : > { %v3414_v3 = vunpack.i.h.bf16 %v3412_v39  ;;  %v3413_v13 = vunpack.i.l.bf16 %v3412_v39  ;;  %v2508_v31 = vmul.f32 %v3439_v1, %v5116_v49 }
 0x513   : > { %v2818_v20 = vrot.slane %v2817_v58, 4 }
 0x514   : > { %v2497_v28 = vmul.f32 %v3413_v13, %v5105_v24  ;;  %v2498_v53 = vmul.f32 %v3414_v3, %v5106_v21 }
 0x515   : > { %v2819_v26 = vadd.f32 %v2818_v20, %v2817_v58 }
 0x516   : > { %v2512_v47 = vadd.f32 %v2511_v23, %v2497_v28 }
 0x517   : > { %v2820_v27 = vrot.slane %v2819_v26, 2 }
 0x518   : > { %v2513_v51 = vadd.f32 %v2512_v47, %v2498_v53 }
 0x519   : > { %v3427_v55 = vpop.permute.xlu1 %3426  ;;  %v2821_v17 = vadd.f32 %v2820_v27, %v2819_v26 }
 0x51a   : > { %v2514_v40 = vadd.f32 %v2513_v51, %v2499_v7  ;;  %v3428_v48 = vunpack.i.l.bf16 %v3427_v55  ;;  %v3429_v12 = vunpack.i.h.bf16 %v3427_v55 }
 0x51b   : > { %v2822_v57 = vrot.slane %v2821_v17, 1 }
 0x51c   : > { %v2515_v54 = vadd.f32 %v2514_v40, %v2500_v33  ;;  %v2503_v42 = vmul.f32 %v3428_v48, %v5111_v38  ;;  %v2504_v44 = vmul.f32 %v3429_v12, %v5112_v36 }
 0x51d   : > { %v2823_v62 = vadd.f32 %v2822_v57, %v2821_v17 }
 0x51e   : > { %v2516_v15 = vadd.f32 %v2515_v54, %v2501_v22 }
 0x51f   : > { %2825 = vrot.lane.b32.xlu1 %v2823_v62, %s3538_s23 }
 0x520   : > { %v2517_v5 = vadd.f32 %v2516_v15, %v2502_v19 }
 0x522   : > { %v2518_v14 = vadd.f32 %v2517_v5, %v2503_v42 }
 0x524   : > { %v2519_v29 = vadd.f32 %v2518_v14, %v2504_v44 }
 0x526   : > { %v2520_v18 = vadd.f32 %v2519_v29, %v2505_v2 }
 0x528   : > { %v2521_v52 = vadd.f32 %v2520_v18, %v2506_v63 }
 0x52a   : > { %v2522_v10 = vadd.f32 %v2521_v52, %v2507_v34 }
 0x52c   : > { %v2523_v0 = vadd.f32 %v2522_v10, %v2508_v31 }
 0x52e   : > { %v2524_v58 = vrot.slane %v2523_v0, 4 }
 0x52f   : > { %s3340_s20 = spop %3339 }
 0x530   : > { %s2530_s30 = smax.f32 %s3539_s29, %s3340_s20  ;;  %v2525_v39 = vadd.f32 %v2524_v58, %v2523_v0  ;;  %p2547_p4 = scmp.gt.f32.partialorder %s3340_s20, 0.0 }
 0x531   : > { %v2531_v56 = vstv %s2530_s30 }
 0x532   : > { %3511 = vrcp.f32 %v2531_v56  ;;  %v2526_v11 = vrot.slane %v2525_v39, 2  ;;  %v2543_v4 = vand.u32 2147483648, %v2531_v56  ;;  %v2541_v6 = vand.u32 2147483647, %v2531_v56  ;;  %s2548_s16 = scalar_select %p2547_p4, 1, 0 }
 0x533   : > { %vm2537_vm3 = vweird.f32 %v2531_v56 }
 0x534   : > { %v2527_v13 = vadd.f32 %v2526_v11, %v2525_v39  ;;  %v2544_v61 = vor.u32 1.1754944e-38, %v2543_v4  ;;  %vm2542_vm5 = vcmp.eq.f32.partialorder %v2541_v6, 8.507059e+37  ;;  %v2549_v47 = vstv %s2548_s16 }
 0x535   : > { %vm2550_vm6 = vcmp.eq.s32.totalorder %v2549_v47, 1 }
 0x536   : > { %v2528_v24 = vrot.slane %v2527_v13, 1 }
 0x538   : > { %v3512_v3 = vpop.eup %3511  ;;  %v2529_v21 = vadd.f32 %v2528_v24, %v2527_v13 }
 0x539   : > { %v2533_v20 = vmul.f32 %v3512_v3, %v2531_v56  ;;  %vm2538_vm2 = vweird.f32 %v3512_v3 }
 0x53a   : > { %vm2539_vm4 = vmor %vm2537_vm3, %vm2538_vm2 }
 0x53b   : > { %v2534_v23 = vsub.f32 1.0, %v2533_v20 }
 0x53d   : > { %v2535_v28 = vmul.f32 %v3512_v3, %v2534_v23 }
 0x53f   : > { %v2536_v26 = vadd.f32 %v3512_v3, %v2535_v28 }
 0x541   : > { %v2540_v53 = vsel %vm2539_vm4, %v3512_v3, %v2536_v26 }
 0x542   : > { %v2545_v27 = vsel %vm2542_vm5, %v2544_v61, %v2540_v53 }
 0x543   : > { %v2546_v9 = vmul.f32 %v2545_v27, %v2529_v21 }
 0x545   : > { %v2551_v7 = vsel %vm2550_vm6, %v2546_v9, 0.0 }
 0x546   : > { %2552 = vst [vmem:[%s534_s22] sm:$0x1] %v2551_v7 }
 0x591   : > { %v2826_v43 = vpop.permute.xlu1 %2825 }
 0x592   : > { %2829 = vst.msk [vmem:[%s537_s25] sm:$0x1] %vm2828_vm7, %v2826_v43 }
 0x593 PF: > { %s26_s18 = sadd.s32 1, %s3529_s18  }
 0x594   : > { %p23_p5 = scmp.ge.s32.totalorder %s26_s18, 4  }
 0x596   :  { %25 = sbr.rel (!%p23_p5) target bundleno = 1 (0x1), region = 150 }

</bundles_post_ra>
